<compile_context>
chip_gen: v7x
topology: tpu7x:2x2x1
jax: 0.10.0
libtpu: 0.0.40
codegen_flags: <defaults>
</compile_context>

<pallas_src>
import functools
import math

import jax
import jax.numpy as jnp
from jax.experimental import pallas as pl
from jax.experimental.pallas import tpu as pltpu


_SQRT1_2 = 0.7071067811865476
_VMEM_LIMIT = 40 * 1024 * 1024   # explicit scoped-VMEM cap (v7x-safe)


def _round_up(x, m):
    return (x + m - 1) // m * m


# ----------------------------------------------------------------------------
# In-kernel math helpers
# ----------------------------------------------------------------------------

def _erf(x):
    # TODO(synk): lax.erf may not lower under Mosaic; use Abramowitz-Stegun
    # 7.1.26 (|err| < 1.5e-7, i.e. f32 accuracy) to match erf-exact F.gelu.
    p = 0.3275911
    a1, a2, a3, a4, a5 = (0.254829592, -0.284496736, 1.421413741,
                          -1.453152027, 1.061405429)
    sgn = jnp.where(x >= 0.0, 1.0, -1.0)
    ax = jnp.abs(x)
    t = 1.0 / (1.0 + p * ax)
    poly = ((((a5 * t + a4) * t + a3) * t + a2) * t + a1) * t
    return sgn * (1.0 - poly * jnp.exp(-ax * ax))


def _silu(x):
    return x * (1.0 / (1.0 + jnp.exp(-x)))


def _gelu(x):
    return 0.5 * x * (1.0 + _erf(x * _SQRT1_2))


def _dequant(w_ref):
    """int8 weight block -> bf16 values (scale applied later in the epilogue)."""
    return w_ref[...].astype(jnp.float32).astype(jnp.bfloat16)


def _layernorm_rows(x, gamma, beta, eps=1e-5):
    """Row-wise LayerNorm of a (TM, K) block; stats in f32, returns bf16."""
    xf = x.astype(jnp.float32)
    mu = jnp.mean(xf, axis=-1, keepdims=True)
    d = xf - mu
    var = jnp.mean(d * d, axis=-1, keepdims=True)
    return (d * jax.lax.rsqrt(var + eps) * gamma + beta).astype(jnp.bfloat16)


# ----------------------------------------------------------------------------
# Matmul tiling (shared by build-time weight padding and the kernel wrappers)
# ----------------------------------------------------------------------------

def _mm_tiles(K, N):
    """Return (Kp, Np, TK, TN): padded sizes + tile sizes for y = x @ w."""
    if K <= 3072:                       # single k-step for every K <= 3072
        Kp = _round_up(K, 32)           # 32: int8 sublane packing
        TK = Kp
    else:
        TK = None
        for cand in (2048, 1920, 1536, 1280, 1152, 1024):
            if K % cand == 0:
                TK, Kp = cand, K
                break
        if TK is None:
            TK = 1024
            Kp = _round_up(K, TK)
    if N <= 1280:
        TN, Np = N, N
    elif N % 640 == 0:
        TN, Np = 640, N
    elif N % 512 == 0:
        TN, Np = 512, N
    else:
        TN = 512
        Np = _round_up(N, TN)
    return Kp, Np, TK, TN


def _weight_spec(TK, TN, k_steps):
    imap = lambda i, j, k: (k, j)
    if k_steps >= 3:
        try:   # deeper buffering on the streamed weight when there are k-steps
            return pl.BlockSpec((TK, TN), imap, pipeline_mode=pl.Buffered(3))
        except Exception:   # pipeline_mode unavailable -> default double buffer
            pass
    return pl.BlockSpec((TK, TN), imap)


# ----------------------------------------------------------------------------
# Pallas kernels
# ----------------------------------------------------------------------------

def _matmul_kernel(*refs, act, has_res, has_ln, single_k):
    idx = 0
    x_ref = refs[idx]; idx += 1
    if has_ln:
        lng_ref, lnb_ref = refs[idx], refs[idx + 1]; idx += 2
    w_ref, s_ref, b_ref = refs[idx], refs[idx + 1], refs[idx + 2]; idx += 3
    if has_res:
        r_ref = refs[idx]; idx += 1
    o_ref = refs[idx]; idx += 1
    acc_ref = None if single_k else refs[idx]

    x = x_ref[...]
    if has_ln:
        x = _layernorm_rows(x, lng_ref[...], lnb_ref[...])
    part = jnp.dot(x, _dequant(w_ref), preferred_element_type=jnp.float32)

    def _epilogue(acc):
        y = acc * s_ref[...] + b_ref[...]
        if act == "silu":
            y = _silu(y)
        if has_res:
            y = y + r_ref[...].astype(jnp.float32)
        o_ref[...] = y.astype(o_ref.dtype)

    if single_k:
        _epilogue(part)                 # no zero-init, no RMW, single store
    else:
        @pl.when(pl.program_id(2) == 0)
        def _():
            acc_ref[...] = part

        @pl.when(pl.program_id(2) != 0)
        def _():
            acc_ref[...] += part

        @pl.when(pl.program_id(2) == pl.num_programs(2) - 1)
        def _():
            _epilogue(acc_ref[...])


def pallas_matmul(x, p, act="none", residual=None, ln=None,
                  out_dtype=jnp.bfloat16):
    """y[:M,:N] = act((x|LN(x)) @ dequant(w) + b) (+ residual).

    p = {"w": int8 (Kp,Np), "s": f32 (1,Np) dequant scale, "b": f32 (N,)}.
    """
    w, s, b = p["w"], p["s"], p["b"]
    M, K = x.shape
    Kp, Np = w.shape
    N = b.shape[0]
    kp2, np2, TK, TN = _mm_tiles(K, N)
    assert (Kp, Np) == (kp2, np2), (K, N, w.shape)
    TM = min(256, _round_up(M, 16))
    Mp = _round_up(M, TM)
    grid = (Mp // TM, Np // TN, Kp // TK)
    single_k = grid[2] == 1
    if ln is not None:
        assert single_k and Kp == K, (K, Kp)

    xp = jnp.pad(x, ((0, Mp - M), (0, Kp - K))).astype(jnp.bfloat16)
    bp = jnp.pad(b, (0, Np - N)).reshape(1, Np)

    in_specs = [pl.BlockSpec((TM, TK), lambda i, j, k: (i, k))]
    args = [xp]
    if ln is not None:
        in_specs += [pl.BlockSpec((1, TK), lambda i, j, k: (0, k))] * 2
        args += [ln[0].reshape(1, Kp), ln[1].reshape(1, Kp)]
    in_specs += [
        _weight_spec(TK, TN, grid[2]),
        pl.BlockSpec((1, TN), lambda i, j, k: (0, j)),
        pl.BlockSpec((1, TN), lambda i, j, k: (0, j)),
    ]
    args += [w, s, bp]
    if residual is not None:
        rp = jnp.pad(residual, ((0, Mp - M), (0, Np - N)))
        in_specs.append(pl.BlockSpec((TM, TN), lambda i, j, k: (i, j)))
        args.append(rp)

    scratch = [] if single_k else [pltpu.VMEM((TM, TN), jnp.float32)]

    out = pl.pallas_call(
        functools.partial(_matmul_kernel, act=act,
                          has_res=residual is not None,
                          has_ln=ln is not None, single_k=single_k),
        out_shape=jax.ShapeDtypeStruct((Mp, Np), out_dtype),
        grid=grid,
        in_specs=in_specs,
        out_specs=pl.BlockSpec((TM, TN), lambda i, j, k: (i, j)),
        scratch_shapes=scratch,
        compiler_params=pltpu.CompilerParams(
            dimension_semantics=("parallel", "parallel", "arbitrary"),
            vmem_limit_bytes=_VMEM_LIMIT),
    )(*args)
    return out[:M, :N]


def _matmul_geglu_kernel(*refs, has_ln):
    idx = 0
    x_ref = refs[idx]; idx += 1
    if has_ln:
        lng_ref, lnb_ref = refs[idx], refs[idx + 1]; idx += 2
    wa_ref, wg_ref, sa_ref, sg_ref, ba_ref, bg_ref, o_ref = refs[idx:idx + 7]

    x = x_ref[...]
    if has_ln:
        x = _layernorm_rows(x, lng_ref[...], lnb_ref[...])
    a = jnp.dot(x, _dequant(wa_ref), preferred_element_type=jnp.float32)
    g = jnp.dot(x, _dequant(wg_ref), preferred_element_type=jnp.float32)
    a = a * sa_ref[...] + ba_ref[...]
    g = g * sg_ref[...] + bg_ref[...]
    o_ref[...] = (a * _gelu(g)).astype(o_ref.dtype)


def pallas_matmul_geglu(x, p, ln=None, out_dtype=jnp.bfloat16):
    """Fused GEGLU: (LN(x)@wa+ba) * gelu(LN(x)@wg+bg).  Always single-k."""
    M, K = x.shape
    Kp, Np = p["wa"].shape
    N = p["ba"].shape[0]
    kp2, np2, TK, TN = _mm_tiles(K, N)
    assert (Kp, Np) == (kp2, np2) and TK == Kp, (K, N)
    if ln is not None:
        assert Kp == K
    TM = min(256, _round_up(M, 16))
    Mp = _round_up(M, TM)
    grid = (Mp // TM, Np // TN)

    xp = jnp.pad(x, ((0, Mp - M), (0, Kp - K))).astype(jnp.bfloat16)
    bap = jnp.pad(p["ba"], (0, Np - N)).reshape(1, Np)
    bgp = jnp.pad(p["bg"], (0, Np - N)).reshape(1, Np)

    in_specs = [pl.BlockSpec((TM, TK), lambda i, j: (i, 0))]
    args = [xp]
    if ln is not None:
        in_specs += [pl.BlockSpec((1, TK), lambda i, j: (0, 0))] * 2
        args += [ln[0].reshape(1, Kp), ln[1].reshape(1, Kp)]
    in_specs += [
        pl.BlockSpec((TK, TN), lambda i, j: (0, j)),
        pl.BlockSpec((TK, TN), lambda i, j: (0, j)),
        pl.BlockSpec((1, TN), lambda i, j: (0, j)),
        pl.BlockSpec((1, TN), lambda i, j: (0, j)),
        pl.BlockSpec((1, TN), lambda i, j: (0, j)),
        pl.BlockSpec((1, TN), lambda i, j: (0, j)),
    ]
    args += [p["wa"], p["wg"], p["sa"], p["sg"], bap, bgp]

    out = pl.pallas_call(
        functools.partial(_matmul_geglu_kernel, has_ln=ln is not None),
        out_shape=jax.ShapeDtypeStruct((Mp, Np), out_dtype),
        grid=grid,
        in_specs=in_specs,
        out_specs=pl.BlockSpec((TM, TN), lambda i, j: (i, j)),
        compiler_params=pltpu.CompilerParams(
            dimension_semantics=("parallel", "parallel"),
            vmem_limit_bytes=_VMEM_LIMIT),
    )(*args)
    return out[:M, :N]


def _groupnorm_kernel(x_ref, g_ref, b_ref, o_ref, *, eps, act):
    x = x_ref[...].astype(jnp.float32)               # (G, Cg*HW), lane-dense
    mu = jnp.mean(x, axis=-1, keepdims=True)
    d = x - mu
    var = jnp.mean(d * d, axis=-1, keepdims=True)
    y = d * jax.lax.rsqrt(var + eps) * g_ref[...] + b_ref[...]
    if act == "silu":
        y = _silu(y)
    o_ref[...] = y.astype(o_ref.dtype)


def pallas_groupnorm(x, gamma, beta, *, eps=1e-5, act="none", num_groups=32,
                     out_dtype=jnp.bfloat16):
    N, C, H, W = x.shape
    G = num_groups
    Cg, HW = C // G, H * W
    L = Cg * HW
    x3 = x.reshape(N, G, L)                          # pure reshape from NCHW
    gb = jnp.broadcast_to(gamma.reshape(G, Cg, 1), (G, Cg, HW)).reshape(G, L)
    bb = jnp.broadcast_to(beta.reshape(G, Cg, 1), (G, Cg, HW)).reshape(G, L)
    out = pl.pallas_call(
        functools.partial(_groupnorm_kernel, eps=eps, act=act),
        out_shape=jax.ShapeDtypeStruct((N, G, L), out_dtype),
        grid=(N,),
        in_specs=[
            pl.BlockSpec((None, G, L), lambda n: (n, 0, 0)),
            pl.BlockSpec((G, L), lambda n: (0, 0)),
            pl.BlockSpec((G, L), lambda n: (0, 0)),
        ],
        out_specs=pl.BlockSpec((None, G, L), lambda n: (n, 0, 0)),
        compiler_params=pltpu.CompilerParams(
            dimension_semantics=("parallel",),
            vmem_limit_bytes=_VMEM_LIMIT),
    )(x3, gb, bb)
    return out.reshape(N, C, H, W)


def _attention_kernel(q_ref, k_ref, v_ref, o_ref):
    # One head per grid step.  1/sqrt(dh) is pre-folded into the q-projection
    # dequant scale at build time, so no scaling happens here.
    q = q_ref[...]                                   # (1, S, dh) bf16
    k = k_ref[...]                                   # (1, Skv, dh) bf16
    s = jnp.einsum("bqd,bkd->bqk", q, k, preferred_element_type=jnp.float32)
    m = jnp.max(s, axis=-1, keepdims=True)
    p = jnp.exp(s - m)
    p = p / jnp.sum(p, axis=-1, keepdims=True)       # exact division
    o_ref[...] = jnp.einsum("bqk,bkd->bqd", p.astype(v_ref.dtype), v_ref[...],
                            preferred_element_type=jnp.float32
                            ).astype(o_ref.dtype)


def pallas_attention(q, k, v):
    """softmax(q k^T) v, one head per grid step (heads run in parallel)."""
    BH, S, dh = q.shape
    Skv = k.shape[1]
    return pl.pallas_call(
        _attention_kernel,
        out_shape=jax.ShapeDtypeStruct((BH, S, dh), q.dtype),
        grid=(BH,),
        in_specs=[
            pl.BlockSpec((1, S, dh), lambda b: (b, 0, 0)),
            pl.BlockSpec((1, Skv, dh), lambda b: (b, 0, 0)),
            pl.BlockSpec((1, Skv, dh), lambda b: (b, 0, 0)),
        ],
        out_specs=pl.BlockSpec((1, S, dh), lambda b: (b, 0, 0)),
        compiler_params=pltpu.CompilerParams(
            dimension_semantics=("parallel",),
            vmem_limit_bytes=_VMEM_LIMIT),
    )(q, k, v)


# ----------------------------------------------------------------------------
# Conv / layer forwards (thin glue feeding the Pallas kernels)
# ----------------------------------------------------------------------------

def conv2d(x, p, *, kh, kw, stride, padding, out_dtype=jnp.bfloat16):
    """NCHW conv via im2col + Pallas matmul.  p holds the int8 weight/scale."""
    N, Cin, H, W = x.shape
    Cout = p["b"].shape[0]
    OH = (H + 2 * padding - kh) // stride + 1
    OW = (W + 2 * padding - kw) // stride + 1
    if kh == 1 and kw == 1 and stride == 1 and padding == 0:
        xcol = x.transpose(0, 2, 3, 1).reshape(N * H * W, Cin)
    else:
        xp = jnp.pad(x, ((0, 0), (0, 0), (padding, padding), (padding, padding)))
        cols = [xp[:, :, i:i + stride * OH:stride, j:j + stride * OW:stride]
                for i in range(kh) for j in range(kw)]
        patches = jnp.stack(cols, axis=-1)           # (N,Cin,OH,OW,kh*kw)
        patches = patches.transpose(0, 2, 3, 1, 4)   # (N,OH,OW,Cin,kh*kw)
        xcol = patches.reshape(N * OH * OW, Cin * kh * kw)
    y = pallas_matmul(xcol, p, out_dtype=out_dtype)
    return y.reshape(N, OH, OW, Cout).transpose(0, 3, 1, 2)


def time_embedding_fwd(p, t):
    h = pallas_matmul(t, p["l1"], act="silu", out_dtype=jnp.float32)
    # NOTE: the F.silu(time) applied inside every UNET_ResidualBlock is hoisted
    # here (the time embedding is only ever consumed through that silu), so the
    # per-block silu dispatch disappears and the overall output is unchanged.
    return pallas_matmul(h, p["l2"], act="silu", out_dtype=jnp.float32)


def resblock_fwd(p, feature, time_emb_silu):
    residue = feature
    h = pallas_groupnorm(feature, p["gn1_g"], p["gn1_b"], eps=1e-5, act="silu")
    h = conv2d(h, p["conv_feat"], kh=3, kw=3, stride=1, padding=1)
    t = pallas_matmul(time_emb_silu, p["lin_time"])
    merged = h + t[:, :, None, None]
    merged = pallas_groupnorm(merged, p["gn2_g"], p["gn2_b"], eps=1e-5,
                              act="silu")
    merged = conv2d(merged, p["conv_merged"], kh=3, kw=3, stride=1, padding=1)
    if p["residual"] is None:
        res = residue
    else:
        res = conv2d(residue, p["residual"], kh=1, kw=1, stride=1, padding=0)
    return merged + res


def _split_heads(t, B, S, H, dh):
    return t.reshape(B, S, H, dh).transpose(0, 2, 1, 3).reshape(B * H, S, dh)


def _merge_heads(t, B, S, H, dh):
    return t.reshape(B, H, S, dh).transpose(0, 2, 1, 3).reshape(B * S, H * dh)


def attnblock_fwd(p, x, context, n_heads):
    residue_long = x
    N, C, H, W = x.shape
    S = H * W
    dh = C // n_heads

    h = pallas_groupnorm(x, p["gn_g"], p["gn_b"], eps=1e-6, act="none")
    h = h.reshape(N, C, S).transpose(0, 2, 1).reshape(N * S, C)  # tokens (bf16)
    h = pallas_matmul(h, p["conv_in"])                           # 1x1 conv

    # self-attention (LayerNorm fused into the qkv matmul, residual add fused
    # into the out_proj epilogue, 1/sqrt(dh) pre-folded into the q weight scale)
    res = h
    qkv = pallas_matmul(h, p["attn1"]["in_proj"],
                        ln=(p["ln1_g"], p["ln1_b"]))
    q, k, v = jnp.split(qkv, 3, axis=-1)
    o = pallas_attention(_split_heads(q, N, S, n_heads, dh),
                         _split_heads(k, N, S, n_heads, dh),
                         _split_heads(v, N, S, n_heads, dh))
    o = _merge_heads(o, N, S, n_heads, dh)
    h = pallas_matmul(o, p["attn1"]["out_proj"], residual=res)

    # cross-attention (k/v projections merged into one weight stream)
    res = h
    Sk = context.shape[1]
    ctx2 = context.reshape(N * Sk, context.shape[2])
    q = pallas_matmul(h, p["attn2"]["q_proj"], ln=(p["ln2_g"], p["ln2_b"]))
    kv = pallas_matmul(ctx2, p["attn2"]["kv_proj"])
    k, v = jnp.split(kv, 2, axis=-1)
    o = pallas_attention(_split_heads(q, N, S, n_heads, dh),
                         _split_heads(k, N, Sk, n_heads, dh),
                         _split_heads(v, N, Sk, n_heads, dh))
    o = _merge_heads(o, N, S, n_heads, dh)
    h = pallas_matmul(o, p["attn2"]["out_proj"], residual=res)

    # GEGLU FFN (LayerNorm + split + gelu + multiply fused in one kernel)
    res = h
    g = pallas_matmul_geglu(h, p["geglu1"], ln=(p["ln3_g"], p["ln3_b"]))
    h = pallas_matmul(g, p["geglu2"], residual=res)

    h = pallas_matmul(h, p["conv_out"])                          # 1x1 conv
    h = h.reshape(N, S, C).transpose(0, 2, 1).reshape(N, C, H, W)
    return h + residue_long


def upsample_fwd(p, x):
    x = jnp.repeat(jnp.repeat(x, 2, axis=2), 2, axis=3)          # nearest x2
    return conv2d(x, p["conv"], kh=3, kw=3, stride=1, padding=1)


def final_fwd(p, x):
    h = pallas_groupnorm(x, p["gn_g"], p["gn_b"], eps=1e-5, act="silu")
    return conv2d(h, p["conv"], kh=3, kw=3, stride=1, padding=1,
                  out_dtype=jnp.float32)


# Per-block jit: identical block signatures share compiles; host compile memory
# stays bounded (no single whole-UNet XLA module).
_conv_j = jax.jit(conv2d, static_argnames=("kh", "kw", "stride", "padding"))
_res_j = jax.jit(resblock_fwd)
_attn_j = jax.jit(attnblock_fwd, static_argnums=(3,))
_up_j = jax.jit(upsample_fwd)
_time_j = jax.jit(time_embedding_fwd)
_final_j = jax.jit(final_fwd)


# ----------------------------------------------------------------------------
# UNET architecture (static structure; params built to mirror it)
# ----------------------------------------------------------------------------

ENC_ARCH = [
    [("conv", 4, 320, 3, 1, 1)],
    [("res", 320, 320), ("attn", 8, 40)],
    [("res", 320, 320), ("attn", 8, 40)],
    [("conv", 320, 320, 3, 2, 1)],
    [("res", 320, 640), ("attn", 8, 80)],
    [("res", 640, 640), ("attn", 8, 80)],
    [("conv", 640, 640, 3, 2, 1)],
    [("res", 640, 1280), ("attn", 8, 160)],
    [("res", 1280, 1280), ("attn", 8, 160)],
    [("conv", 1280, 1280, 3, 2, 1)],
    [("res", 1280, 1280)],
    [("res", 1280, 1280)],
]
BOTTLENECK_ARCH = [("res", 1280, 1280), ("attn", 8, 160), ("res", 1280, 1280)]
DEC_ARCH = [
    [("res", 2560, 1280)],
    [("res", 2560, 1280)],
    [("res", 2560, 1280), ("up", 1280)],
    [("res", 2560, 1280), ("attn", 8, 160)],
    [("res", 2560, 1280), ("attn", 8, 160)],
    [("res", 1920, 1280), ("attn", 8, 160), ("up", 1280)],
    [("res", 1920, 640), ("attn", 8, 80)],
    [("res", 1280, 640), ("attn", 8, 80)],
    [("res", 960, 640), ("attn", 8, 80), ("up", 640)],
    [("res", 960, 320), ("attn", 8, 40)],
    [("res", 640, 320), ("attn", 8, 40)],
    [("res", 640, 320), ("attn", 8, 40)],
]


def apply_layer(desc, p, x, context, time_emb):
    kind = desc[0]
    if kind == "conv":
        return _conv_j(x, p, kh=desc[3], kw=desc[3],
                       stride=desc[4], padding=desc[5])
    if kind == "res":
        return _res_j(p, x, time_emb)
    if kind == "attn":
        return _attn_j(p, x, context, desc[1])
    if kind == "up":
        return _up_j(p, x)
    raise ValueError(kind)


def diffusion_forward(params, latent, context, time):
    t_emb = _time_j(params["time_emb"], time)        # (1, 1280), silu-hoisted
    x = latent
    skips = []
    for blk_arch, blk_p in zip(ENC_ARCH, params["encoders"]):
        for desc, p in zip(blk_arch, blk_p):
            x = apply_layer(desc, p, x, context, t_emb)
        skips.append(x)
    for desc, p in zip(BOTTLENECK_ARCH, params["bottleneck"]):
        x = apply_layer(desc, p, x, context, t_emb)
    for blk_arch, blk_p in zip(DEC_ARCH, params["decoders"]):
        x = jnp.concatenate([x, skips.pop()], axis=1)
        for desc, p in zip(blk_arch, blk_p):
            x = apply_layer(desc, p, x, context, t_emb)
    return _final_j(params["final"], x)


# ----------------------------------------------------------------------------
# Deterministic synthetic parameters: int8 weights pre-flattened / pre-padded
# to their tiled shapes + per-output-channel f32 dequant scales (built once;
# no weight reshape / pad / quantize runs per forward).
# ----------------------------------------------------------------------------

class _ParamGen:
    def __init__(self, seed):
        self._key = jax.random.PRNGKey(seed)

    def take(self, shape, scale, dtype=jnp.float32):
        self._key, sub = jax.random.split(self._key)
        return jax.random.normal(sub, shape, dtype) * scale


def _linear(pg, din, dout, bias=True, col_scale=None):
    """Weight-only int8 linear: w int8 (Kp,Np), dequant scale f32 (1,Np)
    (extra per-column multipliers such as 1/sqrt(dh) folded in), bias f32 at
    its true size (keeps the static output dim visible under jit)."""
    Kp, Np, _, _ = _mm_tiles(din, dout)
    w = pg.take((din, dout), 1.0 / math.sqrt(din), jnp.float32)
    amax = jnp.maximum(jnp.max(jnp.abs(w), axis=0, keepdims=True), 1e-6)
    s = amax / 127.0
    wq = jnp.clip(jnp.round(w / s), -127, 127).astype(jnp.int8)
    if col_scale is not None:
        s = s * jnp.asarray(col_scale, jnp.float32).reshape(1, dout)
    wq = jnp.pad(wq, ((0, Kp - din), (0, Np - dout)))
    s = jnp.pad(s, ((0, 0), (0, Np - dout)))
    if bias:
        b = pg.take((dout,), 0.01, jnp.float32)
    else:
        b = jnp.zeros((dout,), jnp.float32)
    return {"w": wq, "s": s, "b": b}


def _conv(pg, cin, cout, k):
    # corresponds to a torch (cout, cin, k, k) kernel flattened as
    # w.reshape(cout, cin*k*k).T, matching the im2col column order (cin, kh*kw)
    return _linear(pg, cin * k * k, cout)


def _norm_affine(c):
    return jnp.ones((c,), jnp.float32), jnp.zeros((c,), jnp.float32)


def _res_params(pg, cin, cout):
    g1, b1 = _norm_affine(cin)
    g2, b2 = _norm_affine(cout)
    return {"gn1_g": g1, "gn1_b": b1,
            "conv_feat": _conv(pg, cin, cout, 3),
            "lin_time": _linear(pg, 1280, cout),
            "gn2_g": g2, "gn2_b": b2,
            "conv_merged": _conv(pg, cout, cout, 3),
            "residual": None if cin == cout else _conv(pg, cin, cout, 1)}


def _attn_params(pg, n_head, n_embd, d_context=768):
    c = n_head * n_embd
    qscale = 1.0 / math.sqrt(n_embd)                 # folded into q weight scale
    gn_g, gn_b = _norm_affine(c)
    l1g, l1b = _norm_affine(c)
    l2g, l2b = _norm_affine(c)
    l3g, l3b = _norm_affine(c)
    in_cols = jnp.concatenate([jnp.full((c,), qscale, jnp.float32),
                               jnp.ones((2 * c,), jnp.float32)])
    ga = _linear(pg, c, 4 * c)   # GEGLU first half  ("x")
    gg = _linear(pg, c, 4 * c)   # GEGLU second half ("gate")
    return {"gn_g": gn_g, "gn_b": gn_b,
            "conv_in": _conv(pg, c, c, 1),
            "ln1_g": l1g, "ln1_b": l1b,
            "attn1": {"in_proj": _linear(pg, c, 3 * c, bias=False,
                                         col_scale=in_cols),
                      "out_proj": _linear(pg, c, c)},
            "ln2_g": l2g, "ln2_b": l2b,
            "attn2": {"q_proj": _linear(pg, c, c, bias=False,
                                        col_scale=jnp.full((c,), qscale,
                                                           jnp.float32)),
                      "kv_proj": _linear(pg, d_context, 2 * c, bias=False),
                      "out_proj": _linear(pg, c, c)},
            "ln3_g": l3g, "ln3_b": l3b,
            "geglu1": {"wa": ga["w"], "sa": ga["s"], "ba": ga["b"],
                       "wg": gg["w"], "sg": gg["s"], "bg": gg["b"]},
            "geglu2": _linear(pg, 4 * c, c),
            "conv_out": _conv(pg, c, c, 1)}


def _layer_params(pg, desc):
    kind = desc[0]
    if kind == "conv":
        _, cin, cout, k, _, _ = desc
        return _conv(pg, cin, cout, k)
    if kind == "res":
        return _res_params(pg, desc[1], desc[2])
    if kind == "attn":
        return _attn_params(pg, desc[1], desc[2])
    if kind == "up":
        return {"conv": _conv(pg, desc[1], desc[1], 3)}
    raise ValueError(kind)


def build_params(seed=0):
    pg = _ParamGen(seed)
    g, b = _norm_affine(320)
    return {
        "time_emb": {"l1": _linear(pg, 320, 1280), "l2": _linear(pg, 1280, 1280)},
        "encoders": [[_layer_params(pg, d) for d in blk] for blk in ENC_ARCH],
        "bottleneck": [_layer_params(pg, d) for d in BOTTLENECK_ARCH],
        "decoders": [[_layer_params(pg, d) for d in blk] for blk in DEC_ARCH],
        "final": {"gn_g": g, "gn_b": b, "conv": _conv(pg, 320, 4, 3)},
    }


# ----------------------------------------------------------------------------
# Main
# ----------------------------------------------------------------------------

if __name__ == "__main__":
    key = jax.random.PRNGKey(0)
    k_lat, k_ctx, k_time = jax.random.split(key, 3)
    latent = jax.random.normal(k_lat, (1, 4, 16, 16), jnp.float32)    # NCHW
    context = jax.random.normal(k_ctx, (1, 8, 768), jnp.float32)      # (B,S,Dctx)
    time = jax.random.normal(k_time, (1, 320), jnp.float32)           # (1, 320)

    params = build_params(seed=1234)

    out = diffusion_forward(params, latent, context, time)
    out = jax.block_until_ready(out)
    assert out.shape == (1, 4, 16, 16)
    assert out.dtype == jnp.float32
    print("KERNEL_OK")
</pallas_src>

<mosaic_0001>
module attributes {stable_mosaic.version = 11 : i64} {
  func.func @_matmul_kernel(%arg0: i32, %arg1: i32, %arg2: i32, %arg3: memref<16x320xbf16, #tpu.memory_space<vmem>>, %arg4: memref<320x1280xi8, #tpu.memory_space<vmem>>, %arg5: memref<1x1280xf32, #tpu.memory_space<vmem>>, %arg6: memref<1x1280xf32, #tpu.memory_space<vmem>>, %arg7: memref<16x1280xf32, #tpu.memory_space<vmem>>) attributes {dimension_semantics = [#tpu.dimension_semantics<parallel>, #tpu.dimension_semantics<parallel>, #tpu.dimension_semantics<arbitrary>], iteration_bounds = array<i64: 1, 1, 1>, scalar_prefetch = 0 : i64, scratch_operands = 0 : i64, tpu.core_type = #tpu.core_type<tc>, window_params = [{transform_indices = @transform_0, window_bounds = array<i64: 16, 320>}, {transform_indices = @transform_1, window_bounds = array<i64: 320, 1280>}, {transform_indices = @transform_2, window_bounds = array<i64: 1, 1280>}, {transform_indices = @transform_3, window_bounds = array<i64: 1, 1280>}, {transform_indices = @transform_4, window_bounds = array<i64: 16, 1280>}]} {
    %c0 = arith.constant 0 : index
    %c0_0 = arith.constant 0 : index
    %0 = vector.load %arg3[%c0, %c0_0] : memref<16x320xbf16, #tpu.memory_space<vmem>>, vector<16x320xbf16>
    %c0_1 = arith.constant 0 : index
    %c0_2 = arith.constant 0 : index
    %1 = vector.load %arg4[%c0_1, %c0_2] : memref<320x1280xi8, #tpu.memory_space<vmem>>, vector<320x1280xi8>
    %2 = arith.sitofp %1 : vector<320x1280xi8> to vector<320x1280xf32>
    %3 = arith.truncf %2 : vector<320x1280xf32> to vector<320x1280xbf16>
    %cst = arith.constant dense<0.000000e+00> : vector<16x1280xf32>
    %4 = tpu.matmul %0, %3, %cst {dimension_numbers = #tpu.dot_dimension_numbers<[1], [0], [0], [1], [0, 0, 1, 1], [], []>} : vector<16x320xbf16>, vector<320x1280xbf16>, vector<16x1280xf32> -> vector<16x1280xf32>
    %c0_3 = arith.constant 0 : index
    %c0_4 = arith.constant 0 : index
    %5 = vector.load %arg5[%c0_3, %c0_4] : memref<1x1280xf32, #tpu.memory_space<vmem>>, vector<1x1280xf32>
    %6 = vector.broadcast %5 : vector<1x1280xf32> to vector<16x1280xf32>
    %7 = arith.mulf %4, %6 : vector<16x1280xf32>
    %c0_5 = arith.constant 0 : index
    %c0_6 = arith.constant 0 : index
    %8 = vector.load %arg6[%c0_5, %c0_6] : memref<1x1280xf32, #tpu.memory_space<vmem>>, vector<1x1280xf32>
    %9 = vector.broadcast %8 : vector<1x1280xf32> to vector<16x1280xf32>
    %10 = arith.addf %7, %9 : vector<16x1280xf32>
    %cst_7 = arith.constant 0.000000e+00 : f32
    %11 = vector.broadcast %cst_7 : f32 to vector<16x1280xf32>
    %12 = arith.subf %11, %10 : vector<16x1280xf32>
    %13 = math.exp %12 : vector<16x1280xf32>
    %cst_8 = arith.constant 1.000000e+00 : f32
    %14 = vector.broadcast %cst_8 : f32 to vector<16x1280xf32>
    %15 = arith.addf %14, %13 : vector<16x1280xf32>
    %cst_9 = arith.constant 1.000000e+00 : f32
    %16 = vector.broadcast %cst_9 : f32 to vector<16x1280xf32>
    %17 = arith.divf %16, %15 : vector<16x1280xf32>
    %18 = arith.mulf %10, %17 : vector<16x1280xf32>
    %c0_10 = arith.constant 0 : index
    %c0_11 = arith.constant 0 : index
    %19 = vector.load %arg7[%c0_10, %c0_11] : memref<16x1280xf32, #tpu.memory_space<vmem>>, vector<16x1280xf32>
    tpu.vector_store %arg7[%c0_10, %c0_11], %18 {strides = array<i32>} : memref<16x1280xf32, #tpu.memory_space<vmem>>, vector<16x1280xf32>,
    return
  }
  func.func @transform_0(%arg0: i32, %arg1: i32, %arg2: i32) -> (i32, i32) {
    %c0_i32 = arith.constant 0 : i32
    return %arg0, %arg2 : i32, i32
  }
  func.func @transform_1(%arg0: i32, %arg1: i32, %arg2: i32) -> (i32, i32) {
    %c0_i32 = arith.constant 0 : i32
    return %arg2, %arg1 : i32, i32
  }
  func.func @transform_2(%arg0: i32, %arg1: i32, %arg2: i32) -> (i32, i32) {
    %c0_i32 = arith.constant 0 : i32
    %c0_i32_0 = arith.constant 0 : i32
    return %c0_i32, %arg1 : i32, i32
  }
  func.func @transform_3(%arg0: i32, %arg1: i32, %arg2: i32) -> (i32, i32) {
    %c0_i32 = arith.constant 0 : i32
    %c0_i32_0 = arith.constant 0 : i32
    return %c0_i32, %arg1 : i32, i32
  }
  func.func @transform_4(%arg0: i32, %arg1: i32, %arg2: i32) -> (i32, i32) {
    %c0_i32 = arith.constant 0 : i32
    return %arg0, %arg1 : i32, i32
  }
}

module attributes {stable_mosaic.version = 11 : i64} {
  func.func @_matmul_kernel(%arg0: i32, %arg1: i32, %arg2: i32, %arg3: memref<16x1280xbf16, #tpu.memory_space<vmem>>, %arg4: memref<1280x1280xi8, #tpu.memory_space<vmem>>, %arg5: memref<1x1280xf32, #tpu.memory_space<vmem>>, %arg6: memref<1x1280xf32, #tpu.memory_space<vmem>>, %arg7: memref<16x1280xf32, #tpu.memory_space<vmem>>) attributes {dimension_semantics = [#tpu.dimension_semantics<parallel>, #tpu.dimension_semantics<parallel>, #tpu.dimension_semantics<arbitrary>], iteration_bounds = array<i64: 1, 1, 1>, scalar_prefetch = 0 : i64, scratch_operands = 0 : i64, tpu.core_type = #tpu.core_type<tc>, window_params = [{transform_indices = @transform_0, window_bounds = array<i64: 16, 1280>}, {transform_indices = @transform_1, window_bounds = array<i64: 1280, 1280>}, {transform_indices = @transform_2, window_bounds = array<i64: 1, 1280>}, {transform_indices = @transform_3, window_bounds = array<i64: 1, 1280>}, {transform_indices = @transform_4, window_bounds = array<i64: 16, 1280>}]} {
    %c0 = arith.constant 0 : index
    %c0_0 = arith.constant 0 : index
    %0 = vector.load %arg3[%c0, %c0_0] : memref<16x1280xbf16, #tpu.memory_space<vmem>>, vector<16x1280xbf16>
    %c0_1 = arith.constant 0 : index
    %c0_2 = arith.constant 0 : index
    %1 = vector.load %arg4[%c0_1, %c0_2] : memref<1280x1280xi8, #tpu.memory_space<vmem>>, vector<1280x1280xi8>
    %2 = arith.sitofp %1 : vector<1280x1280xi8> to vector<1280x1280xf32>
    %3 = arith.truncf %2 : vector<1280x1280xf32> to vector<1280x1280xbf16>
    %cst = arith.constant dense<0.000000e+00> : vector<16x1280xf32>
    %4 = tpu.matmul %0, %3, %cst {dimension_numbers = #tpu.dot_dimension_numbers<[1], [0], [0], [1], [0, 0, 1, 1], [], []>} : vector<16x1280xbf16>, vector<1280x1280xbf16>, vector<16x1280xf32> -> vector<16x1280xf32>
    %c0_3 = arith.constant 0 : index
    %c0_4 = arith.constant 0 : index
    %5 = vector.load %arg5[%c0_3, %c0_4] : memref<1x1280xf32, #tpu.memory_space<vmem>>, vector<1x1280xf32>
    %6 = vector.broadcast %5 : vector<1x1280xf32> to vector<16x1280xf32>
    %7 = arith.mulf %4, %6 : vector<16x1280xf32>
    %c0_5 = arith.constant 0 : index
    %c0_6 = arith.constant 0 : index
    %8 = vector.load %arg6[%c0_5, %c0_6] : memref<1x1280xf32, #tpu.memory_space<vmem>>, vector<1x1280xf32>
    %9 = vector.broadcast %8 : vector<1x1280xf32> to vector<16x1280xf32>
    %10 = arith.addf %7, %9 : vector<16x1280xf32>
    %cst_7 = arith.constant 0.000000e+00 : f32
    %11 = vector.broadcast %cst_7 : f32 to vector<16x1280xf32>
    %12 = arith.subf %11, %10 : vector<16x1280xf32>
    %13 = math.exp %12 : vector<16x1280xf32>
    %cst_8 = arith.constant 1.000000e+00 : f32
    %14 = vector.broadcast %cst_8 : f32 to vector<16x1280xf32>
    %15 = arith.addf %14, %13 : vector<16x1280xf32>
    %cst_9 = arith.constant 1.000000e+00 : f32
    %16 = vector.broadcast %cst_9 : f32 to vector<16x1280xf32>
    %17 = arith.divf %16, %15 : vector<16x1280xf32>
    %18 = arith.mulf %10, %17 : vector<16x1280xf32>
    %c0_10 = arith.constant 0 : index
    %c0_11 = arith.constant 0 : index
    %19 = vector.load %arg7[%c0_10, %c0_11] : memref<16x1280xf32, #tpu.memory_space<vmem>>, vector<16x1280xf32>
    tpu.vector_store %arg7[%c0_10, %c0_11], %18 {strides = array<i32>} : memref<16x1280xf32, #tpu.memory_space<vmem>>, vector<16x1280xf32>,
    return
  }
  func.func @transform_0(%arg0: i32, %arg1: i32, %arg2: i32) -> (i32, i32) {
    %c0_i32 = arith.constant 0 : i32
    return %arg0, %arg2 : i32, i32
  }
  func.func @transform_1(%arg0: i32, %arg1: i32, %arg2: i32) -> (i32, i32) {
    %c0_i32 = arith.constant 0 : i32
    return %arg2, %arg1 : i32, i32
  }
  func.func @transform_2(%arg0: i32, %arg1: i32, %arg2: i32) -> (i32, i32) {
    %c0_i32 = arith.constant 0 : i32
    %c0_i32_0 = arith.constant 0 : i32
    return %c0_i32, %arg1 : i32, i32
  }
  func.func @transform_3(%arg0: i32, %arg1: i32, %arg2: i32) -> (i32, i32) {
    %c0_i32 = arith.constant 0 : i32
    %c0_i32_0 = arith.constant 0 : i32
    return %c0_i32, %arg1 : i32, i32
  }
  func.func @transform_4(%arg0: i32, %arg1: i32, %arg2: i32) -> (i32, i32) {
    %c0_i32 = arith.constant 0 : i32
    return %arg0, %arg1 : i32, i32
  }
}

</mosaic_0001>

<bundles_post_ra>
// kernel: time_embedding_fwd.2
= control target key start
LH: loop header
LB: loop body
LE: loop exit
PB: predicated region body
PF: predicated region fallthrough
CT: control target
= control target key end

     0   :  { %9 = vsyncpa [#allocation3], 0  ;;  %s1514_s0 = inlined_call_operand.vmem [shape: bf16[16,320], index: 0, kind: input, shape index: {}]   ;;  %s1515_s1 = inlined_call_operand.hbm [shape: s8[320,1280], index: 1, kind: input, shape index: {}]   ;;  %s1516_s2 = inlined_call_operand.hbm [shape: f32[1,1280], index: 2, kind: input, shape index: {}]   ;;  %s1517_s3 = inlined_call_operand.vmem [shape: f32[1,1280], index: 3, kind: input, shape index: {}]   ;;  %s1518_s4 = inlined_call_operand.vmem [shape: f32[16,1280], index: 4, kind: output, shape index: {}]  }
   0x1   :  { %10 = vsyncpa [#allocation5], 0  ;;  %s1276_s15 = smov [#allocation2]   ;;  %s1228_s19 = scalar_lea.hbm %s1515_s1, 12800 }
   0x2   :  { %s18_s16 = sshll.u32 %s1276_s15, 4  ;;  %p1229_p0 = scmp.ne.s32.totalorder %s1515_s1, %s1228_s19  ;;  %s19_s16 = int_to_ptr.vmem [resolvable:$true] %s18_s16 }
   0x3   :  { %p1232_p1 = scmp.lt.u32.totalorder %s1228_s19, %s1515_s1 }
   0x5   :  { %p1234_p2 = pnand %p1232_p1, %p1229_p0 }
   0x7   :  { %1237 = shalt.err (!%p1234_p2)
}
   0x8   :  { %s1238_s24 = scalar_lea.vmem %s19_s16, 12800  ;;  %p1243_p4 = scmp.lt.s32.totalorder %s19_s16, %s19_s16 }
   0x9   :  { %p1239_p3 = scmp.ne.s32.totalorder %s19_s16, %s1238_s24  ;;  %p1244_p5 = scmp.lt.s32.totalorder %s1238_s24, %s1238_s24 }
   0xb   :  { %p1245_p6 = por %p1244_p5, %p1243_p4 }
   0xd   :  { %p1246_p7 = pnand %p1245_p6, %p1239_p3 }
   0xf   :  { %1249 = shalt.err (!%p1246_p7)
}
  0x10   :  { %s1277_s25 = smov 1280   ;;  %s1278_s26 = smov 80  }
  0x11   :  { %24 = dma.hbm_to_vmem [thread:$0]  %s1515_s1, 12800, %s19_s16, [#allocation3], %s1277_s25, %s1277_s25, %s1278_s26  }
  0x12   :  { %s1279_s29 = smov [#allocation4]   ;;  %s1250_s7 = scalar_lea.hbm %s1516_s2, 160 }
  0x13   :  { %s31_s30 = sshll.u32 %s1279_s29, 4  ;;  %p1251_p8 = scmp.ne.s32.totalorder %s1516_s2, %s1250_s7  ;;  %s32_s30 = int_to_ptr.vmem [resolvable:$true] %s31_s30 }
  0x14   :  { %p1254_p9 = scmp.lt.u32.totalorder %s1250_s7, %s1516_s2 }
  0x16   :  { %p1256_p10 = pnand %p1254_p9, %p1251_p8 }
  0x18   :  { %1259 = shalt.err (!%p1256_p10)
}
  0x19   :  { %s1260_s12 = scalar_lea.vmem %s32_s30, 160  ;;  %p1265_p12 = scmp.lt.s32.totalorder %s32_s30, %s32_s30 }
  0x1a   :  { %p1261_p11 = scmp.ne.s32.totalorder %s32_s30, %s1260_s12  ;;  %p1266_p13 = scmp.lt.s32.totalorder %s1260_s12, %s1260_s12 }
  0x1c   :  { %p1267_p0 = por %p1266_p13, %p1265_p12 }
  0x1e   :  { %p1268_p1 = pnand %p1267_p0, %p1261_p11 }
  0x20   :  { %1271 = shalt.err (!%p1268_p1)
}
  0x21   :  { %34 = dma.hbm_to_vmem [thread:$0]  %s1516_s2, 160, %s32_s30, [#allocation5]  }
  0x22   :  { %1272 = dma.done.wait [#allocation3], 12800  }
  0x23   :  { %1273 = vsyncadd [#allocation3], 4294954496 }
  0x24   :  { %1274 = dma.done.wait [#allocation5], 160  }
  0x25   :  { %1275 = vsyncadd [#allocation5], 4294967136  ;;  %v1280_v0 = vmov 0   ;;  %v49_v1 = vld [vmem:[#allocation2 + $0x8] sm:$0xff]  ;;  %v48_v3 = vld [vmem:[#allocation2] sm:$0xff]  ;;  %vm363_vm0 = vcmask 523264  }
  0x26   :  { %442 = vmatprep.mubr.bf16.mxu0 %v1280_v0  ;;  %v129_v2 = vld [vmem:[#allocation2 + $0x288] sm:$0xff]  ;;  %v149_v4 = vunpack.c.l.s8.bf16 %v49_v1  ;;  %v159_v5 = vunpack.c.h.s8.bf16 %v49_v1  ;;  %v128_v8 = vld [vmem:[#allocation2 + $0x280] sm:$0xff]  ;;  %v148_v9 = vunpack.c.l.s8.bf16 %v48_v3  ;;  %v59_v11 = vld [vmem:[#allocation2 + $0x58] sm:$0xff]  ;;  %v158_v13 = vunpack.c.h.s8.bf16 %v48_v3 }
  0x27   :  { %v309_v6 = vunpack.c.l.s8.bf16 %v129_v2  ;;  %v319_v7 = vunpack.c.h.s8.bf16 %v129_v2  ;;  %v308_v10 = vunpack.c.l.s8.bf16 %v128_v8  ;;  %v139_v12 = vld [vmem:[#allocation2 + $0x2d8] sm:$0xff]  ;;  %v318_v14 = vunpack.c.h.s8.bf16 %v128_v8  ;;  %v58_v17 = vld [vmem:[#allocation2 + $0x50] sm:$0xff]  ;;  %v69_v23 = vld [vmem:[#allocation2 + $0xa8] sm:$0xff] }
  0x28   :  { %367 = vmatprep.subr.bf16.mxu1 %v149_v4  ;;  %v169_v15 = vunpack.c.l.s8.bf16 %v59_v11  ;;  %v329_v16 = vunpack.c.l.s8.bf16 %v139_v12  ;;  %v138_v18 = vld [vmem:[#allocation2 + $0x2d0] sm:$0xff]  ;;  %v168_v19 = vunpack.c.l.s8.bf16 %v58_v17  ;;  %v179_v21 = vunpack.c.h.s8.bf16 %v59_v11  ;;  %v131_v24 = vld [vmem:[#allocation2 + $0x298] sm:$0xff]  ;;  %v68_v30 = vld [vmem:[#allocation2 + $0xa0] sm:$0xff] }
  0x29   :  { %410 = vmatprep.subr.bf16.mxu0 %v309_v6  ;;  %368 = vmatpush1.bf16.msra.mxu1 %v148_v9  ;;  %v328_v20 = vunpack.c.l.s8.bf16 %v138_v18  ;;  %v339_v22 = vunpack.c.h.s8.bf16 %v139_v12  ;;  %v178_v25 = vunpack.c.h.s8.bf16 %v58_v17  ;;  %v338_v26 = vunpack.c.h.s8.bf16 %v138_v18  ;;  %v1334_v27 = vld [vmem:[%s1514_s0 + $0x4] ss:$12 sps:$4 sm:$0xff]   ;;  %v1340_v32 = vld [vmem:[%s1514_s0 + $0x8] ss:$12 sps:$4 sm:$0xff]   ;;  %v79_v37 = vld [vmem:[#allocation2 + $0xf8] sm:$0xff] }
  0x2a   :  { %411 = vmatpush1.bf16.msra.mxu0 %v308_v10  ;;  %369 = vmatprep.subr.bf16.mxu1 %v159_v5  ;;  %v189_v28 = vunpack.c.l.s8.bf16 %v69_v23  ;;  %v311_v29 = vunpack.c.l.s8.bf16 %v131_v24  ;;  %v130_v31 = vld [vmem:[#allocation2 + $0x290] sm:$0xff]  ;;  %v188_v33 = vunpack.c.l.s8.bf16 %v68_v30  ;;  %v199_v35 = vunpack.c.h.s8.bf16 %v69_v23  ;;  %v141_v38 = vld [vmem:[#allocation2 + $0x2e8] sm:$0xff]  ;;  %v140_v44 = vld [vmem:[#allocation2 + $0x2e0] sm:$0xff] }
  0x2b   :  { %412 = vmatprep.subr.bf16.mxu0 %v319_v7  ;;  %399 = vmatprep.mubr.bf16.mxu1 %v1334_v27  ;;  %v310_v34 = vunpack.c.l.s8.bf16 %v130_v31  ;;  %v321_v36 = vunpack.c.h.s8.bf16 %v131_v24  ;;  %v198_v39 = vunpack.c.h.s8.bf16 %v68_v30  ;;  %v320_v40 = vunpack.c.h.s8.bf16 %v130_v31  ;;  %v78_v43 = vld [vmem:[#allocation2 + $0xf0] sm:$0xff]  ;;  %v89_v49 = vld [vmem:[#allocation2 + $0x148] sm:$0xff]  ;;  %v88_v55 = vld [vmem:[#allocation2 + $0x140] sm:$0xff] }
  0x2c   :  { %v209_v41 = vunpack.c.l.s8.bf16 %v79_v37  ;;  %v331_v42 = vunpack.c.l.s8.bf16 %v141_v38  ;;  %v208_v45 = vunpack.c.l.s8.bf16 %v78_v43  ;;  %v330_v46 = vunpack.c.l.s8.bf16 %v140_v44  ;;  %v53_v50 = vld [vmem:[#allocation2 + $0x28] sm:$0xff]  ;;  %v52_v56 = vld [vmem:[#allocation2 + $0x20] sm:$0xff]  ;;  %v99_v61 = vld [vmem:[#allocation2 + $0x198] sm:$0xff] }
  0x2d   :  { %370 = vmatpush1.bf16.msra.mxu1 %v158_v13  ;;  %v219_v47 = vunpack.c.h.s8.bf16 %v79_v37  ;;  %v341_v48 = vunpack.c.h.s8.bf16 %v141_v38  ;;  %v218_v51 = vunpack.c.h.s8.bf16 %v78_v43  ;;  %v340_v52 = vunpack.c.h.s8.bf16 %v140_v44  ;;  %v63_v62 = vld [vmem:[#allocation2 + $0x78] sm:$0xff]  ;;  %v98_v4 = vld [vmem:[#allocation2 + $0x190] sm:$0xff]  ;;  %v109_v10 = vld [vmem:[#allocation2 + $0x1e8] sm:$0xff] }
  0x2e   :  { %413 = vmatpush1.bf16.msra.mxu0 %v318_v14  ;;  %371 = vmatprep.subr.bf16.mxu1 %v169_v15  ;;  %v229_v53 = vunpack.c.l.s8.bf16 %v89_v49  ;;  %v153_v54 = vunpack.c.l.s8.bf16 %v53_v50  ;;  %v228_v57 = vunpack.c.l.s8.bf16 %v88_v55  ;;  %v152_v58 = vunpack.c.l.s8.bf16 %v52_v56  ;;  %v62_v5 = vld [vmem:[#allocation2 + $0x70] sm:$0xff]  ;;  %v73_v11 = vld [vmem:[#allocation2 + $0xc8] sm:$0xff]  ;;  %v72_v17 = vld [vmem:[#allocation2 + $0xc0] sm:$0xff] }
  0x2f   :  { %414 = vmatprep.subr.bf16.mxu0 %v329_v16  ;;  %v239_v59 = vunpack.c.h.s8.bf16 %v89_v49  ;;  %v163_v60 = vunpack.c.h.s8.bf16 %v53_v50  ;;  %v238_v63 = vunpack.c.h.s8.bf16 %v88_v55  ;;  %v162_v1 = vunpack.c.h.s8.bf16 %v52_v56  ;;  %v108_v16 = vld [vmem:[#allocation2 + $0x1e0] sm:$0xff]  ;;  %v83_v23 = vld [vmem:[#allocation2 + $0x118] sm:$0xff]  ;;  %v82_v30 = vld [vmem:[#allocation2 + $0x110] sm:$0xff] }
  0x30   :  { %v249_v2 = vunpack.c.l.s8.bf16 %v99_v61  ;;  %v173_v3 = vunpack.c.l.s8.bf16 %v63_v62  ;;  %v248_v6 = vunpack.c.l.s8.bf16 %v98_v4  ;;  %v172_v7 = vunpack.c.l.s8.bf16 %v62_v5  ;;  %v93_v37 = vld [vmem:[#allocation2 + $0x168] sm:$0xff]  ;;  %v92_v43 = vld [vmem:[#allocation2 + $0x160] sm:$0xff]  ;;  %v103_v50 = vld [vmem:[#allocation2 + $0x1b8] sm:$0xff] }
  0x31   :  { %372 = vmatpush1.bf16.msra.mxu1 %v168_v19  ;;  %v259_v8 = vunpack.c.h.s8.bf16 %v99_v61  ;;  %v183_v9 = vunpack.c.h.s8.bf16 %v63_v62  ;;  %v258_v12 = vunpack.c.h.s8.bf16 %v98_v4  ;;  %v182_v13 = vunpack.c.h.s8.bf16 %v62_v5  ;;  %v1351_v44 = vld [vmem:[%s1514_s0] ss:$12 sps:$4 sm:$0xff]   ;;  %v102_v56 = vld [vmem:[#allocation2 + $0x1b0] sm:$0xff]  ;;  %v71_v61 = vld [vmem:[#allocation2 + $0xb8] sm:$0xff] }
  0x32   :  { %415 = vmatpush1.bf16.msra.mxu0 %v328_v20  ;;  %373 = vmatprep.subr.bf16.mxu1 %v179_v21  ;;  %v269_v14 = vunpack.c.l.s8.bf16 %v109_v10  ;;  %v193_v15 = vunpack.c.l.s8.bf16 %v73_v11  ;;  %v268_v18 = vunpack.c.l.s8.bf16 %v108_v16  ;;  %v192_v19 = vunpack.c.l.s8.bf16 %v72_v17  ;;  %v61_v49 = vld [vmem:[#allocation2 + $0x68] sm:$0xff]  ;;  %v60_v55 = vld [vmem:[#allocation2 + $0x60] sm:$0xff]  ;;  %v70_v4 = vld [vmem:[#allocation2 + $0xb0] sm:$0xff] }
  0x33   :  { %416 = vmatprep.subr.bf16.mxu0 %v339_v22  ;;  %v279_v20 = vunpack.c.h.s8.bf16 %v109_v10  ;;  %v203_v21 = vunpack.c.h.s8.bf16 %v73_v11  ;;  %v119_v22 = vld [vmem:[#allocation2 + $0x238] sm:$0xff]  ;;  %v278_v24 = vunpack.c.h.s8.bf16 %v108_v16  ;;  %v113_v62 = vld [vmem:[#allocation2 + $0x208] sm:$0xff]  ;;  %v112_v5 = vld [vmem:[#allocation2 + $0x200] sm:$0xff] }
  0x34   :  { %v81_v10 = vld [vmem:[#allocation2 + $0x108] sm:$0xff]  ;;  %v123_v11 = vld [vmem:[#allocation2 + $0x258] sm:$0xff]  ;;  %v80_v16 = vld [vmem:[#allocation2 + $0x100] sm:$0xff] }
  0x35   :  { %374 = vmatpush1.bf16.msra.mxu1 %v178_v25  ;;  %v202_v25 = vunpack.c.h.s8.bf16 %v72_v17  ;;  %v122_v17 = vld [vmem:[#allocation2 + $0x250] sm:$0xff] }
  0x36   :  { %417 = vmatpush1.bf16.msra.mxu0 %v338_v26  ;;  %375 = vmatprep.subr.bf16.mxu1 %v189_v28  ;;  %v289_v26 = vunpack.c.l.s8.bf16 %v119_v22  ;;  %v213_v28 = vunpack.c.l.s8.bf16 %v83_v23 }
  0x37   :  { %496 = vmatprep.subr.bf16.mxu0 %v311_v29  ;;  %v118_v29 = vld [vmem:[#allocation2 + $0x230] sm:$0xff] }
  0x38   :  { %v288_v31 = vunpack.c.l.s8.bf16 %v118_v29  ;;  %v298_v38 = vunpack.c.h.s8.bf16 %v118_v29  ;;  %v90_v29 = vld [vmem:[#allocation2 + $0x150] sm:$0xff] }
  0x39   :  { %1114 = vmatmul.mubr.msk.bf16.vlgmr.msra.gmra.mrb[0].mxu0 %vm363_vm0, %v1340_v32  ;;  %376 = vmatpush1.bf16.msra.mxu1 %v188_v33  ;;  %v212_v33 = vunpack.c.l.s8.bf16 %v82_v30 }
  0x3a   :  { %497 = vmatpush1.bf16.msra.mxu0 %v310_v34  ;;  %377 = vmatprep.subr.bf16.mxu1 %v199_v35  ;;  %v299_v34 = vunpack.c.h.s8.bf16 %v119_v22  ;;  %v223_v35 = vunpack.c.h.s8.bf16 %v83_v23  ;;  %v91_v22 = vld [vmem:[#allocation2 + $0x158] sm:$0xff]  ;;  %v133_v23 = vld [vmem:[#allocation2 + $0x2a8] sm:$0xff] }
  0x3b   :  { %498 = vmatprep.subr.bf16.mxu0 %v321_v36  ;;  %528 = vmatprep.mubr.bf16.mxu0 %v1280_v0  ;;  %v51_v36 = vld [vmem:[#allocation2 + $0x18] sm:$0xff] }
  0x3d   :  { %378 = vmatpush1.bf16.msra.mxu1 %v198_v39  ;;  %v222_v39 = vunpack.c.h.s8.bf16 %v82_v30  ;;  %v132_v30 = vld [vmem:[#allocation2 + $0x2a0] sm:$0xff] }
  0x3e   :  { %499 = vmatpush1.bf16.msra.mxu0 %v320_v40  ;;  %379 = vmatprep.subr.bf16.mxu1 %v209_v41  ;;  %v151_v40 = vunpack.c.l.s8.bf16 %v51_v36  ;;  %v233_v41 = vunpack.c.l.s8.bf16 %v93_v37 }
  0x3f   :  { %500 = vmatprep.subr.bf16.mxu0 %v331_v42  ;;  %v50_v42 = vld [vmem:[#allocation2 + $0x10] sm:$0xff] }
  0x41   :  { %380 = vmatpush1.bf16.msra.mxu1 %v208_v45  ;;  %v150_v45 = vunpack.c.l.s8.bf16 %v50_v42 }
  0x42   :  { %501 = vmatpush1.bf16.msra.mxu0 %v330_v46  ;;  %381 = vmatprep.subr.bf16.mxu1 %v219_v47  ;;  %v232_v46 = vunpack.c.l.s8.bf16 %v92_v43  ;;  %v161_v47 = vunpack.c.h.s8.bf16 %v51_v36  ;;  %v101_v36 = vld [vmem:[#allocation2 + $0x1a8] sm:$0xff] }
  0x43   :  { %502 = vmatprep.subr.bf16.mxu0 %v341_v48  ;;  %v243_v48 = vunpack.c.h.s8.bf16 %v93_v37  ;;  %v143_v37 = vld [vmem:[#allocation2 + $0x2f8] sm:$0xff] }
  0x45   :  { %382 = vmatpush1.bf16.msra.mxu1 %v218_v51  ;;  %v160_v51 = vunpack.c.h.s8.bf16 %v50_v42  ;;  %v100_v42 = vld [vmem:[#allocation2 + $0x1a0] sm:$0xff] }
  0x46   :  { %503 = vmatpush1.bf16.msra.mxu0 %v340_v52  ;;  %383 = vmatprep.subr.bf16.mxu1 %v229_v53  ;;  %v242_v52 = vunpack.c.h.s8.bf16 %v92_v43  ;;  %v171_v53 = vunpack.c.l.s8.bf16 %v61_v49  ;;  %v142_v43 = vld [vmem:[#allocation2 + $0x2f0] sm:$0xff] }
  0x47   :  { %539 = vmatprep.subr.bf16.mxu0 %v153_v54  ;;  %v253_v54 = vunpack.c.l.s8.bf16 %v103_v50 }
  0x49   :  { %1115 = vmatmul.mubr.msk.bf16.vlgmr.msra.gmra.mrb[4].mxu0 %vm363_vm0, %v1340_v32  ;;  %384 = vmatpush1.bf16.msra.mxu1 %v228_v57  ;;  %v170_v57 = vunpack.c.l.s8.bf16 %v60_v55 }
  0x4a   :  { %540 = vmatpush1.bf16.msra.mxu0 %v152_v58  ;;  %385 = vmatprep.subr.bf16.mxu1 %v239_v59  ;;  %v252_v58 = vunpack.c.l.s8.bf16 %v102_v56  ;;  %v181_v59 = vunpack.c.h.s8.bf16 %v61_v49  ;;  %v111_v49 = vld [vmem:[#allocation2 + $0x1f8] sm:$0xff] }
  0x4b   :  { %541 = vmatprep.subr.bf16.mxu0 %v163_v60  ;;  %571 = vmatprep.mubr.bf16.mxu0 %v1334_v27  ;;  %v263_v60 = vunpack.c.h.s8.bf16 %v103_v50  ;;  %v57_v50 = vld [vmem:[#allocation2 + $0x48] sm:$0xff] }
  0x4d   :  { %386 = vmatpush1.bf16.msra.mxu1 %v238_v63  ;;  %v180_v63 = vunpack.c.h.s8.bf16 %v60_v55  ;;  %v110_v55 = vld [vmem:[#allocation2 + $0x1f0] sm:$0xff] }
  0x4e   :  { %542 = vmatpush1.bf16.msra.mxu0 %v162_v1  ;;  %387 = vmatprep.subr.bf16.mxu1 %v249_v2  ;;  %v262_v1 = vunpack.c.h.s8.bf16 %v102_v56  ;;  %v191_v2 = vunpack.c.l.s8.bf16 %v71_v61  ;;  %v56_v56 = vld [vmem:[#allocation2 + $0x40] sm:$0xff] }
  0x4f   :  { %543 = vmatprep.subr.bf16.mxu0 %v173_v3  ;;  %v273_v3 = vunpack.c.l.s8.bf16 %v113_v62 }
  0x51   :  { %388 = vmatpush1.bf16.msra.mxu1 %v248_v6  ;;  %v190_v6 = vunpack.c.l.s8.bf16 %v70_v4 }
  0x52   :  { %544 = vmatpush1.bf16.msra.mxu0 %v172_v7  ;;  %389 = vmatprep.subr.bf16.mxu1 %v259_v8  ;;  %v272_v7 = vunpack.c.l.s8.bf16 %v112_v5  ;;  %v201_v8 = vunpack.c.h.s8.bf16 %v71_v61  ;;  %v121_v61 = vld [vmem:[#allocation2 + $0x248] sm:$0xff] }
  0x53   :  { %545 = vmatprep.subr.bf16.mxu0 %v183_v9  ;;  %v283_v9 = vunpack.c.h.s8.bf16 %v113_v62  ;;  %v67_v62 = vld [vmem:[#allocation2 + $0x98] sm:$0xff] }
  0x55   :  { %390 = vmatpush1.bf16.msra.mxu1 %v258_v12  ;;  %v200_v12 = vunpack.c.h.s8.bf16 %v70_v4  ;;  %v120_v4 = vld [vmem:[#allocation2 + $0x240] sm:$0xff] }
  0x56   :  { %546 = vmatpush1.bf16.msra.mxu0 %v182_v13  ;;  %391 = vmatprep.subr.bf16.mxu1 %v269_v14  ;;  %v282_v13 = vunpack.c.h.s8.bf16 %v112_v5  ;;  %v211_v14 = vunpack.c.l.s8.bf16 %v81_v10  ;;  %v66_v5 = vld [vmem:[#allocation2 + $0x90] sm:$0xff] }
  0x57   :  { %547 = vmatprep.subr.bf16.mxu0 %v193_v15  ;;  %v293_v15 = vunpack.c.l.s8.bf16 %v123_v11 }
  0x59   :  { %392 = vmatpush1.bf16.msra.mxu1 %v268_v18  ;;  %v210_v18 = vunpack.c.l.s8.bf16 %v80_v16 }
  0x5a   :  { %548 = vmatpush1.bf16.msra.mxu0 %v192_v19  ;;  %393 = vmatprep.subr.bf16.mxu1 %v279_v20  ;;  %v292_v19 = vunpack.c.l.s8.bf16 %v122_v17  ;;  %v221_v20 = vunpack.c.h.s8.bf16 %v81_v10  ;;  %v55_v10 = vld [vmem:[#allocation2 + $0x38] sm:$0xff] }
  0x5b   :  { %549 = vmatprep.subr.bf16.mxu0 %v203_v21  ;;  %v303_v21 = vunpack.c.h.s8.bf16 %v123_v11  ;;  %v77_v11 = vld [vmem:[#allocation2 + $0xe8] sm:$0xff] }
  0x5d   :  { %394 = vmatpush1.bf16.msra.mxu1 %v278_v24  ;;  %v220_v24 = vunpack.c.h.s8.bf16 %v80_v16  ;;  %v54_v16 = vld [vmem:[#allocation2 + $0x30] sm:$0xff] }
  0x5e   :  { %550 = vmatpush1.bf16.msra.mxu0 %v202_v25  ;;  %395 = vmatprep.subr.bf16.mxu1 %v289_v26  ;;  %v302_v25 = vunpack.c.h.s8.bf16 %v122_v17  ;;  %v231_v26 = vunpack.c.l.s8.bf16 %v91_v22  ;;  %v76_v17 = vld [vmem:[#allocation2 + $0xe0] sm:$0xff] }
  0x5f   :  { %551 = vmatprep.subr.bf16.mxu0 %v213_v28  ;;  %v313_v28 = vunpack.c.l.s8.bf16 %v133_v23 }
  0x61   :  { %396 = vmatpush1.bf16.msra.mxu1 %v288_v31  ;;  %v230_v31 = vunpack.c.l.s8.bf16 %v90_v29 }
  0x62   :  { %552 = vmatpush1.bf16.msra.mxu0 %v212_v33  ;;  %397 = vmatprep.subr.bf16.mxu1 %v299_v34  ;;  %v312_v33 = vunpack.c.l.s8.bf16 %v132_v30  ;;  %v241_v34 = vunpack.c.h.s8.bf16 %v91_v22  ;;  %v65_v22 = vld [vmem:[#allocation2 + $0x88] sm:$0xff] }
  0x63   :  { %553 = vmatprep.subr.bf16.mxu0 %v223_v35  ;;  %v323_v35 = vunpack.c.h.s8.bf16 %v133_v23  ;;  %v87_v23 = vld [vmem:[#allocation2 + $0x138] sm:$0xff] }
  0x65   :  { %398 = vmatpush1.bf16.msra.mxu1 %v298_v38  ;;  %v240_v38 = vunpack.c.h.s8.bf16 %v90_v29  ;;  %v64_v29 = vld [vmem:[#allocation2 + $0x80] sm:$0xff] }
  0x66   :  { %554 = vmatpush1.bf16.msra.mxu0 %v222_v39  ;;  %453 = vmatprep.subr.bf16.mxu1 %v151_v40  ;;  %v322_v39 = vunpack.c.h.s8.bf16 %v132_v30  ;;  %v251_v40 = vunpack.c.l.s8.bf16 %v101_v36  ;;  %v86_v30 = vld [vmem:[#allocation2 + $0x130] sm:$0xff] }
  0x67   :  { %555 = vmatprep.subr.bf16.mxu0 %v233_v41  ;;  %v333_v41 = vunpack.c.l.s8.bf16 %v143_v37 }
  0x68   :  { %400 = vmatmul.mubr.bf16.vlgmr.msra.gmra.mrb[0].mxu1 %v1351_v44 }
  0x69   :  { %454 = vmatpush1.bf16.msra.mxu1 %v150_v45  ;;  %485 = vmatprep.mubr.bf16.mxu1 %v1334_v27  ;;  %v250_v45 = vunpack.c.l.s8.bf16 %v100_v42 }
  0x6a   :  { %556 = vmatpush1.bf16.msra.mxu0 %v232_v46  ;;  %455 = vmatprep.subr.bf16.mxu1 %v161_v47  ;;  %v332_v46 = vunpack.c.l.s8.bf16 %v142_v43  ;;  %v261_v47 = vunpack.c.h.s8.bf16 %v101_v36  ;;  %v75_v36 = vld [vmem:[#allocation2 + $0xd8] sm:$0xff] }
  0x6b   :  { %557 = vmatprep.subr.bf16.mxu0 %v243_v48  ;;  %v343_v48 = vunpack.c.h.s8.bf16 %v143_v37  ;;  %v97_v37 = vld [vmem:[#allocation2 + $0x188] sm:$0xff] }
  0x6d   :  { %456 = vmatpush1.bf16.msra.mxu1 %v160_v51  ;;  %v260_v51 = vunpack.c.h.s8.bf16 %v100_v42  ;;  %v74_v42 = vld [vmem:[#allocation2 + $0xd0] sm:$0xff] }
  0x6e   :  { %558 = vmatpush1.bf16.msra.mxu0 %v242_v52  ;;  %457 = vmatprep.subr.bf16.mxu1 %v171_v53  ;;  %v342_v52 = vunpack.c.h.s8.bf16 %v142_v43  ;;  %v271_v53 = vunpack.c.l.s8.bf16 %v111_v49  ;;  %v194_v43 = vunpack.c.l.s8.bf16 %v74_v42 }
  0x6f   :  { %559 = vmatprep.subr.bf16.mxu0 %v253_v54  ;;  %v157_v54 = vunpack.c.l.s8.bf16 %v57_v50 }
  0x71   :  { %458 = vmatpush1.bf16.msra.mxu1 %v170_v57  ;;  %v270_v57 = vunpack.c.l.s8.bf16 %v110_v55 }
  0x72   :  { %560 = vmatpush1.bf16.msra.mxu0 %v252_v58  ;;  %459 = vmatprep.subr.bf16.mxu1 %v181_v59  ;;  %v156_v58 = vunpack.c.l.s8.bf16 %v56_v56  ;;  %v281_v59 = vunpack.c.h.s8.bf16 %v111_v49  ;;  %v107_v49 = vld [vmem:[#allocation2 + $0x1d8] sm:$0xff] }
  0x73   :  { %561 = vmatprep.subr.bf16.mxu0 %v263_v60  ;;  %v167_v60 = vunpack.c.h.s8.bf16 %v57_v50  ;;  %v204_v50 = vunpack.c.h.s8.bf16 %v74_v42  ;;  %v146_v42 = vld [vmem:[#allocation2 + $0x310] sm:$0xff] }
  0x75   :  { %460 = vmatpush1.bf16.msra.mxu1 %v180_v63  ;;  %v280_v63 = vunpack.c.h.s8.bf16 %v110_v55  ;;  %v106_v55 = vld [vmem:[#allocation2 + $0x1d0] sm:$0xff] }
  0x76   :  { %562 = vmatpush1.bf16.msra.mxu0 %v262_v1  ;;  %461 = vmatprep.subr.bf16.mxu1 %v191_v2  ;;  %v166_v1 = vunpack.c.h.s8.bf16 %v56_v56  ;;  %v291_v2 = vunpack.c.l.s8.bf16 %v121_v61 }
  0x77   :  { %563 = vmatprep.subr.bf16.mxu0 %v273_v3  ;;  %v177_v3 = vunpack.c.l.s8.bf16 %v67_v62 }
  0x79   :  { %462 = vmatpush1.bf16.msra.mxu1 %v190_v6  ;;  %v290_v6 = vunpack.c.l.s8.bf16 %v120_v4 }
  0x7a   :  { %564 = vmatpush1.bf16.msra.mxu0 %v272_v7  ;;  %463 = vmatprep.subr.bf16.mxu1 %v201_v8  ;;  %v176_v7 = vunpack.c.l.s8.bf16 %v66_v5  ;;  %v301_v8 = vunpack.c.h.s8.bf16 %v121_v61  ;;  %v117_v61 = vld [vmem:[#allocation2 + $0x228] sm:$0xff] }
  0x7b   :  { %565 = vmatprep.subr.bf16.mxu0 %v283_v9  ;;  %v187_v9 = vunpack.c.h.s8.bf16 %v67_v62 }
  0x7d   :  { %464 = vmatpush1.bf16.msra.mxu1 %v200_v12  ;;  %v300_v12 = vunpack.c.h.s8.bf16 %v120_v4  ;;  %v116_v4 = vld [vmem:[#allocation2 + $0x220] sm:$0xff] }
  0x7e   :  { %566 = vmatpush1.bf16.msra.mxu0 %v282_v13  ;;  %465 = vmatprep.subr.bf16.mxu1 %v211_v14  ;;  %v186_v13 = vunpack.c.h.s8.bf16 %v66_v5  ;;  %v155_v14 = vunpack.c.l.s8.bf16 %v55_v10 }
  0x7f   :  { %567 = vmatprep.subr.bf16.mxu0 %v293_v15  ;;  %v197_v15 = vunpack.c.l.s8.bf16 %v77_v11 }
  0x81   :  { %466 = vmatpush1.bf16.msra.mxu1 %v210_v18  ;;  %v154_v18 = vunpack.c.l.s8.bf16 %v54_v16 }
  0x82   :  { %568 = vmatpush1.bf16.msra.mxu0 %v292_v19  ;;  %467 = vmatprep.subr.bf16.mxu1 %v221_v20  ;;  %v196_v19 = vunpack.c.l.s8.bf16 %v76_v17  ;;  %v165_v20 = vunpack.c.h.s8.bf16 %v55_v10  ;;  %v127_v10 = vld [vmem:[#allocation2 + $0x278] sm:$0xff] }
  0x83   :  { %569 = vmatprep.subr.bf16.mxu0 %v303_v21  ;;  %v207_v21 = vunpack.c.h.s8.bf16 %v77_v11 }
  0x85   :  { %468 = vmatpush1.bf16.msra.mxu1 %v220_v24  ;;  %v164_v24 = vunpack.c.h.s8.bf16 %v54_v16  ;;  %v126_v16 = vld [vmem:[#allocation2 + $0x270] sm:$0xff] }
  0x86   :  { %570 = vmatpush1.bf16.msra.mxu0 %v302_v25  ;;  %469 = vmatprep.subr.bf16.mxu1 %v231_v26  ;;  %v206_v25 = vunpack.c.h.s8.bf16 %v76_v17  ;;  %v175_v26 = vunpack.c.l.s8.bf16 %v65_v22 }
  0x87   :  { %582 = vmatprep.subr.bf16.mxu0 %v313_v28  ;;  %v217_v28 = vunpack.c.l.s8.bf16 %v87_v23 }
  0x89   :  { %572 = vmatmul.mubr.bf16.vlgmr.msra.gmra.mrb[8].mxu0 %v1351_v44  ;;  %470 = vmatpush1.bf16.msra.mxu1 %v230_v31  ;;  %v174_v31 = vunpack.c.l.s8.bf16 %v64_v29 }
  0x8a   :  { %583 = vmatpush1.bf16.msra.mxu0 %v312_v33  ;;  %471 = vmatprep.subr.bf16.mxu1 %v241_v34  ;;  %v216_v33 = vunpack.c.l.s8.bf16 %v86_v30  ;;  %v185_v34 = vunpack.c.h.s8.bf16 %v65_v22  ;;  %v137_v22 = vld [vmem:[#allocation2 + $0x2c8] sm:$0xff] }
  0x8b   :  { %584 = vmatprep.subr.bf16.mxu0 %v323_v35  ;;  %614 = vmatprep.mubr.bf16.mxu0 %v1280_v0  ;;  %v227_v35 = vunpack.c.h.s8.bf16 %v87_v23 }
  0x8d   :  { %472 = vmatpush1.bf16.msra.mxu1 %v240_v38  ;;  %v184_v38 = vunpack.c.h.s8.bf16 %v64_v29  ;;  %v136_v29 = vld [vmem:[#allocation2 + $0x2c0] sm:$0xff] }
  0x8e   :  { %585 = vmatpush1.bf16.msra.mxu0 %v322_v39  ;;  %473 = vmatprep.subr.bf16.mxu1 %v251_v40  ;;  %v226_v39 = vunpack.c.h.s8.bf16 %v86_v30  ;;  %v195_v40 = vunpack.c.l.s8.bf16 %v75_v36 }
  0x8f   :  { %586 = vmatprep.subr.bf16.mxu0 %v333_v41  ;;  %v237_v41 = vunpack.c.l.s8.bf16 %v97_v37 }
  0x91   :  { %474 = vmatpush1.bf16.msra.mxu1 %v250_v45 }
  0x92   :  { %587 = vmatpush1.bf16.msra.mxu0 %v332_v46  ;;  %475 = vmatprep.subr.bf16.mxu1 %v261_v47  ;;  %v205_v46 = vunpack.c.h.s8.bf16 %v75_v36  ;;  %v247_v47 = vunpack.c.h.s8.bf16 %v97_v37  ;;  %v147_v36 = vld [vmem:[#allocation2 + $0x318] sm:$0xff] }
  0x93   :  { %588 = vmatprep.subr.bf16.mxu0 %v343_v48  ;;  %v85_v48 = vld [vmem:[#allocation2 + $0x128] sm:$0xff] }
  0x95   :  { %476 = vmatpush1.bf16.msra.mxu1 %v260_v51 }
  0x96   :  { %589 = vmatpush1.bf16.msra.mxu0 %v342_v52  ;;  %477 = vmatprep.subr.bf16.mxu1 %v271_v53  ;;  %v215_v52 = vunpack.c.l.s8.bf16 %v85_v48  ;;  %v257_v53 = vunpack.c.l.s8.bf16 %v107_v49 }
  0x97   :  { %711 = vmatprep.subr.bf16.mxu0 %v157_v54  ;;  %v84_v54 = vld [vmem:[#allocation2 + $0x120] sm:$0xff] }
  0x98   :  { %v214_v56 = vunpack.c.l.s8.bf16 %v84_v54  ;;  %v224_v62 = vunpack.c.h.s8.bf16 %v84_v54  ;;  %v145_v54 = vld [vmem:[#allocation2 + $0x308] sm:$0xff] }
  0x99   :  { %1116 = vmatmul.mubr.msk.bf16.vlgmr.msra.gmra.mrb[8].mxu0 %vm363_vm0, %v1340_v32  ;;  %478 = vmatpush1.bf16.msra.mxu1 %v270_v57  ;;  %v256_v57 = vunpack.c.l.s8.bf16 %v106_v55 }
  0x9a   :  { %712 = vmatpush1.bf16.msra.mxu0 %v156_v58  ;;  %479 = vmatprep.subr.bf16.mxu1 %v281_v59  ;;  %v225_v58 = vunpack.c.h.s8.bf16 %v85_v48  ;;  %v267_v59 = vunpack.c.h.s8.bf16 %v107_v49  ;;  %v346_v49 = vunpack.c.h.s8.bf16 %v146_v42 }
  0x9b   :  { %713 = vmatprep.subr.bf16.mxu0 %v167_v60  ;;  %743 = vmatprep.mubr.bf16.mxu0 %v1334_v27  ;;  %v95_v60 = vld [vmem:[#allocation2 + $0x178] sm:$0xff] }
  0x9d   :  { %480 = vmatpush1.bf16.msra.mxu1 %v280_v63  ;;  %v266_v63 = vunpack.c.h.s8.bf16 %v106_v55 }
  0x9e   :  { %714 = vmatpush1.bf16.msra.mxu0 %v166_v1  ;;  %481 = vmatprep.subr.bf16.mxu1 %v291_v2  ;;  %v235_v1 = vunpack.c.l.s8.bf16 %v95_v60  ;;  %v277_v2 = vunpack.c.l.s8.bf16 %v117_v61 }
  0x9f   :  { %715 = vmatprep.subr.bf16.mxu0 %v177_v3  ;;  %v94_v3 = vld [vmem:[#allocation2 + $0x170] sm:$0xff] }
  0xa0   :  { %v234_v5 = vunpack.c.l.s8.bf16 %v94_v3  ;;  %v244_v11 = vunpack.c.h.s8.bf16 %v94_v3 }
  0xa1   :  { %482 = vmatpush1.bf16.msra.mxu1 %v290_v6  ;;  %v276_v6 = vunpack.c.l.s8.bf16 %v116_v4 }
  0xa2   :  { %716 = vmatpush1.bf16.msra.mxu0 %v176_v7  ;;  %483 = vmatprep.subr.bf16.mxu1 %v301_v8  ;;  %v245_v7 = vunpack.c.h.s8.bf16 %v95_v60  ;;  %v287_v8 = vunpack.c.h.s8.bf16 %v117_v61 }
  0xa3   :  { %717 = vmatprep.subr.bf16.mxu0 %v187_v9  ;;  %v105_v9 = vld [vmem:[#allocation2 + $0x1c8] sm:$0xff] }
  0xa5   :  { %484 = vmatpush1.bf16.msra.mxu1 %v300_v12  ;;  %v286_v12 = vunpack.c.h.s8.bf16 %v116_v4  ;;  %v801_v4 = vlaneseq }
  0xa6   :  { %718 = vmatpush1.bf16.msra.mxu0 %v186_v13  ;;  %625 = vmatprep.subr.bf16.mxu1 %v155_v14  ;;  %v255_v13 = vunpack.c.l.s8.bf16 %v105_v9  ;;  %v297_v14 = vunpack.c.l.s8.bf16 %v127_v10 }
  0xa7   :  { %719 = vmatprep.subr.bf16.mxu0 %v197_v15  ;;  %v104_v15 = vld [vmem:[#allocation2 + $0x1c0] sm:$0xff] }
  0xa8   :  { %486 = vmatmul.mubr.bf16.vlgmr.msra.gmra.mrb[4].mxu1 %v1351_v44  ;;  %v254_v17 = vunpack.c.l.s8.bf16 %v104_v15  ;;  %v264_v23 = vunpack.c.h.s8.bf16 %v104_v15 }
  0xa9   :  { %626 = vmatpush1.bf16.msra.mxu1 %v154_v18  ;;  %657 = vmatprep.mubr.bf16.mxu1 %v1334_v27  ;;  %v96_v27 = vld [vmem:[#allocation2 + $0x180] sm:$0xff]  ;;  %v296_v18 = vunpack.c.l.s8.bf16 %v126_v16 }
  0xaa   :  { %720 = vmatpush1.bf16.msra.mxu0 %v196_v19  ;;  %627 = vmatprep.subr.bf16.mxu1 %v165_v20  ;;  %v236_v45 = vunpack.c.l.s8.bf16 %v96_v27  ;;  %v246_v51 = vunpack.c.h.s8.bf16 %v96_v27  ;;  %v265_v19 = vunpack.c.h.s8.bf16 %v105_v9  ;;  %v307_v20 = vunpack.c.h.s8.bf16 %v127_v10 }
  0xab   :  { %721 = vmatprep.subr.bf16.mxu0 %v207_v21  ;;  %v115_v21 = vld [vmem:[#allocation2 + $0x218] sm:$0xff] }
  0xad   :  { %628 = vmatpush1.bf16.msra.mxu1 %v164_v24  ;;  %v306_v24 = vunpack.c.h.s8.bf16 %v126_v16 }
  0xae   :  { %722 = vmatpush1.bf16.msra.mxu0 %v206_v25  ;;  %629 = vmatprep.subr.bf16.mxu1 %v175_v26  ;;  %v275_v25 = vunpack.c.l.s8.bf16 %v115_v21  ;;  %v317_v26 = vunpack.c.l.s8.bf16 %v137_v22 }
  0xaf   :  { %723 = vmatprep.subr.bf16.mxu0 %v217_v28  ;;  %v114_v28 = vld [vmem:[#allocation2 + $0x210] sm:$0xff] }
  0xb0   :  { %v274_v30 = vunpack.c.l.s8.bf16 %v114_v28  ;;  %v284_v37 = vunpack.c.h.s8.bf16 %v114_v28 }
  0xb1   :  { %630 = vmatpush1.bf16.msra.mxu1 %v174_v31  ;;  %v316_v31 = vunpack.c.l.s8.bf16 %v136_v29 }
  0xb2   :  { %724 = vmatpush1.bf16.msra.mxu0 %v216_v33  ;;  %631 = vmatprep.subr.bf16.mxu1 %v185_v34  ;;  %v285_v33 = vunpack.c.h.s8.bf16 %v115_v21  ;;  %v327_v34 = vunpack.c.h.s8.bf16 %v137_v22 }
  0xb3   :  { %725 = vmatprep.subr.bf16.mxu0 %v227_v35  ;;  %v125_v35 = vld [vmem:[#allocation2 + $0x268] sm:$0xff] }
  0xb5   :  { %632 = vmatpush1.bf16.msra.mxu1 %v184_v38  ;;  %v326_v38 = vunpack.c.h.s8.bf16 %v136_v29 }
  0xb6   :  { %726 = vmatpush1.bf16.msra.mxu0 %v226_v39  ;;  %633 = vmatprep.subr.bf16.mxu1 %v195_v40  ;;  %v295_v39 = vunpack.c.l.s8.bf16 %v125_v35  ;;  %v337_v40 = vunpack.c.l.s8.bf16 %v147_v36 }
  0xb7   :  { %727 = vmatprep.subr.bf16.mxu0 %v237_v41  ;;  %v124_v41 = vld [vmem:[#allocation2 + $0x260] sm:$0xff] }
  0xb8   :  { %v294_v27 = vunpack.c.l.s8.bf16 %v124_v41  ;;  %v304_v48 = vunpack.c.h.s8.bf16 %v124_v41 }
  0xb9   :  { %634 = vmatpush1.bf16.msra.mxu1 %v194_v43  ;;  %v336_v43 = vunpack.c.l.s8.bf16 %v146_v42 }
  0xba   :  { %728 = vmatpush1.bf16.msra.mxu0 %v236_v45  ;;  %635 = vmatprep.subr.bf16.mxu1 %v205_v46  ;;  %v305_v45 = vunpack.c.h.s8.bf16 %v125_v35  ;;  %v347_v46 = vunpack.c.h.s8.bf16 %v147_v36 }
  0xbb   :  { %729 = vmatprep.subr.bf16.mxu0 %v247_v47  ;;  %v135_v47 = vld [vmem:[#allocation2 + $0x2b8] sm:$0xff] }
  0xbd   :  { %636 = vmatpush1.bf16.msra.mxu1 %v204_v50  ;;  %v315_v50 = vunpack.c.l.s8.bf16 %v135_v47 }
  0xbe   :  { %730 = vmatpush1.bf16.msra.mxu0 %v246_v51  ;;  %637 = vmatprep.subr.bf16.mxu1 %v215_v52  ;;  %v134_v51 = vld [vmem:[#allocation2 + $0x2b0] sm:$0xff] }
  0xbf   :  { %731 = vmatprep.subr.bf16.mxu0 %v257_v53  ;;  %v314_v52 = vunpack.c.l.s8.bf16 %v134_v51  ;;  %v325_v53 = vunpack.c.h.s8.bf16 %v135_v47  ;;  %v324_v55 = vunpack.c.h.s8.bf16 %v134_v51 }
  0xc1   :  { %638 = vmatpush1.bf16.msra.mxu1 %v214_v56  ;;  %v335_v56 = vunpack.c.l.s8.bf16 %v145_v54 }
  0xc2   :  { %732 = vmatpush1.bf16.msra.mxu0 %v256_v57  ;;  %639 = vmatprep.subr.bf16.mxu1 %v225_v58  ;;  %v144_v57 = vld [vmem:[#allocation2 + $0x300] sm:$0xff] }
  0xc3   :  { %733 = vmatprep.subr.bf16.mxu0 %v267_v59  ;;  %v334_v58 = vunpack.c.l.s8.bf16 %v144_v57  ;;  %v345_v59 = vunpack.c.h.s8.bf16 %v145_v54  ;;  %v344_v60 = vunpack.c.h.s8.bf16 %v144_v57 }
  0xc5   :  { %640 = vmatpush1.bf16.msra.mxu1 %v224_v62 }
  0xc6   :  { %734 = vmatpush1.bf16.msra.mxu0 %v266_v63  ;;  %641 = vmatprep.subr.bf16.mxu1 %v235_v1 }
  0xc7   :  { %735 = vmatprep.subr.bf16.mxu0 %v277_v2 }
  0xc9   :  { %642 = vmatpush1.bf16.msra.mxu1 %v234_v5  ;;  %v1378_v5 = vshrl.u32 %v801_v4, 7 }
  0xca   :  { %736 = vmatpush1.bf16.msra.mxu0 %v276_v6  ;;  %643 = vmatprep.subr.bf16.mxu1 %v245_v7  ;;  %v1383_v7 = vld [vmem:[#allocation4] sm:$0xff] }
  0xcb   :  { %737 = vmatprep.subr.bf16.mxu0 %v287_v8  ;;  %v1381_v6 = vsub.s32 0, %v1378_v5  ;;  %v1391_v8 = vld [vmem:[%s1517_s3] sm:$0xff] }
  0xcd   :  { %644 = vmatpush1.bf16.msra.mxu1 %v244_v11  ;;  %v804_v9 = vrot.slane %v1383_v7, %v1381_v6 }
  0xce   :  { %738 = vmatpush1.bf16.msra.mxu0 %v286_v12  ;;  %645 = vmatprep.subr.bf16.mxu1 %v255_v13  ;;  %v878_v13 = vrot.slane %v1391_v8, %v1381_v6 }
  0xcf   :  { %739 = vmatprep.subr.bf16.mxu0 %v297_v14 }
  0xd1   :  { %646 = vmatpush1.bf16.msra.mxu1 %v254_v17 }
  0xd2   :  { %740 = vmatpush1.bf16.msra.mxu0 %v296_v18  ;;  %647 = vmatprep.subr.bf16.mxu1 %v265_v19 }
  0xd3   :  { %741 = vmatprep.subr.bf16.mxu0 %v307_v20 }
  0xd5   :  { %648 = vmatpush1.bf16.msra.mxu1 %v264_v23 }
  0xd6   :  { %742 = vmatpush1.bf16.msra.mxu0 %v306_v24  ;;  %649 = vmatprep.subr.bf16.mxu1 %v275_v25 }
  0xd7   :  { %754 = vmatprep.subr.bf16.mxu0 %v317_v26 }
  0xd9   :  { %744 = vmatmul.mubr.bf16.vlgmr.msra.gmra.mrb[12].mxu0 %v1351_v44  ;;  %650 = vmatpush1.bf16.msra.mxu1 %v274_v30 }
  0xda   :  { %755 = vmatpush1.bf16.msra.mxu0 %v316_v31  ;;  %651 = vmatprep.subr.bf16.mxu1 %v285_v33 }
  0xdb   :  { %756 = vmatprep.subr.bf16.mxu0 %v327_v34  ;;  %786 = vmatprep.mubr.bf16.mxu0 %v1280_v0 }
  0xdd   :  { %652 = vmatpush1.bf16.msra.mxu1 %v284_v37 }
  0xde   :  { %757 = vmatpush1.bf16.msra.mxu0 %v326_v38  ;;  %653 = vmatprep.subr.bf16.mxu1 %v295_v39 }
  0xdf   :  { %758 = vmatprep.subr.bf16.mxu0 %v337_v40 }
  0xe1   :  { %654 = vmatpush1.bf16.msra.mxu1 %v294_v27 }
  0xe2   :  { %759 = vmatpush1.bf16.msra.mxu0 %v336_v43  ;;  %655 = vmatprep.subr.bf16.mxu1 %v305_v45 }
  0xe3   :  { %760 = vmatprep.subr.bf16.mxu0 %v347_v46 }
  0xe5   :  { %656 = vmatpush1.bf16.msra.mxu1 %v304_v48 }
  0xe6   :  { %761 = vmatpush1.bf16.msra.mxu0 %v346_v49  ;;  %668 = vmatprep.subr.bf16.mxu1 %v315_v50 }
  0xe8   :  { %658 = vmatmul.mubr.bf16.vlgmr.msra.gmra.mrb[8].mxu1 %v1351_v44 }
  0xe9   :  { %1118 = vmatmul.mubr.msk.bf16.vlgmr.msra.gmra.mrb[12].mxu0 %vm363_vm0, %v1340_v32  ;;  %669 = vmatpush1.bf16.msra.mxu1 %v314_v52 }
  0xea   :  { %700 = vmatprep.mubr.bf16.mxu1 %v1280_v0  ;;  %670 = vmatprep.subr.bf16.mxu1 %v325_v53 }
  0xed   :  { %671 = vmatpush1.bf16.msra.mxu1 %v324_v55  ;;  %v819_v55 = vsub.s32 4, %v1378_v5 }
  0xee   :  { %672 = vmatprep.subr.bf16.mxu1 %v335_v56  ;;  %v823_v56 = vsub.s32 5, %v1378_v5 }
  0xef   :  { %v820_v57 = vrot.slane %v1383_v7, %v819_v55 }
  0xf1   :  { %673 = vmatpush1.bf16.msra.mxu1 %v334_v58  ;;  %v824_v58 = vrot.slane %v1383_v7, %v823_v56 }
  0xf2   :  { %674 = vmatprep.subr.bf16.mxu1 %v345_v59  ;;  %v894_v59 = vrot.slane %v1391_v8, %v819_v55 }
  0xf5   :  { %675 = vmatpush1.bf16.msra.mxu1 %v344_v60 }
  0xf8   :  { %1117 = vmatmul.mubr.msk.bf16.vlgmr.msra.gmra.mrb[8].mxu1 %vm363_vm0, %v1340_v32  ;;  %v1386_v32 = vsub.s32 1, %v1378_v5 }
  0xfa   :  { %v808_v11 = vrot.slane %v1383_v7, %v1386_v32  ;;  %v882_v16 = vrot.slane %v1391_v8, %v1386_v32 }
 0x10c   :  { %v444_v61 = vpop.f32.mrb[0].mxu0 }
 0x10d   :  { %v446_v44 = vpop.f32.mrb[1].mxu0 }
 0x10e   :  { %v448_v62 = vpop.f32.mrb[2].mxu0 }
 0x10f   :  { %v450_v63 = vpop.f32.mrb[3].mxu0 }
 0x11c   :  { %v1370_v1 = vpop.f32.mrb[4].mxu0 }
 0x11d   :  { %v1372_v0 = vpop.f32.mrb[5].mxu0 }
 0x11e   :  { %v1374_v2 = vpop.f32.mrb[6].mxu0 }
 0x11f   :  { %v1376_v3 = vpop.f32.mrb[7].mxu0 }
 0x13b   :  { %v401_v10 = vpop.f32.mrb[0].mxu1 }
 0x13c   :  { %v445_v12 = vadd.f32 %v444_v61, %v401_v10  ;;  %v403_v14 = vpop.f32.mrb[1].mxu1  ;;  %v898_v61 = vrot.slane %v1391_v8, %v823_v56 }
 0x13d   :  { %v447_v15 = vadd.f32 %v446_v44, %v403_v14  ;;  %v405_v17 = vpop.f32.mrb[2].mxu1 }
 0x13e   :  { %v851_v18 = vmul.f32 %v804_v9, %v445_v12  ;;  %v449_v19 = vadd.f32 %v448_v62, %v405_v17  ;;  %v407_v20 = vpop.f32.mrb[3].mxu1 }
 0x13f   :  { %v852_v21 = vmul.f32 %v808_v11, %v447_v15  ;;  %v451_v22 = vadd.f32 %v450_v63, %v407_v20 }
 0x140   :  { %v925_v23 = vadd.f32 %v878_v13, %v851_v18  ;;  %v861_v24 = vmul.f32 %v804_v9, %v449_v19 }
 0x141   :  { %v926_v25 = vadd.f32 %v882_v16, %v852_v21  ;;  %v862_v26 = vmul.f32 %v808_v11, %v451_v22 }
 0x142   :  { %v945_v28 = vsub.f32 0.0, %v925_v23  ;;  %v935_v29 = vadd.f32 %v878_v13, %v861_v24  ;;  %v811_v24 = vsub.s32 2, %v1378_v5 }
 0x143   :  { %v946_v30 = vsub.f32 0.0, %v926_v25  ;;  %v936_v31 = vadd.f32 %v882_v16, %v862_v26 }
 0x144   :  { %v965_v33 = vmul.f32 1.442695, %v945_v28  ;;  %v955_v34 = vsub.f32 0.0, %v935_v29  ;;  %v812_v26 = vrot.slane %v1383_v7, %v811_v24 }
 0x145   :  { %v967_v35 = vmul.f32 1.442695, %v946_v30  ;;  %v956_v36 = vsub.f32 0.0, %v936_v31 }
 0x146   :  { %1148 = vpow2.f32 %v965_v33  ;;  %v985_v37 = vmul.f32 1.442695, %v955_v34 }
 0x147   :  { %1150 = vpow2.f32 %v967_v35  ;;  %v987_v38 = vmul.f32 1.442695, %v956_v36 }
 0x148   :  { %1152 = vpow2.f32 %v985_v37 }
 0x149   :  { %1154 = vpow2.f32 %v987_v38 }
 0x150   :  { %v1149_v39 = vpop.eup %1148 }
 0x151   :  { %v1151_v40 = vpop.eup %1150  ;;  %v1005_v41 = vadd.f32 1.0, %v1149_v39 }
 0x152   :  { %v1153_v42 = vpop.eup %1152  ;;  %v1006_v27 = vadd.f32 1.0, %v1151_v40 }
 0x153   :  { %v1155_v43 = vpop.eup %1154  ;;  %1156 = vrcp.f32 %v1005_v41  ;;  %v1015_v45 = vadd.f32 1.0, %v1153_v42 }
 0x154   :  { %1158 = vrcp.f32 %v1006_v27  ;;  %v1016_v46 = vadd.f32 1.0, %v1155_v43 }
 0x155   :  { %1160 = vrcp.f32 %v1015_v45 }
 0x156   :  { %1162 = vrcp.f32 %v1016_v46 }
 0x15d   :  { %v1157_v47 = vpop.eup %1156 }
 0x15e   :  { %v1159_v48 = vpop.eup %1158  ;;  %v1065_v49 = vmul.f32 %v1157_v47, %v925_v23 }
 0x15f   :  { %v1161_v50 = vpop.eup %1160  ;;  %v1066_v51 = vmul.f32 %v1159_v48, %v926_v25  ;;  %v815_v25 = vsub.s32 3, %v1378_v5 }
 0x160   :  { %v1163_v52 = vpop.eup %1162  ;;  %1085 = vst [vmem:[%s1518_s4] sm:$0xff] %v1065_v49  ;;  %v1075_v53 = vmul.f32 %v1161_v50, %v935_v29 }
 0x161   :  { %1086 = vst [vmem:[%s1518_s4 + $0x8] sm:$0xff] %v1066_v51  ;;  %v1076_v54 = vmul.f32 %v1163_v52, %v936_v31  ;;  %v816_v29 = vrot.slane %v1383_v7, %v815_v25  ;;  %v886_v31 = vrot.slane %v1391_v8, %v811_v24  ;;  %v890_v35 = vrot.slane %v1391_v8, %v815_v25 }
 0x162   :  { %1095 = vst [vmem:[%s1518_s4 + $0x50] sm:$0xff] %v1075_v53 }
 0x163   :  { %1096 = vst [vmem:[%s1518_s4 + $0x58] sm:$0xff] %v1076_v54 }
 0x16c   :  { %v616_v60 = vpop.f32.mrb[8].mxu0 }
 0x16d   :  { %v855_v44 = vmul.f32 %v820_v57, %v616_v60  ;;  %v618_v62 = vpop.f32.mrb[9].mxu0 }
 0x16e   :  { %v856_v63 = vmul.f32 %v824_v58, %v618_v62  ;;  %v620_v4 = vpop.f32.mrb[10].mxu0 }
 0x16f   :  { %v1419_v9 = vadd.f32 %v894_v59, %v855_v44  ;;  %v865_v10 = vmul.f32 %v820_v57, %v620_v4  ;;  %v622_v11 = vpop.f32.mrb[11].mxu0 }
 0x170   :  { %v1421_v12 = vadd.f32 %v898_v61, %v856_v63  ;;  %v866_v13 = vmul.f32 %v824_v58, %v622_v11 }
 0x171   :  { %v949_v14 = vsub.f32 0.0, %v1419_v9  ;;  %v1424_v15 = vadd.f32 %v894_v59, %v865_v10 }
 0x172   :  { %v950_v16 = vsub.f32 0.0, %v1421_v12  ;;  %v1427_v17 = vadd.f32 %v898_v61, %v866_v13 }
 0x173   :  { %v973_v18 = vmul.f32 1.442695, %v949_v14  ;;  %v959_v19 = vsub.f32 0.0, %v1424_v15 }
 0x174   :  { %v975_v20 = vmul.f32 1.442695, %v950_v16  ;;  %v960_v21 = vsub.f32 0.0, %v1427_v17 }
 0x175   :  { %1164 = vpow2.f32 %v973_v18  ;;  %v993_v22 = vmul.f32 1.442695, %v959_v19 }
 0x176   :  { %1166 = vpow2.f32 %v975_v20  ;;  %v995_v23 = vmul.f32 1.442695, %v960_v21 }
 0x177   :  { %1168 = vpow2.f32 %v993_v22 }
 0x178   :  { %1170 = vpow2.f32 %v995_v23 }
 0x17b   :  { %v487_v28 = vpop.f32.mrb[4].mxu1 }
 0x17c   :  { %v531_v30 = vadd.f32 %v1370_v1, %v487_v28  ;;  %v489_v33 = vpop.f32.mrb[5].mxu1  ;;  %v798_v28 = vld [vmem:[#allocation4 + $0x8] sm:$0x3] }
 0x17d   :  { %v533_v34 = vadd.f32 %v1372_v0, %v489_v33  ;;  %v491_v36 = vpop.f32.mrb[6].mxu1 }
 0x17e   :  { %v853_v38 = vmul.f32 %v812_v26, %v531_v30  ;;  %v535_v39 = vadd.f32 %v1374_v2, %v491_v36  ;;  %v493_v40 = vpop.f32.mrb[7].mxu1  ;;  %v836_v30 = vrot.slane %v798_v28, %v1381_v6 }
 0x17f   :  { %v1165_v37 = vpop.eup %1164  ;;  %v854_v27 = vmul.f32 %v816_v29, %v533_v34  ;;  %v537_v43 = vadd.f32 %v1376_v3, %v493_v40 }
 0x180   :  { %v1167_v41 = vpop.eup %1166  ;;  %v1009_v42 = vadd.f32 1.0, %v1165_v37  ;;  %v927_v46 = vadd.f32 %v886_v31, %v853_v38  ;;  %v863_v47 = vmul.f32 %v812_v26, %v535_v39 }
 0x181   :  { %v1169_v45 = vpop.eup %1168  ;;  %v1010_v1 = vadd.f32 1.0, %v1167_v41  ;;  %v928_v49 = vadd.f32 %v890_v35, %v854_v27  ;;  %v864_v50 = vmul.f32 %v816_v29, %v537_v43  ;;  %v872_v29 = vld [vmem:[%s1517_s3 + $0x8] sm:$0x3] }
 0x182   :  { %v1171_v48 = vpop.eup %1170  ;;  %1172 = vrcp.f32 %v1009_v42  ;;  %v1019_v0 = vadd.f32 1.0, %v1169_v45  ;;  %v947_v52 = vsub.f32 0.0, %v927_v46  ;;  %v937_v53 = vadd.f32 %v886_v31, %v863_v47 }
 0x183   :  { %1174 = vrcp.f32 %v1010_v1  ;;  %v1020_v51 = vadd.f32 1.0, %v1171_v48  ;;  %v948_v2 = vsub.f32 0.0, %v928_v49  ;;  %v938_v54 = vadd.f32 %v890_v35, %v864_v50 }
 0x184   :  { %1176 = vrcp.f32 %v1019_v0  ;;  %v969_v55 = vmul.f32 1.442695, %v947_v52  ;;  %v957_v56 = vsub.f32 0.0, %v937_v53  ;;  %v840_v31 = vrot.slane %v798_v28, %v1386_v32 }
 0x185   :  { %1178 = vrcp.f32 %v1020_v51  ;;  %v971_v3 = vmul.f32 1.442695, %v948_v2  ;;  %v958_v57 = vsub.f32 0.0, %v938_v54  ;;  %v910_v33 = vrot.slane %v872_v29, %v1381_v6 }
 0x186   :  { %1180 = vpow2.f32 %v969_v55  ;;  %v989_v58 = vmul.f32 1.442695, %v957_v56  ;;  %v914_v35 = vrot.slane %v872_v29, %v1386_v32  ;;  %v827_v50 = vsub.s32 6, %v1378_v5 }
 0x187   :  { %1182 = vpow2.f32 %v971_v3  ;;  %v991_v59 = vmul.f32 1.442695, %v958_v57  ;;  %v831_v52 = vsub.s32 7, %v1378_v5 }
 0x188   :  { %1184 = vpow2.f32 %v989_v58 }
 0x189   :  { %1186 = vpow2.f32 %v991_v59  ;;  %v832_v2 = vrot.slane %v1383_v7, %v831_v52  ;;  %v906_v56 = vrot.slane %v1391_v8, %v831_v52 }
 0x18c   :  { %v1173_v60 = vpop.eup %1172 }
 0x18d   :  { %v1175_v61 = vpop.eup %1174  ;;  %v1069_v44 = vmul.f32 %v1173_v60, %v1419_v9 }
 0x18e   :  { %v1177_v62 = vpop.eup %1176  ;;  %v1070_v63 = vmul.f32 %v1175_v61, %v1421_v12 }
 0x18f   :  { %v1179_v4 = vpop.eup %1178  ;;  %1089 = vst [vmem:[%s1518_s4 + $0x20] sm:$0xff] %v1069_v44  ;;  %v1079_v10 = vmul.f32 %v1177_v62, %v1424_v15 }
 0x190   :  { %1090 = vst [vmem:[%s1518_s4 + $0x28] sm:$0xff] %v1070_v63  ;;  %v1080_v11 = vmul.f32 %v1179_v4, %v1427_v17  ;;  %v1181_v13 = vpop.eup %1180 }
 0x191   :  { %1099 = vst [vmem:[%s1518_s4 + $0x70] sm:$0xff] %v1079_v10  ;;  %v1183_v9 = vpop.eup %1182  ;;  %v1007_v12 = vadd.f32 1.0, %v1181_v13 }
 0x192   :  { %1100 = vst [vmem:[%s1518_s4 + $0x78] sm:$0xff] %v1080_v11  ;;  %v1185_v14 = vpop.eup %1184  ;;  %v1008_v16 = vadd.f32 1.0, %v1183_v9 }
 0x193   :  { %v1187_v15 = vpop.eup %1186  ;;  %1188 = vrcp.f32 %v1007_v12  ;;  %v1017_v18 = vadd.f32 1.0, %v1185_v14 }
 0x194   :  { %1190 = vrcp.f32 %v1008_v16  ;;  %v1018_v19 = vadd.f32 1.0, %v1187_v15 }
 0x195   :  { %1192 = vrcp.f32 %v1017_v18 }
 0x196   :  { %1194 = vrcp.f32 %v1018_v19 }
 0x19d   :  { %v1189_v17 = vpop.eup %1188 }
 0x19e   :  { %v1191_v20 = vpop.eup %1190  ;;  %v1067_v21 = vmul.f32 %v1189_v17, %v927_v46 }
 0x19f   :  { %v1193_v22 = vpop.eup %1192  ;;  %v1068_v23 = vmul.f32 %v1191_v20, %v928_v49 }
 0x1a0   :  { %v1195_v24 = vpop.eup %1194  ;;  %1087 = vst [vmem:[%s1518_s4 + $0x10] sm:$0xff] %v1067_v21  ;;  %v1077_v25 = vmul.f32 %v1193_v22, %v937_v53  ;;  %v828_v53 = vrot.slane %v1383_v7, %v827_v50 }
 0x1a1   :  { %1088 = vst [vmem:[%s1518_s4 + $0x18] sm:$0xff] %v1068_v23  ;;  %v1078_v26 = vmul.f32 %v1195_v24, %v938_v54  ;;  %v902_v54 = vrot.slane %v1391_v8, %v827_v50 }
 0x1a2   :  { %1097 = vst [vmem:[%s1518_s4 + $0x60] sm:$0xff] %v1077_v25 }
 0x1a3   :  { %1098 = vst [vmem:[%s1518_s4 + $0x68] sm:$0xff] %v1078_v26 }
 0x1bc   :  { %v788_v34 = vpop.f32.mrb[12].mxu0 }
 0x1bd   :  { %v859_v36 = vmul.f32 %v836_v30, %v788_v34  ;;  %v790_v37 = vpop.f32.mrb[13].mxu0 }
 0x1be   :  { %v860_v38 = vmul.f32 %v840_v31, %v790_v37  ;;  %v792_v39 = vpop.f32.mrb[14].mxu0 }
 0x1bf   :  { %v1476_v40 = vadd.f32 %v910_v33, %v859_v36  ;;  %v869_v41 = vmul.f32 %v836_v30, %v792_v39  ;;  %v794_v42 = vpop.f32.mrb[15].mxu0 }
 0x1c0   :  { %v934_v27 = vadd.f32 %v914_v35, %v860_v38  ;;  %v870_v43 = vmul.f32 %v840_v31, %v794_v42 }
 0x1c1   :  { %v953_v45 = vsub.f32 0.0, %v1476_v40  ;;  %v943_v1 = vadd.f32 %v910_v33, %v869_v41 }
 0x1c2   :  { %v954_v46 = vsub.f32 0.0, %v934_v27  ;;  %v1479_v47 = vadd.f32 %v914_v35, %v870_v43 }
 0x1c3   :  { %v981_v6 = vmul.f32 1.442695, %v953_v45  ;;  %v963_v48 = vsub.f32 0.0, %v943_v1 }
 0x1c4   :  { %v983_v0 = vmul.f32 1.442695, %v954_v46  ;;  %v964_v32 = vsub.f32 0.0, %v1479_v47 }
 0x1c5   :  { %1196 = vpow2.f32 %v981_v6  ;;  %v1001_v49 = vmul.f32 1.442695, %v963_v48 }
 0x1c6   :  { %1198 = vpow2.f32 %v983_v0  ;;  %v1003_v51 = vmul.f32 1.442695, %v964_v32 }
 0x1c7   :  { %1200 = vpow2.f32 %v1001_v49 }
 0x1c8   :  { %1202 = vpow2.f32 %v1003_v51 }
 0x1cb   :  { %v702_v55 = vpop.f32.mrb[8].mxu1 }
 0x1cc   :  { %v857_v3 = vmul.f32 %v828_v53, %v702_v55  ;;  %v704_v57 = vpop.f32.mrb[9].mxu1 }
 0x1cd   :  { %v858_v58 = vmul.f32 %v832_v2, %v704_v57  ;;  %v706_v59 = vpop.f32.mrb[10].mxu1 }
 0x1ce   :  { %v931_v61 = vadd.f32 %v902_v54, %v857_v3  ;;  %v867_v44 = vmul.f32 %v828_v53, %v706_v59  ;;  %v708_v62 = vpop.f32.mrb[11].mxu1 }
 0x1cf   :  { %v1197_v60 = vpop.eup %1196  ;;  %v932_v4 = vadd.f32 %v906_v56, %v858_v58  ;;  %v868_v10 = vmul.f32 %v832_v2, %v708_v62 }
 0x1d0   :  { %v1199_v5 = vpop.eup %1198  ;;  %v1013_v63 = vadd.f32 1.0, %v1197_v60  ;;  %v951_v7 = vsub.f32 0.0, %v931_v61  ;;  %v941_v9 = vadd.f32 %v902_v54, %v867_v44 }
 0x1d1   :  { %v1201_v11 = vpop.eup %1200  ;;  %v1014_v13 = vadd.f32 1.0, %v1199_v5  ;;  %v952_v8 = vsub.f32 0.0, %v932_v4  ;;  %v942_v16 = vadd.f32 %v906_v56, %v868_v10 }
 0x1d2   :  { %v1203_v12 = vpop.eup %1202  ;;  %1204 = vrcp.f32 %v1013_v63  ;;  %v1023_v14 = vadd.f32 1.0, %v1201_v11  ;;  %v977_v18 = vmul.f32 1.442695, %v951_v7  ;;  %v961_v19 = vsub.f32 0.0, %v941_v9 }
 0x1d3   :  { %1206 = vrcp.f32 %v1014_v13  ;;  %v1024_v15 = vadd.f32 1.0, %v1203_v12  ;;  %v979_v17 = vmul.f32 1.442695, %v952_v8  ;;  %v962_v20 = vsub.f32 0.0, %v942_v16 }
 0x1d4   :  { %1208 = vrcp.f32 %v1023_v14  ;;  %v997_v21 = vmul.f32 1.442695, %v961_v19 }
 0x1d5   :  { %1210 = vrcp.f32 %v1024_v15  ;;  %v999_v22 = vmul.f32 1.442695, %v962_v20 }
 0x1d6   :  { %1212 = vpow2.f32 %v977_v18 }
 0x1d7   :  { %1214 = vpow2.f32 %v979_v17 }
 0x1d8   :  { %1216 = vpow2.f32 %v997_v21 }
 0x1d9   :  { %1218 = vpow2.f32 %v999_v22 }
 0x1dc   :  { %v1205_v23 = vpop.eup %1204 }
 0x1dd   :  { %v1207_v24 = vpop.eup %1206  ;;  %v1073_v25 = vmul.f32 %v1205_v23, %v1476_v40 }
 0x1de   :  { %v1209_v26 = vpop.eup %1208  ;;  %v1074_v28 = vmul.f32 %v1207_v24, %v934_v27 }
 0x1df   :  { %v1211_v29 = vpop.eup %1210  ;;  %1093 = vst [vmem:[%s1518_s4 + $0x40] sm:$0xff] %v1073_v25  ;;  %v1083_v30 = vmul.f32 %v1209_v26, %v943_v1 }
 0x1e0   :  { %v1213_v31 = vpop.eup %1212  ;;  %1094 = vst [vmem:[%s1518_s4 + $0x48] sm:$0xff] %v1074_v28  ;;  %v1084_v33 = vmul.f32 %v1211_v29, %v1479_v47 }
 0x1e1   :  { %v1215_v34 = vpop.eup %1214  ;;  %1103 = vst [vmem:[%s1518_s4 + $0x90] sm:$0xff] %v1083_v30  ;;  %v1011_v35 = vadd.f32 1.0, %v1213_v31 }
 0x1e2   :  { %v1217_v36 = vpop.eup %1216  ;;  %1104 = vst [vmem:[%s1518_s4 + $0x98] sm:$0xff] %v1084_v33  ;;  %v1012_v37 = vadd.f32 1.0, %v1215_v34 }
 0x1e3   :  { %v1219_v38 = vpop.eup %1218  ;;  %1220 = vrcp.f32 %v1011_v35  ;;  %v1021_v39 = vadd.f32 1.0, %v1217_v36 }
 0x1e4   :  { %1222 = vrcp.f32 %v1012_v37  ;;  %v1022_v40 = vadd.f32 1.0, %v1219_v38 }
 0x1e5   :  { %1224 = vrcp.f32 %v1021_v39 }
 0x1e6   :  { %1226 = vrcp.f32 %v1022_v40 }
 0x1ed   :  { %v1221_v41 = vpop.eup %1220 }
 0x1ee   :  { %v1223_v42 = vpop.eup %1222  ;;  %v1071_v27 = vmul.f32 %v1221_v41, %v931_v61 }
 0x1ef   :  { %v1225_v43 = vpop.eup %1224  ;;  %v1072_v45 = vmul.f32 %v1223_v42, %v932_v4 }
 0x1f0   :  { %v1227_v1 = vpop.eup %1226  ;;  %1091 = vst [vmem:[%s1518_s4 + $0x30] sm:$0xff] %v1071_v27  ;;  %v1081_v46 = vmul.f32 %v1225_v43, %v941_v9 }
 0x1f1   :  { %1092 = vst [vmem:[%s1518_s4 + $0x38] sm:$0xff] %v1072_v45  ;;  %v1082_v47 = vmul.f32 %v1227_v1, %v942_v16 }
 0x1f2   :  { %1101 = vst [vmem:[%s1518_s4 + $0x80] sm:$0xff] %v1081_v46 }
 0x1f3   :  { %1102 = vst [vmem:[%s1518_s4 + $0x88] sm:$0xff] %v1082_v47 }
 0x1f4   :  { %1109 = vsyncpa [#allocation3], 1 }
 0x1f5   :  { %1110 = vsyncpa [#allocation5], 1 }

// kernel: time_embedding_fwd.3
= control target key start
LH: loop header
LB: loop body
LE: loop exit
PB: predicated region body
PF: predicated region fallthrough
CT: control target
= control target key end

     0   :  { %9 = vsyncpa [#allocation3], 0  ;;  %s3329_s0 = inlined_call_operand.vmem [shape: bf16[16,1280], index: 0, kind: input, shape index: {}]   ;;  %s3330_s1 = inlined_call_operand.hbm [shape: s8[1280,1280], index: 1, kind: input, shape index: {}]   ;;  %s3331_s2 = inlined_call_operand.hbm [shape: f32[1,1280], index: 2, kind: input, shape index: {}]   ;;  %s3332_s3 = inlined_call_operand.vmem [shape: f32[1,1280], index: 3, kind: input, shape index: {}]   ;;  %s3333_s4 = inlined_call_operand.vmem [shape: f32[16,1280], index: 4, kind: output, shape index: {}]  }
   0x1   :  { %10 = vsyncpa [#allocation5], 0  ;;  %s2947_s15 = smov [#allocation2]   ;;  %s2899_s19 = scalar_lea.hbm %s3330_s1, 51200 }
   0x2   :  { %s18_s16 = sshll.u32 %s2947_s15, 4  ;;  %p2900_p0 = scmp.ne.s32.totalorder %s3330_s1, %s2899_s19  ;;  %s19_s16 = int_to_ptr.vmem [resolvable:$true] %s18_s16 }
   0x3   :  { %p2903_p1 = scmp.lt.u32.totalorder %s2899_s19, %s3330_s1 }
   0x5   :  { %p2905_p2 = pnand %p2903_p1, %p2900_p0 }
   0x7   :  { %2908 = shalt.err (!%p2905_p2)
}
   0x8   :  { %s2909_s24 = scalar_lea.vmem %s19_s16, 51200  ;;  %p2914_p4 = scmp.lt.s32.totalorder %s19_s16, %s19_s16 }
   0x9   :  { %p2910_p3 = scmp.ne.s32.totalorder %s19_s16, %s2909_s24  ;;  %p2915_p5 = scmp.lt.s32.totalorder %s2909_s24, %s2909_s24 }
   0xb   :  { %p2916_p6 = por %p2915_p5, %p2914_p4 }
   0xd   :  { %p2917_p7 = pnand %p2916_p6, %p2910_p3 }
   0xf   :  { %2920 = shalt.err (!%p2917_p7)
}
  0x10   :  { %s2948_s25 = smov 1280   ;;  %s2949_s26 = smov 80  }
  0x11   :  { %24 = dma.hbm_to_vmem [thread:$0]  %s3330_s1, 51200, %s19_s16, [#allocation3], %s2948_s25, %s2948_s25, %s2949_s26  }
  0x12   :  { %s2950_s29 = smov [#allocation4]   ;;  %s2921_s7 = scalar_lea.hbm %s3331_s2, 160 }
  0x13   :  { %s31_s30 = sshll.u32 %s2950_s29, 4  ;;  %p2922_p8 = scmp.ne.s32.totalorder %s3331_s2, %s2921_s7  ;;  %s32_s30 = int_to_ptr.vmem [resolvable:$true] %s31_s30 }
  0x14   :  { %p2925_p9 = scmp.lt.u32.totalorder %s2921_s7, %s3331_s2 }
  0x16   :  { %p2927_p10 = pnand %p2925_p9, %p2922_p8 }
  0x18   :  { %2930 = shalt.err (!%p2927_p10)
}
  0x19   :  { %s2931_s12 = scalar_lea.vmem %s32_s30, 160  ;;  %p2936_p12 = scmp.lt.s32.totalorder %s32_s30, %s32_s30 }
  0x1a   :  { %p2932_p11 = scmp.ne.s32.totalorder %s32_s30, %s2931_s12  ;;  %p2937_p13 = scmp.lt.s32.totalorder %s2931_s12, %s2931_s12 }
  0x1c   :  { %p2938_p0 = por %p2937_p13, %p2936_p12 }
  0x1e   :  { %p2939_p1 = pnand %p2938_p0, %p2932_p11 }
  0x20   :  { %2942 = shalt.err (!%p2939_p1)
}
  0x21   :  { %34 = dma.hbm_to_vmem [thread:$0]  %s3331_s2, 160, %s32_s30, [#allocation5]  }
  0x22   :  { %2943 = dma.done.wait [#allocation3], 51200  }
  0x23   :  { %2944 = vsyncadd [#allocation3], 4294916096 }
  0x24   :  { %2945 = dma.done.wait [#allocation5], 160  }
  0x25   :  { %2946 = vsyncadd [#allocation5], 4294967136  ;;  %v54_v0 = vld [vmem:[#allocation2 + $0x8] sm:$0xff]  ;;  %v53_v2 = vld [vmem:[#allocation2] sm:$0xff] }
  0x26   :  { %v214_v1 = vld [vmem:[#allocation2 + $0x508] sm:$0xff]  ;;  %v454_v3 = vunpack.c.l.s8.bf16 %v54_v0  ;;  %v464_v4 = vunpack.c.h.s8.bf16 %v54_v0  ;;  %v213_v7 = vld [vmem:[#allocation2 + $0x500] sm:$0xff]  ;;  %v453_v8 = vunpack.c.l.s8.bf16 %v53_v2  ;;  %v64_v10 = vld [vmem:[#allocation2 + $0x58] sm:$0xff]  ;;  %v463_v12 = vunpack.c.h.s8.bf16 %v53_v2 }
  0x27   :  { %v774_v5 = vunpack.c.l.s8.bf16 %v214_v1  ;;  %v784_v6 = vunpack.c.h.s8.bf16 %v214_v1  ;;  %v773_v9 = vunpack.c.l.s8.bf16 %v213_v7  ;;  %v224_v11 = vld [vmem:[#allocation2 + $0x558] sm:$0xff]  ;;  %v783_v13 = vunpack.c.h.s8.bf16 %v213_v7  ;;  %v63_v16 = vld [vmem:[#allocation2 + $0x50] sm:$0xff]  ;;  %v74_v22 = vld [vmem:[#allocation2 + $0xa8] sm:$0xff] }
  0x28   :  { %1303 = vmatprep.subr.bf16.mxu1 %v454_v3  ;;  %v474_v14 = vunpack.c.l.s8.bf16 %v64_v10  ;;  %v794_v15 = vunpack.c.l.s8.bf16 %v224_v11  ;;  %v223_v17 = vld [vmem:[#allocation2 + $0x550] sm:$0xff]  ;;  %v473_v18 = vunpack.c.l.s8.bf16 %v63_v16  ;;  %v484_v20 = vunpack.c.h.s8.bf16 %v64_v10  ;;  %v234_v23 = vld [vmem:[#allocation2 + $0x5a8] sm:$0xff]  ;;  %v73_v30 = vld [vmem:[#allocation2 + $0xa0] sm:$0xff] }
  0x29   :  { %1389 = vmatprep.subr.bf16.mxu0 %v774_v5  ;;  %1304 = vmatpush1.bf16.msra.mxu1 %v453_v8  ;;  %v793_v19 = vunpack.c.l.s8.bf16 %v223_v17  ;;  %v804_v21 = vunpack.c.h.s8.bf16 %v224_v11  ;;  %v3003_v24 = vld [vmem:[%s3329_s0 + $0x4] ss:$40 sps:$4 sm:$0xff]   ;;  %v483_v25 = vunpack.c.h.s8.bf16 %v63_v16  ;;  %v803_v26 = vunpack.c.h.s8.bf16 %v223_v17  ;;  %v2788_v27 = vld [vmem:[%s3329_s0 + $0x14] ss:$40 sps:$4 sm:$0xff]  }
  0x2a   :  { %1390 = vmatpush1.bf16.msra.mxu0 %v773_v9  ;;  %1305 = vmatprep.subr.bf16.mxu1 %v464_v4  ;;  %v494_v28 = vunpack.c.l.s8.bf16 %v74_v22  ;;  %v814_v29 = vunpack.c.l.s8.bf16 %v234_v23  ;;  %v233_v31 = vld [vmem:[#allocation2 + $0x5a0] sm:$0xff]  ;;  %v493_v32 = vunpack.c.l.s8.bf16 %v73_v30  ;;  %v504_v34 = vunpack.c.h.s8.bf16 %v74_v22  ;;  %v84_v36 = vld [vmem:[#allocation2 + $0xf8] sm:$0xff]  ;;  %v83_v42 = vld [vmem:[#allocation2 + $0xf0] sm:$0xff] }
  0x2b   :  { %1391 = vmatprep.subr.bf16.mxu0 %v784_v6  ;;  %1335 = vmatprep.mubr.bf16.mxu1 %v3003_v24  ;;  %v813_v33 = vunpack.c.l.s8.bf16 %v233_v31  ;;  %v824_v35 = vunpack.c.h.s8.bf16 %v234_v23  ;;  %v244_v37 = vld [vmem:[#allocation2 + $0x5f8] sm:$0xff]  ;;  %v503_v38 = vunpack.c.h.s8.bf16 %v73_v30  ;;  %v823_v39 = vunpack.c.h.s8.bf16 %v233_v31  ;;  %v243_v43 = vld [vmem:[#allocation2 + $0x5f0] sm:$0xff]  ;;  %v94_v48 = vld [vmem:[#allocation2 + $0x148] sm:$0xff] }
  0x2c   :  { %1421 = vmatprep.mubr.bf16.mxu0 %v2788_v27  ;;  %v514_v40 = vunpack.c.l.s8.bf16 %v84_v36  ;;  %v834_v41 = vunpack.c.l.s8.bf16 %v244_v37  ;;  %v513_v44 = vunpack.c.l.s8.bf16 %v83_v42  ;;  %v833_v45 = vunpack.c.l.s8.bf16 %v243_v43  ;;  %v254_v49 = vld [vmem:[#allocation2 + $0x648] sm:$0xff]  ;;  %v93_v54 = vld [vmem:[#allocation2 + $0x140] sm:$0xff]  ;;  %v104_v60 = vld [vmem:[#allocation2 + $0x198] sm:$0xff] }
  0x2d   :  { %1306 = vmatpush1.bf16.msra.mxu1 %v463_v12  ;;  %v524_v46 = vunpack.c.h.s8.bf16 %v84_v36  ;;  %v844_v47 = vunpack.c.h.s8.bf16 %v244_v37  ;;  %v523_v50 = vunpack.c.h.s8.bf16 %v83_v42  ;;  %v843_v51 = vunpack.c.h.s8.bf16 %v243_v43  ;;  %v253_v55 = vld [vmem:[#allocation2 + $0x640] sm:$0xff]  ;;  %v264_v61 = vld [vmem:[#allocation2 + $0x698] sm:$0xff]  ;;  %v103_v2 = vld [vmem:[#allocation2 + $0x190] sm:$0xff] }
  0x2e   :  { %1392 = vmatpush1.bf16.msra.mxu0 %v783_v13  ;;  %1307 = vmatprep.subr.bf16.mxu1 %v474_v14  ;;  %v534_v52 = vunpack.c.l.s8.bf16 %v94_v48  ;;  %v854_v53 = vunpack.c.l.s8.bf16 %v254_v49  ;;  %v533_v56 = vunpack.c.l.s8.bf16 %v93_v54  ;;  %v853_v57 = vunpack.c.l.s8.bf16 %v253_v55  ;;  %v263_v3 = vld [vmem:[#allocation2 + $0x690] sm:$0xff]  ;;  %v114_v8 = vld [vmem:[#allocation2 + $0x1e8] sm:$0xff]  ;;  %v113_v14 = vld [vmem:[#allocation2 + $0x1e0] sm:$0xff] }
  0x2f   :  { %1393 = vmatprep.subr.bf16.mxu0 %v794_v15  ;;  %v544_v58 = vunpack.c.h.s8.bf16 %v94_v48  ;;  %v864_v59 = vunpack.c.h.s8.bf16 %v254_v49  ;;  %v543_v62 = vunpack.c.h.s8.bf16 %v93_v54  ;;  %v863_v63 = vunpack.c.h.s8.bf16 %v253_v55  ;;  %v274_v9 = vld [vmem:[#allocation2 + $0x6e8] sm:$0xff]  ;;  %v273_v15 = vld [vmem:[#allocation2 + $0x6e0] sm:$0xff]  ;;  %v123_v27 = vld [vmem:[#allocation2 + $0x230] sm:$0xff] }
  0x30   :  { %v554_v0 = vunpack.c.l.s8.bf16 %v104_v60  ;;  %v874_v1 = vunpack.c.l.s8.bf16 %v264_v61  ;;  %v553_v4 = vunpack.c.l.s8.bf16 %v103_v2  ;;  %v873_v5 = vunpack.c.l.s8.bf16 %v263_v3  ;;  %v2791_v42 = vld [vmem:[%s3329_s0 + $0x10] ss:$40 sps:$4 sm:$0xff]   ;;  %v3020_v49 = vld [vmem:[%s3329_s0 + $0xc] ss:$40 sps:$4 sm:$0xff]  }
  0x31   :  { %1308 = vmatpush1.bf16.msra.mxu1 %v473_v18  ;;  %v564_v6 = vunpack.c.h.s8.bf16 %v104_v60  ;;  %v884_v7 = vunpack.c.h.s8.bf16 %v264_v61  ;;  %v563_v10 = vunpack.c.h.s8.bf16 %v103_v2  ;;  %v883_v11 = vunpack.c.h.s8.bf16 %v263_v3  ;;  %v304_v48 = vld [vmem:[#allocation2 + $0x7d8] sm:$0xff]  ;;  %v143_v55 = vld [vmem:[#allocation2 + $0x2d0] sm:$0xff]  ;;  %v154_v61 = vld [vmem:[#allocation2 + $0x328] sm:$0xff] }
  0x32   :  { %1394 = vmatpush1.bf16.msra.mxu0 %v793_v19  ;;  %1309 = vmatprep.subr.bf16.mxu1 %v484_v20  ;;  %v574_v12 = vunpack.c.l.s8.bf16 %v114_v8  ;;  %v894_v13 = vunpack.c.l.s8.bf16 %v274_v9  ;;  %v573_v16 = vunpack.c.l.s8.bf16 %v113_v14  ;;  %v893_v17 = vunpack.c.l.s8.bf16 %v273_v15  ;;  %v124_v20 = vld [vmem:[#allocation2 + $0x238] sm:$0xff]  ;;  %v153_v3 = vld [vmem:[#allocation2 + $0x320] sm:$0xff] }
  0x33   :  { %1395 = vmatprep.subr.bf16.mxu0 %v804_v21  ;;  %v584_v18 = vunpack.c.h.s8.bf16 %v114_v8  ;;  %v904_v19 = vunpack.c.h.s8.bf16 %v274_v9  ;;  %v284_v21 = vld [vmem:[#allocation2 + $0x738] sm:$0xff]  ;;  %v583_v22 = vunpack.c.h.s8.bf16 %v113_v14  ;;  %v903_v23 = vunpack.c.h.s8.bf16 %v273_v15  ;;  %v163_v15 = vld [vmem:[#allocation2 + $0x370] sm:$0xff] }
  0x34   :  { %v604_v31 = vunpack.c.h.s8.bf16 %v124_v20  ;;  %v954_v54 = vunpack.c.l.s8.bf16 %v304_v48  ;;  %v964_v60 = vunpack.c.h.s8.bf16 %v304_v48  ;;  %v164_v9 = vld [vmem:[#allocation2 + $0x378] sm:$0xff]  ;;  %v354_v48 = vld [vmem:[#allocation2 + $0x968] sm:$0xff] }
  0x35   :  { %1310 = vmatpush1.bf16.msra.mxu1 %v483_v25  ;;  %v594_v25 = vunpack.c.l.s8.bf16 %v124_v20 }
  0x36   :  { %1396 = vmatpush1.bf16.msra.mxu0 %v803_v26  ;;  %1311 = vmatprep.subr.bf16.mxu1 %v494_v28  ;;  %v914_v26 = vunpack.c.l.s8.bf16 %v284_v21  ;;  %v283_v28 = vld [vmem:[#allocation2 + $0x730] sm:$0xff] }
  0x37   :  { %1397 = vmatprep.subr.bf16.mxu0 %v814_v29  ;;  %v593_v29 = vunpack.c.l.s8.bf16 %v123_v27  ;;  %v913_v30 = vunpack.c.l.s8.bf16 %v283_v28  ;;  %v923_v36 = vunpack.c.h.s8.bf16 %v283_v28  ;;  %v173_v28 = vld [vmem:[#allocation2 + $0x3c0] sm:$0xff] }
  0x39   :  { %1312 = vmatpush1.bf16.msra.mxu1 %v493_v32  ;;  %v924_v32 = vunpack.c.h.s8.bf16 %v284_v21  ;;  %v174_v21 = vld [vmem:[#allocation2 + $0x3c8] sm:$0xff] }
  0x3a   :  { %1398 = vmatpush1.bf16.msra.mxu0 %v813_v33  ;;  %1313 = vmatprep.subr.bf16.mxu1 %v504_v34  ;;  %v134_v33 = vld [vmem:[#allocation2 + $0x288] sm:$0xff] }
  0x3b   :  { %1399 = vmatprep.subr.bf16.mxu0 %v824_v35  ;;  %v294_v34 = vld [vmem:[#allocation2 + $0x788] sm:$0xff]  ;;  %v603_v35 = vunpack.c.h.s8.bf16 %v123_v27  ;;  %v614_v37 = vunpack.c.l.s8.bf16 %v134_v33 }
  0x3d   :  { %1314 = vmatpush1.bf16.msra.mxu1 %v503_v38  ;;  %v934_v38 = vunpack.c.l.s8.bf16 %v294_v34 }
  0x3e   :  { %1400 = vmatpush1.bf16.msra.mxu0 %v823_v39  ;;  %1315 = vmatprep.subr.bf16.mxu1 %v514_v40  ;;  %v133_v39 = vld [vmem:[#allocation2 + $0x280] sm:$0xff] }
  0x3f   :  { %1401 = vmatprep.subr.bf16.mxu0 %v834_v41  ;;  %v293_v40 = vld [vmem:[#allocation2 + $0x780] sm:$0xff]  ;;  %v613_v43 = vunpack.c.l.s8.bf16 %v133_v39 }
  0x40   :  { %v3012_v41 = vld [vmem:[%s3329_s0] ss:$40 sps:$4 sm:$0xff]  }
  0x41   :  { %1316 = vmatpush1.bf16.msra.mxu1 %v513_v44  ;;  %v933_v44 = vunpack.c.l.s8.bf16 %v293_v40 }
  0x42   :  { %1402 = vmatpush1.bf16.msra.mxu0 %v833_v45  ;;  %1317 = vmatprep.subr.bf16.mxu1 %v524_v46  ;;  %v624_v45 = vunpack.c.h.s8.bf16 %v134_v33  ;;  %v944_v46 = vunpack.c.h.s8.bf16 %v294_v34  ;;  %v184_v34 = vld [vmem:[#allocation2 + $0x418] sm:$0xff] }
  0x43   :  { %1403 = vmatprep.subr.bf16.mxu0 %v844_v47  ;;  %v144_v47 = vld [vmem:[#allocation2 + $0x2d8] sm:$0xff] }
  0x45   :  { %1318 = vmatpush1.bf16.msra.mxu1 %v523_v50  ;;  %v2795_v50 = vld [vmem:[%s3329_s0 + $0x1c] ss:$40 sps:$4 sm:$0xff]  }
  0x46   :  { %1404 = vmatpush1.bf16.msra.mxu0 %v843_v51  ;;  %1319 = vmatprep.subr.bf16.mxu1 %v534_v52  ;;  %v623_v51 = vunpack.c.h.s8.bf16 %v133_v39  ;;  %v943_v52 = vunpack.c.h.s8.bf16 %v293_v40  ;;  %v183_v40 = vld [vmem:[#allocation2 + $0x410] sm:$0xff] }
  0x47   :  { %1405 = vmatprep.subr.bf16.mxu0 %v854_v53  ;;  %v634_v53 = vunpack.c.l.s8.bf16 %v144_v47 }
  0x49   :  { %1320 = vmatpush1.bf16.msra.mxu1 %v533_v56  ;;  %v303_v56 = vld [vmem:[#allocation2 + $0x7d0] sm:$0xff] }
  0x4a   :  { %1406 = vmatpush1.bf16.msra.mxu0 %v853_v57  ;;  %1321 = vmatprep.subr.bf16.mxu1 %v544_v58  ;;  %v633_v57 = vunpack.c.l.s8.bf16 %v143_v55  ;;  %v953_v58 = vunpack.c.l.s8.bf16 %v303_v56 }
  0x4b   :  { %1407 = vmatprep.subr.bf16.mxu0 %v864_v59  ;;  %v644_v59 = vunpack.c.h.s8.bf16 %v144_v47  ;;  %v194_v47 = vld [vmem:[#allocation2 + $0x468] sm:$0xff] }
  0x4d   :  { %1322 = vmatpush1.bf16.msra.mxu1 %v543_v62  ;;  %v314_v62 = vld [vmem:[#allocation2 + $0x828] sm:$0xff] }
  0x4e   :  { %1408 = vmatpush1.bf16.msra.mxu0 %v863_v63  ;;  %1323 = vmatprep.subr.bf16.mxu1 %v554_v0  ;;  %v643_v63 = vunpack.c.h.s8.bf16 %v143_v55  ;;  %v963_v0 = vunpack.c.h.s8.bf16 %v303_v56  ;;  %v974_v2 = vunpack.c.l.s8.bf16 %v314_v62  ;;  %v984_v8 = vunpack.c.h.s8.bf16 %v314_v62  ;;  %v353_v55 = vld [vmem:[#allocation2 + $0x960] sm:$0xff] }
  0x4f   :  { %1409 = vmatprep.subr.bf16.mxu0 %v874_v1  ;;  %v654_v1 = vunpack.c.l.s8.bf16 %v154_v61 }
  0x51   :  { %1324 = vmatpush1.bf16.msra.mxu1 %v553_v4  ;;  %v313_v4 = vld [vmem:[#allocation2 + $0x820] sm:$0xff] }
  0x52   :  { %1410 = vmatpush1.bf16.msra.mxu0 %v873_v5  ;;  %1325 = vmatprep.subr.bf16.mxu1 %v564_v6  ;;  %v653_v5 = vunpack.c.l.s8.bf16 %v153_v3  ;;  %v973_v6 = vunpack.c.l.s8.bf16 %v313_v4 }
  0x53   :  { %1411 = vmatprep.subr.bf16.mxu0 %v884_v7  ;;  %v664_v7 = vunpack.c.h.s8.bf16 %v154_v61  ;;  %v364_v61 = vld [vmem:[#allocation2 + $0x9b8] sm:$0xff] }
  0x55   :  { %1326 = vmatpush1.bf16.msra.mxu1 %v563_v10  ;;  %v324_v10 = vld [vmem:[#allocation2 + $0x878] sm:$0xff] }
  0x56   :  { %1412 = vmatpush1.bf16.msra.mxu0 %v883_v11  ;;  %1327 = vmatprep.subr.bf16.mxu1 %v574_v12  ;;  %v663_v11 = vunpack.c.h.s8.bf16 %v153_v3  ;;  %v983_v12 = vunpack.c.h.s8.bf16 %v313_v4  ;;  %v994_v14 = vunpack.c.l.s8.bf16 %v324_v10  ;;  %v1004_v20 = vunpack.c.h.s8.bf16 %v324_v10  ;;  %v363_v3 = vld [vmem:[#allocation2 + $0x9b0] sm:$0xff] }
  0x57   :  { %1413 = vmatprep.subr.bf16.mxu0 %v894_v13  ;;  %v674_v13 = vunpack.c.l.s8.bf16 %v164_v9 }
  0x59   :  { %1328 = vmatpush1.bf16.msra.mxu1 %v573_v16  ;;  %v323_v16 = vld [vmem:[#allocation2 + $0x870] sm:$0xff] }
  0x5a   :  { %1414 = vmatpush1.bf16.msra.mxu0 %v893_v17  ;;  %1329 = vmatprep.subr.bf16.mxu1 %v584_v18  ;;  %v673_v17 = vunpack.c.l.s8.bf16 %v163_v15  ;;  %v993_v18 = vunpack.c.l.s8.bf16 %v323_v16 }
  0x5b   :  { %1415 = vmatprep.subr.bf16.mxu0 %v904_v19  ;;  %v684_v19 = vunpack.c.h.s8.bf16 %v164_v9  ;;  %v56_v9 = vld [vmem:[#allocation2 + $0x18] sm:$0xff] }
  0x5d   :  { %1330 = vmatpush1.bf16.msra.mxu1 %v583_v22  ;;  %v334_v22 = vld [vmem:[#allocation2 + $0x8c8] sm:$0xff] }
  0x5e   :  { %1416 = vmatpush1.bf16.msra.mxu0 %v903_v23  ;;  %1331 = vmatprep.subr.bf16.mxu1 %v594_v25  ;;  %v683_v23 = vunpack.c.h.s8.bf16 %v163_v15  ;;  %v1003_v25 = vunpack.c.h.s8.bf16 %v323_v16  ;;  %v1014_v27 = vunpack.c.l.s8.bf16 %v334_v22  ;;  %v1024_v33 = vunpack.c.h.s8.bf16 %v334_v22  ;;  %v55_v15 = vld [vmem:[#allocation2 + $0x10] sm:$0xff]  ;;  %v384_v22 = vld [vmem:[#allocation2 + $0xa58] sm:$0xff] }
  0x5f   :  { %1417 = vmatprep.subr.bf16.mxu0 %v914_v26  ;;  %v694_v26 = vunpack.c.l.s8.bf16 %v174_v21  ;;  %v3030_v16 = vld [vmem:[%s3329_s0 + $0x8] ss:$40 sps:$4 sm:$0xff]  }
  0x61   :  { %1332 = vmatpush1.bf16.msra.mxu1 %v593_v29  ;;  %v333_v29 = vld [vmem:[#allocation2 + $0x8c0] sm:$0xff] }
  0x62   :  { %1418 = vmatpush1.bf16.msra.mxu0 %v913_v30  ;;  %1333 = vmatprep.subr.bf16.mxu1 %v604_v31  ;;  %v693_v30 = vunpack.c.l.s8.bf16 %v173_v28  ;;  %v1013_v31 = vunpack.c.l.s8.bf16 %v333_v29 }
  0x63   :  { %1419 = vmatprep.subr.bf16.mxu0 %v924_v32  ;;  %v704_v32 = vunpack.c.h.s8.bf16 %v174_v21  ;;  %v466_v21 = vunpack.c.h.s8.bf16 %v56_v9 }
  0x65   :  { %1334 = vmatpush1.bf16.msra.mxu1 %v603_v35  ;;  %v344_v35 = vld [vmem:[#allocation2 + $0x918] sm:$0xff] }
  0x66   :  { %1420 = vmatpush1.bf16.msra.mxu0 %v923_v36  ;;  %1346 = vmatprep.subr.bf16.mxu1 %v614_v37  ;;  %v703_v36 = vunpack.c.h.s8.bf16 %v173_v28  ;;  %v1023_v37 = vunpack.c.h.s8.bf16 %v333_v29  ;;  %v1034_v39 = vunpack.c.l.s8.bf16 %v344_v35  ;;  %v1114_v28 = vunpack.c.l.s8.bf16 %v384_v22 }
  0x67   :  { %1432 = vmatprep.subr.bf16.mxu0 %v934_v38  ;;  %v714_v38 = vunpack.c.l.s8.bf16 %v184_v34 }
  0x68   :  { %1336 = vmatmul.mubr.bf16.vlgmr.msra.gmra.mrb[0].mxu1 %v3012_v41 }
  0x69   :  { %1422 = vmatmul.mubr.bf16.vlgmr.msra.gmra.mrb[0].mxu0 %v2791_v42  ;;  %1347 = vmatpush1.bf16.msra.mxu1 %v613_v43  ;;  %v343_v42 = vld [vmem:[#allocation2 + $0x910] sm:$0xff]  ;;  %v713_v43 = vunpack.c.l.s8.bf16 %v183_v40 }
  0x6a   :  { %1433 = vmatpush1.bf16.msra.mxu0 %v933_v44  ;;  %1348 = vmatprep.subr.bf16.mxu1 %v624_v45  ;;  %v1033_v44 = vunpack.c.l.s8.bf16 %v343_v42  ;;  %v724_v45 = vunpack.c.h.s8.bf16 %v184_v34  ;;  %v1124_v34 = vunpack.c.h.s8.bf16 %v384_v22 }
  0x6b   :  { %1434 = vmatprep.subr.bf16.mxu0 %v944_v46  ;;  %1378 = vmatprep.mubr.bf16.mxu1 %v3020_v49  ;;  %v1044_v46 = vunpack.c.h.s8.bf16 %v344_v35 }
  0x6c   :  { %1464 = vmatprep.mubr.bf16.mxu0 %v2795_v50  ;;  %v723_v50 = vunpack.c.h.s8.bf16 %v183_v40 }
  0x6d   :  { %1349 = vmatpush1.bf16.msra.mxu1 %v623_v51  ;;  %v1043_v51 = vunpack.c.h.s8.bf16 %v343_v42 }
  0x6e   :  { %1435 = vmatpush1.bf16.msra.mxu0 %v943_v52  ;;  %1350 = vmatprep.subr.bf16.mxu1 %v634_v53  ;;  %v734_v52 = vunpack.c.l.s8.bf16 %v194_v47  ;;  %v1054_v53 = vunpack.c.l.s8.bf16 %v354_v48 }
  0x6f   :  { %1436 = vmatprep.subr.bf16.mxu0 %v954_v54  ;;  %v193_v54 = vld [vmem:[#allocation2 + $0x460] sm:$0xff] }
  0x70   :  { %v733_v56 = vunpack.c.l.s8.bf16 %v193_v54  ;;  %v743_v62 = vunpack.c.h.s8.bf16 %v193_v54 }
  0x71   :  { %1351 = vmatpush1.bf16.msra.mxu1 %v633_v57  ;;  %v1053_v57 = vunpack.c.l.s8.bf16 %v353_v55 }
  0x72   :  { %1437 = vmatpush1.bf16.msra.mxu0 %v953_v58  ;;  %1352 = vmatprep.subr.bf16.mxu1 %v644_v59  ;;  %v744_v58 = vunpack.c.h.s8.bf16 %v194_v47  ;;  %v1064_v59 = vunpack.c.h.s8.bf16 %v354_v48 }
  0x73   :  { %1438 = vmatprep.subr.bf16.mxu0 %v964_v60  ;;  %v204_v60 = vld [vmem:[#allocation2 + $0x4b8] sm:$0xff] }
  0x75   :  { %1353 = vmatpush1.bf16.msra.mxu1 %v643_v63  ;;  %v1063_v63 = vunpack.c.h.s8.bf16 %v353_v55 }
  0x76   :  { %1439 = vmatpush1.bf16.msra.mxu0 %v963_v0  ;;  %1354 = vmatprep.subr.bf16.mxu1 %v654_v1  ;;  %v754_v0 = vunpack.c.l.s8.bf16 %v204_v60  ;;  %v1074_v1 = vunpack.c.l.s8.bf16 %v364_v61 }
  0x77   :  { %1440 = vmatprep.subr.bf16.mxu0 %v974_v2  ;;  %v203_v2 = vld [vmem:[#allocation2 + $0x4b0] sm:$0xff] }
  0x78   :  { %v753_v4 = vunpack.c.l.s8.bf16 %v203_v2  ;;  %v763_v10 = vunpack.c.h.s8.bf16 %v203_v2 }
  0x79   :  { %1355 = vmatpush1.bf16.msra.mxu1 %v653_v5  ;;  %v1073_v5 = vunpack.c.l.s8.bf16 %v363_v3 }
  0x7a   :  { %1441 = vmatpush1.bf16.msra.mxu0 %v973_v6  ;;  %1356 = vmatprep.subr.bf16.mxu1 %v664_v7  ;;  %v764_v6 = vunpack.c.h.s8.bf16 %v204_v60  ;;  %v1084_v7 = vunpack.c.h.s8.bf16 %v364_v61 }
  0x7b   :  { %1442 = vmatprep.subr.bf16.mxu0 %v984_v8  ;;  %v374_v8 = vld [vmem:[#allocation2 + $0xa08] sm:$0xff] }
  0x7d   :  { %1357 = vmatpush1.bf16.msra.mxu1 %v663_v11  ;;  %v1083_v11 = vunpack.c.h.s8.bf16 %v363_v3 }
  0x7e   :  { %1443 = vmatpush1.bf16.msra.mxu0 %v983_v12  ;;  %1358 = vmatprep.subr.bf16.mxu1 %v674_v13  ;;  %v1094_v12 = vunpack.c.l.s8.bf16 %v374_v8  ;;  %v456_v13 = vunpack.c.l.s8.bf16 %v56_v9 }
  0x7f   :  { %1444 = vmatprep.subr.bf16.mxu0 %v994_v14  ;;  %v373_v14 = vld [vmem:[#allocation2 + $0xa00] sm:$0xff] }
  0x81   :  { %1359 = vmatpush1.bf16.msra.mxu1 %v673_v17  ;;  %v2797_v17 = vld [vmem:[%s3329_s0 + $0x18] ss:$40 sps:$4 sm:$0xff]  }
  0x82   :  { %1445 = vmatpush1.bf16.msra.mxu0 %v993_v18  ;;  %1360 = vmatprep.subr.bf16.mxu1 %v684_v19  ;;  %v1093_v18 = vunpack.c.l.s8.bf16 %v373_v14  ;;  %v455_v19 = vunpack.c.l.s8.bf16 %v55_v15 }
  0x83   :  { %1446 = vmatprep.subr.bf16.mxu0 %v1004_v20  ;;  %v1104_v20 = vunpack.c.h.s8.bf16 %v374_v8 }
  0x85   :  { %1361 = vmatpush1.bf16.msra.mxu1 %v683_v23  ;;  %v66_v23 = vld [vmem:[#allocation2 + $0x68] sm:$0xff] }
  0x86   :  { %1447 = vmatpush1.bf16.msra.mxu0 %v1003_v25  ;;  %1362 = vmatprep.subr.bf16.mxu1 %v694_v26  ;;  %v2798_v25 = vld [vmem:[%s3329_s0 + $0x24] ss:$40 sps:$4 sm:$0xff]   ;;  %v1103_v26 = vunpack.c.h.s8.bf16 %v373_v14  ;;  %v476_v29 = vunpack.c.l.s8.bf16 %v66_v23  ;;  %v486_v35 = vunpack.c.h.s8.bf16 %v66_v23 }
  0x87   :  { %1448 = vmatprep.subr.bf16.mxu0 %v1014_v27  ;;  %v465_v27 = vunpack.c.h.s8.bf16 %v55_v15  ;;  %v434_v23 = vld [vmem:[#allocation2 + $0xbe8] sm:$0xff] }
  0x89   :  { %1363 = vmatpush1.bf16.msra.mxu1 %v693_v30  ;;  %v383_v30 = vld [vmem:[#allocation2 + $0xa50] sm:$0xff] }
  0x8a   :  { %1449 = vmatpush1.bf16.msra.mxu0 %v1013_v31  ;;  %1364 = vmatprep.subr.bf16.mxu1 %v704_v32  ;;  %v65_v31 = vld [vmem:[#allocation2 + $0x60] sm:$0xff]  ;;  %v1113_v32 = vunpack.c.l.s8.bf16 %v383_v30 }
  0x8b   :  { %1450 = vmatprep.subr.bf16.mxu0 %v1024_v33  ;;  %v475_v33 = vunpack.c.l.s8.bf16 %v65_v31 }
  0x8d   :  { %1365 = vmatpush1.bf16.msra.mxu1 %v703_v36  ;;  %v394_v36 = vld [vmem:[#allocation2 + $0xaa8] sm:$0xff] }
  0x8e   :  { %1451 = vmatpush1.bf16.msra.mxu0 %v1023_v37  ;;  %1366 = vmatprep.subr.bf16.mxu1 %v714_v38  ;;  %v76_v37 = vld [vmem:[#allocation2 + $0xb8] sm:$0xff]  ;;  %v1123_v38 = vunpack.c.h.s8.bf16 %v383_v30  ;;  %v1134_v40 = vunpack.c.l.s8.bf16 %v394_v36  ;;  %v1144_v47 = vunpack.c.h.s8.bf16 %v394_v36  ;;  %v433_v30 = vld [vmem:[#allocation2 + $0xbe0] sm:$0xff] }
  0x8f   :  { %1452 = vmatprep.subr.bf16.mxu0 %v1034_v39  ;;  %v485_v39 = vunpack.c.h.s8.bf16 %v65_v31  ;;  %v496_v42 = vunpack.c.l.s8.bf16 %v76_v37  ;;  %v506_v48 = vunpack.c.h.s8.bf16 %v76_v37  ;;  %v115_v31 = vld [vmem:[#allocation2 + $0x1f0] sm:$0xff]  ;;  %v444_v36 = vld [vmem:[#allocation2 + $0xc38] sm:$0xff]  ;;  %v126_v37 = vld [vmem:[#allocation2 + $0x248] sm:$0xff] }
  0x91   :  { %1367 = vmatpush1.bf16.msra.mxu1 %v713_v43  ;;  %v393_v43 = vld [vmem:[#allocation2 + $0xaa0] sm:$0xff] }
  0x92   :  { %1453 = vmatpush1.bf16.msra.mxu0 %v1033_v44  ;;  %1368 = vmatprep.subr.bf16.mxu1 %v724_v45  ;;  %v75_v44 = vld [vmem:[#allocation2 + $0xb0] sm:$0xff]  ;;  %v1133_v45 = vunpack.c.l.s8.bf16 %v393_v43 }
  0x93   :  { %1454 = vmatprep.subr.bf16.mxu0 %v1044_v46  ;;  %v495_v46 = vunpack.c.l.s8.bf16 %v75_v44 }
  0x95   :  { %1369 = vmatpush1.bf16.msra.mxu1 %v723_v50  ;;  %v404_v50 = vld [vmem:[#allocation2 + $0xaf8] sm:$0xff] }
  0x96   :  { %1455 = vmatpush1.bf16.msra.mxu0 %v1043_v51  ;;  %1370 = vmatprep.subr.bf16.mxu1 %v734_v52  ;;  %v86_v51 = vld [vmem:[#allocation2 + $0x108] sm:$0xff]  ;;  %v1143_v52 = vunpack.c.h.s8.bf16 %v393_v43  ;;  %v1154_v54 = vunpack.c.l.s8.bf16 %v404_v50  ;;  %v1164_v60 = vunpack.c.h.s8.bf16 %v404_v50  ;;  %v443_v43 = vld [vmem:[#allocation2 + $0xc30] sm:$0xff]  ;;  %v136_v50 = vld [vmem:[#allocation2 + $0x298] sm:$0xff] }
  0x97   :  { %1456 = vmatprep.subr.bf16.mxu0 %v1054_v53  ;;  %v505_v53 = vunpack.c.h.s8.bf16 %v75_v44  ;;  %v516_v55 = vunpack.c.l.s8.bf16 %v86_v51  ;;  %v526_v61 = vunpack.c.h.s8.bf16 %v86_v51  ;;  %v125_v44 = vld [vmem:[#allocation2 + $0x240] sm:$0xff]  ;;  %v58_v51 = vld [vmem:[#allocation2 + $0x28] sm:$0xff] }
  0x99   :  { %1371 = vmatpush1.bf16.msra.mxu1 %v733_v56  ;;  %v403_v56 = vld [vmem:[#allocation2 + $0xaf0] sm:$0xff] }
  0x9a   :  { %1457 = vmatpush1.bf16.msra.mxu0 %v1053_v57  ;;  %1372 = vmatprep.subr.bf16.mxu1 %v744_v58  ;;  %v85_v57 = vld [vmem:[#allocation2 + $0x100] sm:$0xff]  ;;  %v1153_v58 = vunpack.c.l.s8.bf16 %v403_v56 }
  0x9b   :  { %1458 = vmatprep.subr.bf16.mxu0 %v1064_v59  ;;  %v515_v59 = vunpack.c.l.s8.bf16 %v85_v57 }
  0x9d   :  { %1373 = vmatpush1.bf16.msra.mxu1 %v743_v62  ;;  %v414_v62 = vld [vmem:[#allocation2 + $0xb48] sm:$0xff] }
  0x9e   :  { %1459 = vmatpush1.bf16.msra.mxu0 %v1063_v63  ;;  %1374 = vmatprep.subr.bf16.mxu1 %v754_v0  ;;  %v96_v63 = vld [vmem:[#allocation2 + $0x158] sm:$0xff]  ;;  %v1163_v0 = vunpack.c.h.s8.bf16 %v403_v56  ;;  %v1174_v2 = vunpack.c.l.s8.bf16 %v414_v62  ;;  %v1184_v8 = vunpack.c.h.s8.bf16 %v414_v62  ;;  %v135_v56 = vld [vmem:[#allocation2 + $0x290] sm:$0xff]  ;;  %v468_v62 = vunpack.c.h.s8.bf16 %v58_v51 }
  0x9f   :  { %1460 = vmatprep.subr.bf16.mxu0 %v1074_v1  ;;  %v525_v1 = vunpack.c.h.s8.bf16 %v85_v57  ;;  %v536_v3 = vunpack.c.l.s8.bf16 %v96_v63  ;;  %v546_v9 = vunpack.c.h.s8.bf16 %v96_v63  ;;  %v57_v57 = vld [vmem:[#allocation2 + $0x20] sm:$0xff]  ;;  %v146_v63 = vld [vmem:[#allocation2 + $0x2e8] sm:$0xff] }
  0xa1   :  { %1375 = vmatpush1.bf16.msra.mxu1 %v753_v4  ;;  %v413_v4 = vld [vmem:[#allocation2 + $0xb40] sm:$0xff] }
  0xa2   :  { %1461 = vmatpush1.bf16.msra.mxu0 %v1073_v5  ;;  %1376 = vmatprep.subr.bf16.mxu1 %v764_v6  ;;  %v95_v5 = vld [vmem:[#allocation2 + $0x150] sm:$0xff]  ;;  %v1173_v6 = vunpack.c.l.s8.bf16 %v413_v4 }
  0xa3   :  { %1462 = vmatprep.subr.bf16.mxu0 %v1084_v7  ;;  %v535_v7 = vunpack.c.l.s8.bf16 %v95_v5 }
  0xa5   :  { %1377 = vmatpush1.bf16.msra.mxu1 %v763_v10  ;;  %v424_v10 = vld [vmem:[#allocation2 + $0xb98] sm:$0xff] }
  0xa6   :  { %1463 = vmatpush1.bf16.msra.mxu0 %v1083_v11  ;;  %1518 = vmatprep.subr.bf16.mxu1 %v456_v13  ;;  %v106_v11 = vld [vmem:[#allocation2 + $0x1a8] sm:$0xff]  ;;  %v545_v13 = vunpack.c.h.s8.bf16 %v95_v5  ;;  %v1194_v14 = vunpack.c.l.s8.bf16 %v424_v10  ;;  %v145_v5 = vld [vmem:[#allocation2 + $0x2e0] sm:$0xff] }
  0xa7   :  { %1475 = vmatprep.subr.bf16.mxu0 %v1094_v12  ;;  %v1183_v12 = vunpack.c.h.s8.bf16 %v413_v4  ;;  %v556_v15 = vunpack.c.l.s8.bf16 %v106_v11  ;;  %v566_v22 = vunpack.c.h.s8.bf16 %v106_v11  ;;  %v156_v11 = vld [vmem:[#allocation2 + $0x338] sm:$0xff] }
  0xa8   :  { %1379 = vmatmul.mubr.bf16.vlgmr.msra.gmra.mrb[0].mxu1 %v3030_v16 }
  0xa9   :  { %1465 = vmatmul.mubr.bf16.vlgmr.msra.gmra.mrb[0].mxu0 %v2797_v17  ;;  %1519 = vmatpush1.bf16.msra.mxu1 %v455_v19  ;;  %v423_v17 = vld [vmem:[#allocation2 + $0xb90] sm:$0xff] }
  0xaa   :  { %1476 = vmatpush1.bf16.msra.mxu0 %v1093_v18  ;;  %1520 = vmatprep.subr.bf16.mxu1 %v466_v21  ;;  %v105_v18 = vld [vmem:[#allocation2 + $0x1a0] sm:$0xff]  ;;  %v1193_v19 = vunpack.c.l.s8.bf16 %v423_v17  ;;  %v1204_v21 = vunpack.c.h.s8.bf16 %v424_v10 }
  0xab   :  { %1477 = vmatprep.subr.bf16.mxu0 %v1104_v20  ;;  %1507 = vmatprep.mubr.bf16.mxu0 %v2798_v25  ;;  %v555_v20 = vunpack.c.l.s8.bf16 %v105_v18  ;;  %v116_v25 = vld [vmem:[#allocation2 + $0x1f8] sm:$0xff] }
  0xac   :  { %1550 = vmatprep.mubr.bf16.mxu1 %v3003_v24 }
  0xad   :  { %1521 = vmatpush1.bf16.msra.mxu1 %v465_v27  ;;  %v565_v27 = vunpack.c.h.s8.bf16 %v105_v18  ;;  %v155_v18 = vld [vmem:[#allocation2 + $0x330] sm:$0xff] }
  0xae   :  { %1478 = vmatpush1.bf16.msra.mxu0 %v1103_v26  ;;  %1522 = vmatprep.subr.bf16.mxu1 %v476_v29  ;;  %v1203_v26 = vunpack.c.h.s8.bf16 %v423_v17  ;;  %v576_v29 = vunpack.c.l.s8.bf16 %v116_v25 }
  0xaf   :  { %1479 = vmatprep.subr.bf16.mxu0 %v1114_v28  ;;  %v1214_v28 = vunpack.c.l.s8.bf16 %v434_v23 }
  0xb1   :  { %1523 = vmatpush1.bf16.msra.mxu1 %v475_v33  ;;  %v575_v33 = vunpack.c.l.s8.bf16 %v115_v31 }
  0xb2   :  { %1480 = vmatpush1.bf16.msra.mxu0 %v1113_v32  ;;  %1524 = vmatprep.subr.bf16.mxu1 %v486_v35  ;;  %v1213_v32 = vunpack.c.l.s8.bf16 %v433_v30  ;;  %v586_v35 = vunpack.c.h.s8.bf16 %v116_v25  ;;  %v88_v25 = vld [vmem:[#allocation2 + $0x118] sm:$0xff] }
  0xb3   :  { %1481 = vmatprep.subr.bf16.mxu0 %v1124_v34  ;;  %v1224_v34 = vunpack.c.h.s8.bf16 %v434_v23  ;;  %v166_v23 = vld [vmem:[#allocation2 + $0x388] sm:$0xff] }
  0xb5   :  { %1525 = vmatpush1.bf16.msra.mxu1 %v485_v39  ;;  %v585_v39 = vunpack.c.h.s8.bf16 %v115_v31  ;;  %v87_v31 = vld [vmem:[#allocation2 + $0x110] sm:$0xff] }
  0xb6   :  { %1482 = vmatpush1.bf16.msra.mxu0 %v1123_v38  ;;  %1526 = vmatprep.subr.bf16.mxu1 %v496_v42  ;;  %v1223_v38 = vunpack.c.h.s8.bf16 %v433_v30  ;;  %v596_v42 = vunpack.c.l.s8.bf16 %v126_v37  ;;  %v165_v30 = vld [vmem:[#allocation2 + $0x380] sm:$0xff] }
  0xb7   :  { %1483 = vmatprep.subr.bf16.mxu0 %v1134_v40  ;;  %v1234_v40 = vunpack.c.l.s8.bf16 %v444_v36 }
  0xb9   :  { %1527 = vmatpush1.bf16.msra.mxu1 %v495_v46  ;;  %v595_v46 = vunpack.c.l.s8.bf16 %v125_v44 }
  0xba   :  { %1484 = vmatpush1.bf16.msra.mxu0 %v1133_v45  ;;  %1528 = vmatprep.subr.bf16.mxu1 %v506_v48  ;;  %v1233_v45 = vunpack.c.l.s8.bf16 %v443_v43  ;;  %v606_v48 = vunpack.c.h.s8.bf16 %v126_v37  ;;  %v98_v37 = vld [vmem:[#allocation2 + $0x168] sm:$0xff] }
  0xbb   :  { %1485 = vmatprep.subr.bf16.mxu0 %v1144_v47  ;;  %v1244_v47 = vunpack.c.h.s8.bf16 %v444_v36  ;;  %v176_v36 = vld [vmem:[#allocation2 + $0x3d8] sm:$0xff] }
  0xbd   :  { %1529 = vmatpush1.bf16.msra.mxu1 %v505_v53  ;;  %v605_v53 = vunpack.c.h.s8.bf16 %v125_v44  ;;  %v97_v44 = vld [vmem:[#allocation2 + $0x160] sm:$0xff] }
  0xbe   :  { %1486 = vmatpush1.bf16.msra.mxu0 %v1143_v52  ;;  %1530 = vmatprep.subr.bf16.mxu1 %v516_v55  ;;  %v1243_v52 = vunpack.c.h.s8.bf16 %v443_v43  ;;  %v458_v55 = vunpack.c.l.s8.bf16 %v58_v51  ;;  %v175_v43 = vld [vmem:[#allocation2 + $0x3d0] sm:$0xff]  ;;  %v108_v51 = vld [vmem:[#allocation2 + $0x1b8] sm:$0xff] }
  0xbf   :  { %1487 = vmatprep.subr.bf16.mxu0 %v1154_v54  ;;  %v616_v54 = vunpack.c.l.s8.bf16 %v136_v50 }
  0xc1   :  { %1531 = vmatpush1.bf16.msra.mxu1 %v515_v59  ;;  %v615_v59 = vunpack.c.l.s8.bf16 %v135_v56 }
  0xc2   :  { %1488 = vmatpush1.bf16.msra.mxu0 %v1153_v58  ;;  %1532 = vmatprep.subr.bf16.mxu1 %v526_v61  ;;  %v2800_v58 = vld [vmem:[%s3329_s0 + $0x20] ss:$40 sps:$4 sm:$0xff]   ;;  %v626_v61 = vunpack.c.h.s8.bf16 %v136_v50 }
  0xc3   :  { %1489 = vmatprep.subr.bf16.mxu0 %v1164_v60  ;;  %v457_v60 = vunpack.c.l.s8.bf16 %v57_v57  ;;  %v186_v50 = vld [vmem:[#allocation2 + $0x428] sm:$0xff] }
  0xc5   :  { %1533 = vmatpush1.bf16.msra.mxu1 %v525_v1  ;;  %v625_v1 = vunpack.c.h.s8.bf16 %v135_v56  ;;  %v185_v56 = vld [vmem:[#allocation2 + $0x420] sm:$0xff] }
  0xc6   :  { %1490 = vmatpush1.bf16.msra.mxu0 %v1163_v0  ;;  %1534 = vmatprep.subr.bf16.mxu1 %v536_v3  ;;  %v68_v0 = vld [vmem:[#allocation2 + $0x78] sm:$0xff]  ;;  %v636_v3 = vunpack.c.l.s8.bf16 %v146_v63 }
  0xc7   :  { %1491 = vmatprep.subr.bf16.mxu0 %v1174_v2  ;;  %v467_v2 = vunpack.c.h.s8.bf16 %v57_v57  ;;  %v478_v4 = vunpack.c.l.s8.bf16 %v68_v0  ;;  %v488_v10 = vunpack.c.h.s8.bf16 %v68_v0  ;;  %v107_v57 = vld [vmem:[#allocation2 + $0x1b0] sm:$0xff]  ;;  %v725_v0 = vunpack.c.h.s8.bf16 %v185_v56 }
  0xc9   :  { %1535 = vmatpush1.bf16.msra.mxu1 %v535_v7  ;;  %v635_v7 = vunpack.c.l.s8.bf16 %v145_v5 }
  0xca   :  { %1492 = vmatpush1.bf16.msra.mxu0 %v1173_v6  ;;  %1536 = vmatprep.subr.bf16.mxu1 %v546_v9  ;;  %v67_v6 = vld [vmem:[#allocation2 + $0x70] sm:$0xff]  ;;  %v646_v9 = vunpack.c.h.s8.bf16 %v146_v63  ;;  %v118_v63 = vld [vmem:[#allocation2 + $0x208] sm:$0xff] }
  0xcb   :  { %1493 = vmatprep.subr.bf16.mxu0 %v1184_v8  ;;  %v477_v8 = vunpack.c.l.s8.bf16 %v67_v6 }
  0xcd   :  { %1537 = vmatpush1.bf16.msra.mxu1 %v545_v13  ;;  %v645_v13 = vunpack.c.h.s8.bf16 %v145_v5  ;;  %v117_v5 = vld [vmem:[#allocation2 + $0x200] sm:$0xff] }
  0xce   :  { %1494 = vmatpush1.bf16.msra.mxu0 %v1183_v12  ;;  %1538 = vmatprep.subr.bf16.mxu1 %v556_v15  ;;  %v78_v12 = vld [vmem:[#allocation2 + $0xc8] sm:$0xff]  ;;  %v656_v15 = vunpack.c.l.s8.bf16 %v156_v11 }
  0xcf   :  { %1495 = vmatprep.subr.bf16.mxu0 %v1194_v14  ;;  %v487_v14 = vunpack.c.h.s8.bf16 %v67_v6  ;;  %v498_v17 = vunpack.c.l.s8.bf16 %v78_v12 }
  0xd1   :  { %1539 = vmatpush1.bf16.msra.mxu1 %v555_v20 }
  0xd2   :  { %1496 = vmatpush1.bf16.msra.mxu0 %v1193_v19  ;;  %1540 = vmatprep.subr.bf16.mxu1 %v566_v22  ;;  %v655_v19 = vunpack.c.l.s8.bf16 %v155_v18  ;;  %v508_v22 = vunpack.c.h.s8.bf16 %v78_v12 }
  0xd3   :  { %1497 = vmatprep.subr.bf16.mxu0 %v1204_v21  ;;  %v666_v21 = vunpack.c.h.s8.bf16 %v156_v11  ;;  %v128_v11 = vld [vmem:[#allocation2 + $0x258] sm:$0xff] }
  0xd5   :  { %1541 = vmatpush1.bf16.msra.mxu1 %v565_v27 }
  0xd6   :  { %1498 = vmatpush1.bf16.msra.mxu0 %v1203_v26  ;;  %1542 = vmatprep.subr.bf16.mxu1 %v576_v29  ;;  %v665_v26 = vunpack.c.h.s8.bf16 %v155_v18  ;;  %v518_v29 = vunpack.c.l.s8.bf16 %v88_v25  ;;  %v127_v18 = vld [vmem:[#allocation2 + $0x250] sm:$0xff] }
  0xd7   :  { %1499 = vmatprep.subr.bf16.mxu0 %v1214_v28  ;;  %v676_v28 = vunpack.c.l.s8.bf16 %v166_v23 }
  0xd9   :  { %1543 = vmatpush1.bf16.msra.mxu1 %v575_v33  ;;  %v517_v33 = vunpack.c.l.s8.bf16 %v87_v31 }
  0xda   :  { %1500 = vmatpush1.bf16.msra.mxu0 %v1213_v32  ;;  %1544 = vmatprep.subr.bf16.mxu1 %v586_v35  ;;  %v675_v32 = vunpack.c.l.s8.bf16 %v165_v30  ;;  %v528_v35 = vunpack.c.h.s8.bf16 %v88_v25 }
  0xdb   :  { %1501 = vmatprep.subr.bf16.mxu0 %v1224_v34  ;;  %v686_v34 = vunpack.c.h.s8.bf16 %v166_v23  ;;  %v138_v23 = vld [vmem:[#allocation2 + $0x2a8] sm:$0xff] }
  0xdd   :  { %1545 = vmatpush1.bf16.msra.mxu1 %v585_v39  ;;  %v527_v39 = vunpack.c.h.s8.bf16 %v87_v31 }
  0xde   :  { %1502 = vmatpush1.bf16.msra.mxu0 %v1223_v38  ;;  %1546 = vmatprep.subr.bf16.mxu1 %v596_v42  ;;  %v685_v38 = vunpack.c.h.s8.bf16 %v165_v30  ;;  %v538_v42 = vunpack.c.l.s8.bf16 %v98_v37  ;;  %v137_v30 = vld [vmem:[#allocation2 + $0x2a0] sm:$0xff] }
  0xdf   :  { %1503 = vmatprep.subr.bf16.mxu0 %v1234_v40  ;;  %v696_v40 = vunpack.c.l.s8.bf16 %v176_v36 }
  0xe1   :  { %1547 = vmatpush1.bf16.msra.mxu1 %v595_v46  ;;  %v537_v46 = vunpack.c.l.s8.bf16 %v97_v44 }
  0xe2   :  { %1504 = vmatpush1.bf16.msra.mxu0 %v1233_v45  ;;  %1548 = vmatprep.subr.bf16.mxu1 %v606_v48  ;;  %v695_v45 = vunpack.c.l.s8.bf16 %v175_v43  ;;  %v548_v48 = vunpack.c.h.s8.bf16 %v98_v37 }
  0xe3   :  { %1505 = vmatprep.subr.bf16.mxu0 %v1244_v47  ;;  %v706_v47 = vunpack.c.h.s8.bf16 %v176_v36  ;;  %v148_v36 = vld [vmem:[#allocation2 + $0x2f8] sm:$0xff] }
  0xe5   :  { %1549 = vmatpush1.bf16.msra.mxu1 %v605_v53  ;;  %v547_v53 = vunpack.c.h.s8.bf16 %v97_v44  ;;  %v3051_v44 = vld [vmem:[%s3329_s0 + $0x14] ss:$40 sps:$4 sm:$0xff]  }
  0xe6   :  { %1506 = vmatpush1.bf16.msra.mxu0 %v1243_v52  ;;  %1561 = vmatprep.subr.bf16.mxu1 %v616_v54  ;;  %v705_v52 = vunpack.c.h.s8.bf16 %v175_v43  ;;  %v716_v54 = vunpack.c.l.s8.bf16 %v186_v50  ;;  %v147_v43 = vld [vmem:[#allocation2 + $0x2f0] sm:$0xff] }
  0xe7   :  { %1733 = vmatprep.subr.bf16.mxu0 %v458_v55  ;;  %v558_v55 = vunpack.c.l.s8.bf16 %v108_v51 }
  0xe8   :  { %1551 = vmatmul.mubr.bf16.vlgmr.msra.gmra.mrb[4].mxu1 %v3012_v41 }
  0xe9   :  { %1508 = vmatmul.mubr.bf16.vlgmr.msra.gmra.mrb[0].mxu0 %v2800_v58  ;;  %1562 = vmatpush1.bf16.msra.mxu1 %v615_v59  ;;  %v715_v58 = vunpack.c.l.s8.bf16 %v185_v56  ;;  %v557_v59 = vunpack.c.l.s8.bf16 %v107_v57 }
  0xea   :  { %1734 = vmatpush1.bf16.msra.mxu0 %v457_v60  ;;  %1563 = vmatprep.subr.bf16.mxu1 %v626_v61  ;;  %v726_v60 = vunpack.c.h.s8.bf16 %v186_v50  ;;  %v568_v61 = vunpack.c.h.s8.bf16 %v108_v51  ;;  %v158_v50 = vld [vmem:[#allocation2 + $0x348] sm:$0xff] }
  0xeb   :  { %1735 = vmatprep.subr.bf16.mxu0 %v468_v62  ;;  %1593 = vmatprep.mubr.bf16.mxu1 %v3020_v49  ;;  %v196_v62 = vld [vmem:[#allocation2 + $0x478] sm:$0xff] }
  0xec   :  { %1765 = vmatprep.mubr.bf16.mxu0 %v3003_v24  ;;  %v77_v24 = vld [vmem:[#allocation2 + $0xc0] sm:$0xff] }
  0xed   :  { %1564 = vmatpush1.bf16.msra.mxu1 %v625_v1  ;;  %v497_v20 = vunpack.c.l.s8.bf16 %v77_v24  ;;  %v507_v27 = vunpack.c.h.s8.bf16 %v77_v24  ;;  %v567_v1 = vunpack.c.h.s8.bf16 %v107_v57 }
  0xee   :  { %1736 = vmatpush1.bf16.msra.mxu0 %v467_v2  ;;  %1565 = vmatprep.subr.bf16.mxu1 %v636_v3  ;;  %v736_v2 = vunpack.c.l.s8.bf16 %v196_v62  ;;  %v578_v3 = vunpack.c.l.s8.bf16 %v118_v63 }
  0xef   :  { %1737 = vmatprep.subr.bf16.mxu0 %v478_v4  ;;  %v195_v4 = vld [vmem:[#allocation2 + $0x470] sm:$0xff] }
  0xf0   :  { %v735_v6 = vunpack.c.l.s8.bf16 %v195_v4  ;;  %v745_v12 = vunpack.c.h.s8.bf16 %v195_v4 }
  0xf1   :  { %1566 = vmatpush1.bf16.msra.mxu1 %v635_v7  ;;  %v577_v7 = vunpack.c.l.s8.bf16 %v117_v5 }
  0xf2   :  { %1738 = vmatpush1.bf16.msra.mxu0 %v477_v8  ;;  %1567 = vmatprep.subr.bf16.mxu1 %v646_v9  ;;  %v746_v8 = vunpack.c.h.s8.bf16 %v196_v62  ;;  %v588_v9 = vunpack.c.h.s8.bf16 %v118_v63 }
  0xf3   :  { %1739 = vmatprep.subr.bf16.mxu0 %v488_v10  ;;  %v206_v10 = vld [vmem:[#allocation2 + $0x4c8] sm:$0xff] }
  0xf5   :  { %1568 = vmatpush1.bf16.msra.mxu1 %v645_v13  ;;  %v587_v13 = vunpack.c.h.s8.bf16 %v117_v5 }
  0xf6   :  { %1740 = vmatpush1.bf16.msra.mxu0 %v487_v14  ;;  %1569 = vmatprep.subr.bf16.mxu1 %v656_v15  ;;  %v756_v14 = vunpack.c.l.s8.bf16 %v206_v10  ;;  %v598_v15 = vunpack.c.l.s8.bf16 %v128_v11 }
  0xf7   :  { %1741 = vmatprep.subr.bf16.mxu0 %v498_v17  ;;  %v205_v17 = vld [vmem:[#allocation2 + $0x4c0] sm:$0xff] }
  0xf8   :  { %v755_v24 = vunpack.c.l.s8.bf16 %v205_v17  ;;  %v765_v25 = vunpack.c.h.s8.bf16 %v205_v17 }
  0xf9   :  { %1570 = vmatpush1.bf16.msra.mxu1 %v655_v19  ;;  %v597_v19 = vunpack.c.l.s8.bf16 %v127_v18 }
  0xfa   :  { %1742 = vmatpush1.bf16.msra.mxu0 %v497_v20  ;;  %1571 = vmatprep.subr.bf16.mxu1 %v666_v21  ;;  %v766_v20 = vunpack.c.h.s8.bf16 %v206_v10  ;;  %v608_v21 = vunpack.c.h.s8.bf16 %v128_v11 }
  0xfb   :  { %1743 = vmatprep.subr.bf16.mxu0 %v508_v22  ;;  %v216_v22 = vld [vmem:[#allocation2 + $0x518] sm:$0xff] }
  0xfd   :  { %1572 = vmatpush1.bf16.msra.mxu1 %v665_v26  ;;  %v607_v26 = vunpack.c.h.s8.bf16 %v127_v18 }
  0xfe   :  { %1744 = vmatpush1.bf16.msra.mxu0 %v507_v27  ;;  %1573 = vmatprep.subr.bf16.mxu1 %v676_v28  ;;  %v776_v27 = vunpack.c.l.s8.bf16 %v216_v22  ;;  %v618_v28 = vunpack.c.l.s8.bf16 %v138_v23 }
  0xff   :  { %1745 = vmatprep.subr.bf16.mxu0 %v518_v29  ;;  %v215_v29 = vld [vmem:[#allocation2 + $0x510] sm:$0xff] }
 0x100   :  { %v775_v31 = vunpack.c.l.s8.bf16 %v215_v29  ;;  %v785_v37 = vunpack.c.h.s8.bf16 %v215_v29 }
 0x101   :  { %1574 = vmatpush1.bf16.msra.mxu1 %v675_v32  ;;  %v617_v32 = vunpack.c.l.s8.bf16 %v137_v30 }
 0x102   :  { %1746 = vmatpush1.bf16.msra.mxu0 %v517_v33  ;;  %1575 = vmatprep.subr.bf16.mxu1 %v686_v34  ;;  %v786_v33 = vunpack.c.h.s8.bf16 %v216_v22  ;;  %v628_v34 = vunpack.c.h.s8.bf16 %v138_v23 }
 0x103   :  { %1747 = vmatprep.subr.bf16.mxu0 %v528_v35  ;;  %v226_v35 = vld [vmem:[#allocation2 + $0x568] sm:$0xff] }
 0x105   :  { %1576 = vmatpush1.bf16.msra.mxu1 %v685_v38  ;;  %v627_v38 = vunpack.c.h.s8.bf16 %v137_v30 }
 0x106   :  { %1748 = vmatpush1.bf16.msra.mxu0 %v527_v39  ;;  %1577 = vmatprep.subr.bf16.mxu1 %v696_v40  ;;  %v796_v39 = vunpack.c.l.s8.bf16 %v226_v35  ;;  %v638_v40 = vunpack.c.l.s8.bf16 %v148_v36 }
 0x107   :  { %1749 = vmatprep.subr.bf16.mxu0 %v538_v42  ;;  %v225_v42 = vld [vmem:[#allocation2 + $0x560] sm:$0xff] }
 0x108   :  { %v805_v51 = vunpack.c.h.s8.bf16 %v225_v42 }
 0x109   :  { %1578 = vmatpush1.bf16.msra.mxu1 %v695_v45  ;;  %v637_v45 = vunpack.c.l.s8.bf16 %v147_v43 }
 0x10a   :  { %1750 = vmatpush1.bf16.msra.mxu0 %v537_v46  ;;  %1579 = vmatprep.subr.bf16.mxu1 %v706_v47  ;;  %v806_v46 = vunpack.c.h.s8.bf16 %v226_v35  ;;  %v648_v47 = vunpack.c.h.s8.bf16 %v148_v36 }
 0x10b   :  { %1751 = vmatprep.subr.bf16.mxu0 %v548_v48  ;;  %v236_v48 = vld [vmem:[#allocation2 + $0x5b8] sm:$0xff] }
 0x10d   :  { %1580 = vmatpush1.bf16.msra.mxu1 %v705_v52  ;;  %v647_v52 = vunpack.c.h.s8.bf16 %v147_v43 }
 0x10e   :  { %1752 = vmatpush1.bf16.msra.mxu0 %v547_v53  ;;  %1581 = vmatprep.subr.bf16.mxu1 %v716_v54  ;;  %v816_v53 = vunpack.c.l.s8.bf16 %v236_v48  ;;  %v658_v54 = vunpack.c.l.s8.bf16 %v158_v50 }
 0x10f   :  { %1753 = vmatprep.subr.bf16.mxu0 %v558_v55  ;;  %v235_v55 = vld [vmem:[#allocation2 + $0x5b0] sm:$0xff] }
 0x110   :  { %v815_v56 = vunpack.c.l.s8.bf16 %v235_v55  ;;  %v825_v62 = vunpack.c.h.s8.bf16 %v235_v55 }
 0x111   :  { %1582 = vmatpush1.bf16.msra.mxu1 %v715_v58  ;;  %v826_v58 = vunpack.c.h.s8.bf16 %v236_v48 }
 0x112   :  { %1754 = vmatpush1.bf16.msra.mxu0 %v557_v59  ;;  %1583 = vmatprep.subr.bf16.mxu1 %v726_v60  ;;  %v668_v59 = vunpack.c.h.s8.bf16 %v158_v50  ;;  %v246_v60 = vld [vmem:[#allocation2 + $0x608] sm:$0xff] }
 0x113   :  { %1755 = vmatprep.subr.bf16.mxu0 %v568_v61  ;;  %v168_v61 = vld [vmem:[#allocation2 + $0x398] sm:$0xff] }
 0x115   :  { %1584 = vmatpush1.bf16.msra.mxu1 %v725_v0  ;;  %v836_v0 = vunpack.c.l.s8.bf16 %v246_v60 }
 0x116   :  { %1756 = vmatpush1.bf16.msra.mxu0 %v567_v1  ;;  %1585 = vmatprep.subr.bf16.mxu1 %v736_v2  ;;  %v678_v1 = vunpack.c.l.s8.bf16 %v168_v61  ;;  %v245_v2 = vld [vmem:[#allocation2 + $0x600] sm:$0xff] }
 0x117   :  { %1757 = vmatprep.subr.bf16.mxu0 %v578_v3  ;;  %v167_v3 = vld [vmem:[#allocation2 + $0x390] sm:$0xff]  ;;  %v835_v4 = vunpack.c.l.s8.bf16 %v245_v2  ;;  %v845_v10 = vunpack.c.h.s8.bf16 %v245_v2 }
 0x118   :  { %v677_v5 = vunpack.c.l.s8.bf16 %v167_v3  ;;  %v687_v11 = vunpack.c.h.s8.bf16 %v167_v3 }
 0x119   :  { %1586 = vmatpush1.bf16.msra.mxu1 %v735_v6  ;;  %v846_v6 = vunpack.c.h.s8.bf16 %v246_v60 }
 0x11a   :  { %1758 = vmatpush1.bf16.msra.mxu0 %v577_v7  ;;  %1587 = vmatprep.subr.bf16.mxu1 %v746_v8  ;;  %v688_v7 = vunpack.c.h.s8.bf16 %v168_v61  ;;  %v256_v8 = vld [vmem:[#allocation2 + $0x658] sm:$0xff] }
 0x11b   :  { %1759 = vmatprep.subr.bf16.mxu0 %v588_v9  ;;  %v178_v9 = vld [vmem:[#allocation2 + $0x3e8] sm:$0xff] }
 0x11d   :  { %1588 = vmatpush1.bf16.msra.mxu1 %v745_v12  ;;  %v856_v12 = vunpack.c.l.s8.bf16 %v256_v8 }
 0x11e   :  { %1760 = vmatpush1.bf16.msra.mxu0 %v587_v13  ;;  %1589 = vmatprep.subr.bf16.mxu1 %v756_v14  ;;  %v698_v13 = vunpack.c.l.s8.bf16 %v178_v9  ;;  %v255_v14 = vld [vmem:[#allocation2 + $0x650] sm:$0xff] }
 0x11f   :  { %1761 = vmatprep.subr.bf16.mxu0 %v598_v15  ;;  %v177_v15 = vld [vmem:[#allocation2 + $0x3e0] sm:$0xff]  ;;  %v855_v17 = vunpack.c.l.s8.bf16 %v255_v14  ;;  %v865_v22 = vunpack.c.h.s8.bf16 %v255_v14  ;;  %v227_v14 = vld [vmem:[#allocation2 + $0x570] sm:$0xff] }
 0x120   :  { %v697_v18 = vunpack.c.l.s8.bf16 %v177_v15  ;;  %v707_v23 = vunpack.c.h.s8.bf16 %v177_v15  ;;  %v3065_v15 = vld [vmem:[%s3329_s0 + $0x1c] ss:$40 sps:$4 sm:$0xff]  }
 0x121   :  { %1590 = vmatpush1.bf16.msra.mxu1 %v755_v24  ;;  %v866_v24 = vunpack.c.h.s8.bf16 %v256_v8  ;;  %v3058_v8 = vld [vmem:[%s3329_s0 + $0x10] ss:$40 sps:$4 sm:$0xff]  }
 0x122   :  { %1762 = vmatpush1.bf16.msra.mxu0 %v597_v19  ;;  %1591 = vmatprep.subr.bf16.mxu1 %v766_v20  ;;  %v708_v19 = vunpack.c.h.s8.bf16 %v178_v9  ;;  %v266_v20 = vld [vmem:[#allocation2 + $0x6a8] sm:$0xff] }
 0x123   :  { %1763 = vmatprep.subr.bf16.mxu0 %v608_v21  ;;  %v188_v21 = vld [vmem:[#allocation2 + $0x438] sm:$0xff] }
 0x125   :  { %1592 = vmatpush1.bf16.msra.mxu1 %v765_v25  ;;  %v876_v25 = vunpack.c.l.s8.bf16 %v266_v20 }
 0x126   :  { %1764 = vmatpush1.bf16.msra.mxu0 %v607_v26  ;;  %1604 = vmatprep.subr.bf16.mxu1 %v776_v27  ;;  %v718_v26 = vunpack.c.l.s8.bf16 %v188_v21  ;;  %v265_v27 = vld [vmem:[#allocation2 + $0x6a0] sm:$0xff] }
 0x127   :  { %1776 = vmatprep.subr.bf16.mxu0 %v618_v28  ;;  %v187_v28 = vld [vmem:[#allocation2 + $0x430] sm:$0xff]  ;;  %v875_v29 = vunpack.c.l.s8.bf16 %v265_v27  ;;  %v885_v35 = vunpack.c.h.s8.bf16 %v265_v27 }
 0x128   :  { %1594 = vmatmul.mubr.bf16.vlgmr.msra.gmra.mrb[4].mxu1 %v3030_v16  ;;  %v717_v30 = vunpack.c.l.s8.bf16 %v187_v28  ;;  %v727_v36 = vunpack.c.h.s8.bf16 %v187_v28 }
 0x129   :  { %1766 = vmatmul.mubr.bf16.vlgmr.msra.gmra.mrb[4].mxu0 %v3012_v41  ;;  %1605 = vmatpush1.bf16.msra.mxu1 %v775_v31  ;;  %v795_v41 = vunpack.c.l.s8.bf16 %v225_v42  ;;  %v886_v31 = vunpack.c.h.s8.bf16 %v266_v20  ;;  %v238_v20 = vld [vmem:[#allocation2 + $0x5c8] sm:$0xff] }
 0x12a   :  { %1777 = vmatpush1.bf16.msra.mxu0 %v617_v32  ;;  %1606 = vmatprep.subr.bf16.mxu1 %v786_v33  ;;  %v728_v32 = vunpack.c.h.s8.bf16 %v188_v21  ;;  %v276_v33 = vld [vmem:[#allocation2 + $0x6f8] sm:$0xff] }
 0x12b   :  { %1778 = vmatprep.subr.bf16.mxu0 %v628_v34  ;;  %1636 = vmatprep.mubr.bf16.mxu1 %v3051_v44  ;;  %v198_v34 = vld [vmem:[#allocation2 + $0x488] sm:$0xff] }
 0x12c   :  { %1808 = vmatprep.mubr.bf16.mxu0 %v3020_v49  ;;  %v157_v49 = vld [vmem:[#allocation2 + $0x340] sm:$0xff] }
 0x12d   :  { %1607 = vmatpush1.bf16.msra.mxu1 %v785_v37  ;;  %v657_v57 = vunpack.c.l.s8.bf16 %v157_v49  ;;  %v667_v63 = vunpack.c.h.s8.bf16 %v157_v49  ;;  %v896_v37 = vunpack.c.l.s8.bf16 %v276_v33 }
 0x12e   :  { %1779 = vmatpush1.bf16.msra.mxu0 %v627_v38  ;;  %1608 = vmatprep.subr.bf16.mxu1 %v796_v39  ;;  %v738_v38 = vunpack.c.l.s8.bf16 %v198_v34  ;;  %v275_v39 = vld [vmem:[#allocation2 + $0x6f0] sm:$0xff] }
 0x12f   :  { %1780 = vmatprep.subr.bf16.mxu0 %v638_v40  ;;  %v197_v40 = vld [vmem:[#allocation2 + $0x480] sm:$0xff]  ;;  %v895_v42 = vunpack.c.l.s8.bf16 %v275_v39  ;;  %v905_v48 = vunpack.c.h.s8.bf16 %v275_v39 }
 0x130   :  { %v737_v43 = vunpack.c.l.s8.bf16 %v197_v40  ;;  %v747_v50 = vunpack.c.h.s8.bf16 %v197_v40 }
 0x131   :  { %1609 = vmatpush1.bf16.msra.mxu1 %v795_v41  ;;  %v906_v41 = vunpack.c.h.s8.bf16 %v276_v33 }
 0x132   :  { %1781 = vmatpush1.bf16.msra.mxu0 %v637_v45  ;;  %1610 = vmatprep.subr.bf16.mxu1 %v806_v46  ;;  %v748_v45 = vunpack.c.h.s8.bf16 %v198_v34  ;;  %v286_v46 = vld [vmem:[#allocation2 + $0x748] sm:$0xff] }
 0x133   :  { %1782 = vmatprep.subr.bf16.mxu0 %v648_v47  ;;  %v208_v47 = vld [vmem:[#allocation2 + $0x4d8] sm:$0xff] }
 0x135   :  { %1611 = vmatpush1.bf16.msra.mxu1 %v805_v51  ;;  %v916_v51 = vunpack.c.l.s8.bf16 %v286_v46 }
 0x136   :  { %1783 = vmatpush1.bf16.msra.mxu0 %v647_v52  ;;  %1612 = vmatprep.subr.bf16.mxu1 %v816_v53  ;;  %v758_v52 = vunpack.c.l.s8.bf16 %v208_v47  ;;  %v285_v53 = vld [vmem:[#allocation2 + $0x740] sm:$0xff] }
 0x137   :  { %1784 = vmatprep.subr.bf16.mxu0 %v658_v54  ;;  %v207_v54 = vld [vmem:[#allocation2 + $0x4d0] sm:$0xff]  ;;  %v915_v55 = vunpack.c.l.s8.bf16 %v285_v53  ;;  %v925_v60 = vunpack.c.h.s8.bf16 %v285_v53 }
 0x138   :  { %v757_v49 = vunpack.c.l.s8.bf16 %v207_v54  ;;  %v767_v61 = vunpack.c.h.s8.bf16 %v207_v54 }
 0x139   :  { %1613 = vmatpush1.bf16.msra.mxu1 %v815_v56  ;;  %v926_v56 = vunpack.c.h.s8.bf16 %v286_v46 }
 0x13a   :  { %1785 = vmatpush1.bf16.msra.mxu0 %v657_v57  ;;  %1614 = vmatprep.subr.bf16.mxu1 %v826_v58  ;;  %v768_v57 = vunpack.c.h.s8.bf16 %v208_v47  ;;  %v296_v58 = vld [vmem:[#allocation2 + $0x798] sm:$0xff] }
 0x13b   :  { %1786 = vmatprep.subr.bf16.mxu0 %v668_v59  ;;  %v218_v59 = vld [vmem:[#allocation2 + $0x528] sm:$0xff] }
 0x13d   :  { %1615 = vmatpush1.bf16.msra.mxu1 %v825_v62  ;;  %v936_v62 = vunpack.c.l.s8.bf16 %v296_v58 }
 0x13e   :  { %1787 = vmatpush1.bf16.msra.mxu0 %v667_v63  ;;  %1616 = vmatprep.subr.bf16.mxu1 %v836_v0  ;;  %v778_v63 = vunpack.c.l.s8.bf16 %v218_v59  ;;  %v295_v0 = vld [vmem:[#allocation2 + $0x790] sm:$0xff] }
 0x13f   :  { %1788 = vmatprep.subr.bf16.mxu0 %v678_v1  ;;  %v217_v1 = vld [vmem:[#allocation2 + $0x520] sm:$0xff]  ;;  %v935_v2 = vunpack.c.l.s8.bf16 %v295_v0  ;;  %v945_v9 = vunpack.c.h.s8.bf16 %v295_v0 }
 0x140   :  { %v777_v3 = vunpack.c.l.s8.bf16 %v217_v1 }
 0x141   :  { %1617 = vmatpush1.bf16.msra.mxu1 %v835_v4  ;;  %v946_v4 = vunpack.c.h.s8.bf16 %v296_v58 }
 0x142   :  { %1789 = vmatpush1.bf16.msra.mxu0 %v677_v5  ;;  %1618 = vmatprep.subr.bf16.mxu1 %v846_v6  ;;  %v788_v5 = vunpack.c.h.s8.bf16 %v218_v59  ;;  %v306_v6 = vld [vmem:[#allocation2 + $0x7e8] sm:$0xff] }
 0x143   :  { %1790 = vmatprep.subr.bf16.mxu0 %v688_v7  ;;  %v228_v7 = vld [vmem:[#allocation2 + $0x578] sm:$0xff] }
 0x145   :  { %1619 = vmatpush1.bf16.msra.mxu1 %v845_v10  ;;  %v787_v10 = vunpack.c.h.s8.bf16 %v217_v1 }
 0x146   :  { %1791 = vmatpush1.bf16.msra.mxu0 %v687_v11  ;;  %1620 = vmatprep.subr.bf16.mxu1 %v856_v12  ;;  %v956_v11 = vunpack.c.l.s8.bf16 %v306_v6  ;;  %v798_v12 = vunpack.c.l.s8.bf16 %v228_v7 }
 0x147   :  { %1792 = vmatprep.subr.bf16.mxu0 %v698_v13  ;;  %v305_v13 = vld [vmem:[#allocation2 + $0x7e0] sm:$0xff] }
 0x148   :  { %v965_v21 = vunpack.c.h.s8.bf16 %v305_v13 }
 0x149   :  { %1621 = vmatpush1.bf16.msra.mxu1 %v855_v17  ;;  %v797_v17 = vunpack.c.l.s8.bf16 %v227_v14 }
 0x14a   :  { %1793 = vmatpush1.bf16.msra.mxu0 %v697_v18  ;;  %1622 = vmatprep.subr.bf16.mxu1 %v866_v24  ;;  %v966_v18 = vunpack.c.h.s8.bf16 %v306_v6  ;;  %v808_v24 = vunpack.c.h.s8.bf16 %v228_v7 }
 0x14b   :  { %1794 = vmatprep.subr.bf16.mxu0 %v708_v19  ;;  %v316_v19 = vld [vmem:[#allocation2 + $0x838] sm:$0xff] }
 0x14d   :  { %1623 = vmatpush1.bf16.msra.mxu1 %v865_v22  ;;  %v807_v22 = vunpack.c.h.s8.bf16 %v227_v14 }
 0x14e   :  { %1795 = vmatpush1.bf16.msra.mxu0 %v707_v23  ;;  %1624 = vmatprep.subr.bf16.mxu1 %v876_v25  ;;  %v976_v23 = vunpack.c.l.s8.bf16 %v316_v19  ;;  %v818_v25 = vunpack.c.l.s8.bf16 %v238_v20 }
 0x14f   :  { %1796 = vmatprep.subr.bf16.mxu0 %v718_v26  ;;  %v315_v26 = vld [vmem:[#allocation2 + $0x830] sm:$0xff] }
 0x150   :  { %v975_v27 = vunpack.c.l.s8.bf16 %v315_v26  ;;  %v985_v33 = vunpack.c.h.s8.bf16 %v315_v26 }
 0x151   :  { %1625 = vmatpush1.bf16.msra.mxu1 %v875_v29  ;;  %v986_v29 = vunpack.c.h.s8.bf16 %v316_v19 }
 0x152   :  { %1797 = vmatpush1.bf16.msra.mxu0 %v717_v30  ;;  %1626 = vmatprep.subr.bf16.mxu1 %v886_v31  ;;  %v828_v30 = vunpack.c.h.s8.bf16 %v238_v20  ;;  %v326_v31 = vld [vmem:[#allocation2 + $0x888] sm:$0xff] }
 0x153   :  { %1798 = vmatprep.subr.bf16.mxu0 %v728_v32  ;;  %v248_v32 = vld [vmem:[#allocation2 + $0x618] sm:$0xff]  ;;  %v1006_v46 = vunpack.c.h.s8.bf16 %v326_v31 }
 0x154   :  { %v848_v47 = vunpack.c.h.s8.bf16 %v248_v32 }
 0x155   :  { %1627 = vmatpush1.bf16.msra.mxu1 %v885_v35  ;;  %v996_v35 = vunpack.c.l.s8.bf16 %v326_v31 }
 0x156   :  { %1799 = vmatpush1.bf16.msra.mxu0 %v727_v36  ;;  %1628 = vmatprep.subr.bf16.mxu1 %v896_v37  ;;  %v838_v36 = vunpack.c.l.s8.bf16 %v248_v32  ;;  %v325_v37 = vld [vmem:[#allocation2 + $0x880] sm:$0xff] }
 0x157   :  { %1800 = vmatprep.subr.bf16.mxu0 %v738_v38  ;;  %v247_v38 = vld [vmem:[#allocation2 + $0x610] sm:$0xff] }
 0x159   :  { %1629 = vmatpush1.bf16.msra.mxu1 %v895_v42 }
 0x15a   :  { %1801 = vmatpush1.bf16.msra.mxu0 %v737_v43  ;;  %1630 = vmatprep.subr.bf16.mxu1 %v906_v41  ;;  %v995_v43 = vunpack.c.l.s8.bf16 %v325_v37  ;;  %v837_v41 = vunpack.c.l.s8.bf16 %v247_v38 }
 0x15b   :  { %1802 = vmatprep.subr.bf16.mxu0 %v748_v45 }
 0x15d   :  { %1631 = vmatpush1.bf16.msra.mxu1 %v905_v48  ;;  %v336_v48 = vld [vmem:[#allocation2 + $0x8d8] sm:$0xff] }
 0x15e   :  { %1803 = vmatpush1.bf16.msra.mxu0 %v747_v50  ;;  %1632 = vmatprep.subr.bf16.mxu1 %v916_v51  ;;  %v258_v50 = vld [vmem:[#allocation2 + $0x668] sm:$0xff]  ;;  %v1005_v51 = vunpack.c.h.s8.bf16 %v325_v37  ;;  %v1016_v53 = vunpack.c.l.s8.bf16 %v336_v48  ;;  %v1026_v58 = vunpack.c.h.s8.bf16 %v336_v48 }
 0x15f   :  { %1804 = vmatprep.subr.bf16.mxu0 %v758_v52  ;;  %v847_v52 = vunpack.c.h.s8.bf16 %v247_v38  ;;  %v858_v54 = vunpack.c.l.s8.bf16 %v258_v50  ;;  %v868_v59 = vunpack.c.h.s8.bf16 %v258_v50 }
 0x161   :  { %1633 = vmatpush1.bf16.msra.mxu1 %v915_v55  ;;  %v335_v55 = vld [vmem:[#allocation2 + $0x8d0] sm:$0xff] }
 0x162   :  { %1805 = vmatpush1.bf16.msra.mxu0 %v757_v49  ;;  %1634 = vmatprep.subr.bf16.mxu1 %v926_v56  ;;  %v257_v49 = vld [vmem:[#allocation2 + $0x660] sm:$0xff]  ;;  %v1015_v56 = vunpack.c.l.s8.bf16 %v335_v55 }
 0x163   :  { %1806 = vmatprep.subr.bf16.mxu0 %v768_v57  ;;  %v857_v57 = vunpack.c.l.s8.bf16 %v257_v49 }
 0x165   :  { %1635 = vmatpush1.bf16.msra.mxu1 %v925_v60  ;;  %v346_v60 = vld [vmem:[#allocation2 + $0x928] sm:$0xff] }
 0x166   :  { %1807 = vmatpush1.bf16.msra.mxu0 %v767_v61  ;;  %1647 = vmatprep.subr.bf16.mxu1 %v936_v62  ;;  %v268_v61 = vld [vmem:[#allocation2 + $0x6b8] sm:$0xff]  ;;  %v1025_v62 = vunpack.c.h.s8.bf16 %v335_v55  ;;  %v1036_v0 = vunpack.c.l.s8.bf16 %v346_v60  ;;  %v1046_v6 = vunpack.c.h.s8.bf16 %v346_v60 }
 0x167   :  { %1819 = vmatprep.subr.bf16.mxu0 %v778_v63  ;;  %v867_v63 = vunpack.c.h.s8.bf16 %v257_v49  ;;  %v878_v1 = vunpack.c.l.s8.bf16 %v268_v61  ;;  %v888_v7 = vunpack.c.h.s8.bf16 %v268_v61 }
 0x168   :  { %1637 = vmatmul.mubr.bf16.vlgmr.msra.gmra.mrb[4].mxu1 %v3058_v8 }
 0x169   :  { %1809 = vmatmul.mubr.bf16.vlgmr.msra.gmra.mrb[4].mxu0 %v3030_v16  ;;  %1648 = vmatpush1.bf16.msra.mxu1 %v935_v2  ;;  %v955_v16 = vunpack.c.l.s8.bf16 %v305_v13  ;;  %v345_v2 = vld [vmem:[#allocation2 + $0x920] sm:$0xff] }
 0x16a   :  { %1820 = vmatpush1.bf16.msra.mxu0 %v777_v3  ;;  %1649 = vmatprep.subr.bf16.mxu1 %v946_v4  ;;  %v267_v3 = vld [vmem:[#allocation2 + $0x6b0] sm:$0xff]  ;;  %v1035_v4 = vunpack.c.l.s8.bf16 %v345_v2 }
 0x16b   :  { %1821 = vmatprep.subr.bf16.mxu0 %v788_v5  ;;  %1679 = vmatprep.mubr.bf16.mxu1 %v3065_v15  ;;  %v877_v5 = vunpack.c.l.s8.bf16 %v267_v3 }
 0x16c   :  { %1851 = vmatprep.mubr.bf16.mxu0 %v3051_v44  ;;  %v237_v44 = vld [vmem:[#allocation2 + $0x5c0] sm:$0xff] }
 0x16d   :  { %1650 = vmatpush1.bf16.msra.mxu1 %v945_v9  ;;  %v817_v28 = vunpack.c.l.s8.bf16 %v237_v44  ;;  %v827_v34 = vunpack.c.h.s8.bf16 %v237_v44  ;;  %v356_v9 = vld [vmem:[#allocation2 + $0x978] sm:$0xff] }
 0x16e   :  { %1822 = vmatpush1.bf16.msra.mxu0 %v787_v10  ;;  %1651 = vmatprep.subr.bf16.mxu1 %v956_v11  ;;  %v278_v10 = vld [vmem:[#allocation2 + $0x708] sm:$0xff]  ;;  %v1045_v11 = vunpack.c.h.s8.bf16 %v345_v2  ;;  %v1056_v13 = vunpack.c.l.s8.bf16 %v356_v9  ;;  %v1066_v19 = vunpack.c.h.s8.bf16 %v356_v9 }
 0x16f   :  { %1823 = vmatprep.subr.bf16.mxu0 %v798_v12  ;;  %v887_v12 = vunpack.c.h.s8.bf16 %v267_v3  ;;  %v898_v14 = vunpack.c.l.s8.bf16 %v278_v10  ;;  %v908_v20 = vunpack.c.h.s8.bf16 %v278_v10 }
 0x171   :  { %1652 = vmatpush1.bf16.msra.mxu1 %v955_v16  ;;  %v355_v16 = vld [vmem:[#allocation2 + $0x970] sm:$0xff] }
 0x172   :  { %1824 = vmatpush1.bf16.msra.mxu0 %v797_v17  ;;  %1653 = vmatprep.subr.bf16.mxu1 %v966_v18  ;;  %v277_v17 = vld [vmem:[#allocation2 + $0x700] sm:$0xff]  ;;  %v1055_v18 = vunpack.c.l.s8.bf16 %v355_v16 }
 0x173   :  { %1825 = vmatprep.subr.bf16.mxu0 %v808_v24  ;;  %v897_v24 = vunpack.c.l.s8.bf16 %v277_v17 }
 0x175   :  { %1654 = vmatpush1.bf16.msra.mxu1 %v965_v21  ;;  %v366_v21 = vld [vmem:[#allocation2 + $0x9c8] sm:$0xff] }
 0x176   :  { %1826 = vmatpush1.bf16.msra.mxu0 %v807_v22  ;;  %1655 = vmatprep.subr.bf16.mxu1 %v976_v23  ;;  %v288_v22 = vld [vmem:[#allocation2 + $0x758] sm:$0xff]  ;;  %v1065_v23 = vunpack.c.h.s8.bf16 %v355_v16  ;;  %v1076_v26 = vunpack.c.l.s8.bf16 %v366_v21  ;;  %v1086_v31 = vunpack.c.h.s8.bf16 %v366_v21 }
 0x177   :  { %1827 = vmatprep.subr.bf16.mxu0 %v818_v25  ;;  %v907_v25 = vunpack.c.h.s8.bf16 %v277_v17  ;;  %v918_v44 = vunpack.c.l.s8.bf16 %v288_v22  ;;  %v928_v32 = vunpack.c.h.s8.bf16 %v288_v22  ;;  %v406_v17 = vld [vmem:[#allocation2 + $0xb08] sm:$0xff] }
 0x178   :  { %v1156_v22 = vunpack.c.l.s8.bf16 %v406_v17 }
 0x179   :  { %1656 = vmatpush1.bf16.msra.mxu1 %v975_v27  ;;  %v365_v27 = vld [vmem:[#allocation2 + $0x9c0] sm:$0xff] }
 0x17a   :  { %1828 = vmatpush1.bf16.msra.mxu0 %v817_v28  ;;  %1657 = vmatprep.subr.bf16.mxu1 %v986_v29  ;;  %v287_v28 = vld [vmem:[#allocation2 + $0x750] sm:$0xff]  ;;  %v1075_v29 = vunpack.c.l.s8.bf16 %v365_v27 }
 0x17b   :  { %1829 = vmatprep.subr.bf16.mxu0 %v828_v30  ;;  %v3069_v39 = vpop.f32.mrb[0].mxu1  ;;  %v917_v30 = vunpack.c.l.s8.bf16 %v287_v28 }
 0x17c   :  { %v3071_v40 = vpop.f32.mrb[1].mxu1 }
 0x17d   :  { %v3073_v42 = vpop.f32.mrb[2].mxu1  ;;  %1658 = vmatpush1.bf16.msra.mxu1 %v985_v33  ;;  %v376_v33 = vld [vmem:[#allocation2 + $0xa18] sm:$0xff] }
 0x17e   :  { %1830 = vmatpush1.bf16.msra.mxu0 %v827_v34  ;;  %v3075_v45 = vpop.f32.mrb[3].mxu1  ;;  %1659 = vmatprep.subr.bf16.mxu1 %v996_v35  ;;  %v298_v34 = vld [vmem:[#allocation2 + $0x7a8] sm:$0xff]  ;;  %v1085_v35 = vunpack.c.h.s8.bf16 %v365_v27  ;;  %v1096_v37 = vunpack.c.l.s8.bf16 %v376_v33  ;;  %v1106_v48 = vunpack.c.h.s8.bf16 %v376_v33 }
 0x17f   :  { %1831 = vmatprep.subr.bf16.mxu0 %v838_v36  ;;  %v927_v36 = vunpack.c.h.s8.bf16 %v287_v28  ;;  %v938_v38 = vunpack.c.l.s8.bf16 %v298_v34  ;;  %v948_v50 = vunpack.c.h.s8.bf16 %v298_v34 }
 0x181   :  { %1660 = vmatpush1.bf16.msra.mxu1 %v995_v43  ;;  %v375_v43 = vld [vmem:[#allocation2 + $0xa10] sm:$0xff] }
 0x182   :  { %1832 = vmatpush1.bf16.msra.mxu0 %v837_v41  ;;  %1661 = vmatprep.subr.bf16.mxu1 %v1006_v46  ;;  %v297_v41 = vld [vmem:[#allocation2 + $0x7a0] sm:$0xff]  ;;  %v1095_v46 = vunpack.c.l.s8.bf16 %v375_v43 }
 0x183   :  { %1833 = vmatprep.subr.bf16.mxu0 %v848_v47  ;;  %v937_v47 = vunpack.c.l.s8.bf16 %v297_v41  ;;  %v947_v55 = vunpack.c.h.s8.bf16 %v297_v41 }
 0x185   :  { %1662 = vmatpush1.bf16.msra.mxu1 %v1005_v51  ;;  %v386_v51 = vld [vmem:[#allocation2 + $0xa68] sm:$0xff] }
 0x186   :  { %1834 = vmatpush1.bf16.msra.mxu0 %v847_v52  ;;  %1663 = vmatprep.subr.bf16.mxu1 %v1016_v53  ;;  %v308_v52 = vld [vmem:[#allocation2 + $0x7f8] sm:$0xff]  ;;  %v1116_v49 = vunpack.c.l.s8.bf16 %v386_v51  ;;  %v1126_v61 = vunpack.c.h.s8.bf16 %v386_v51 }
 0x187   :  { %1835 = vmatprep.subr.bf16.mxu0 %v858_v54  ;;  %v3080_v53 = vld [vmem:[%s3329_s0 + $0x18] ss:$40 sps:$4 sm:$0xff]   ;;  %v1105_v54 = vunpack.c.h.s8.bf16 %v375_v43  ;;  %v1166_v43 = vunpack.c.h.s8.bf16 %v406_v17 }
 0x188   :  { %v425_v17 = vld [vmem:[#allocation2 + $0xba0] sm:$0xff] }
 0x189   :  { %1664 = vmatpush1.bf16.msra.mxu1 %v1015_v56  ;;  %v958_v56 = vunpack.c.l.s8.bf16 %v308_v52 }
 0x18a   :  { %1836 = vmatpush1.bf16.msra.mxu0 %v857_v57  ;;  %1665 = vmatprep.subr.bf16.mxu1 %v1026_v58  ;;  %v385_v57 = vld [vmem:[#allocation2 + $0xa60] sm:$0xff]  ;;  %v307_v58 = vld [vmem:[#allocation2 + $0x7f0] sm:$0xff] }
 0x18b   :  { %1837 = vmatprep.subr.bf16.mxu0 %v868_v59  ;;  %v3087_v59 = vld [vmem:[%s3329_s0 + $0x24] ss:$40 sps:$4 sm:$0xff]   ;;  %v957_v60 = vunpack.c.l.s8.bf16 %v307_v58  ;;  %v1125_v2 = vunpack.c.h.s8.bf16 %v385_v57  ;;  %v967_v3 = vunpack.c.h.s8.bf16 %v307_v58 }
 0x18c   :  { %v337_v58 = vld [vmem:[#allocation2 + $0x8e0] sm:$0xff] }
 0x18d   :  { %1666 = vmatpush1.bf16.msra.mxu1 %v1025_v62  ;;  %v968_v62 = vunpack.c.h.s8.bf16 %v308_v52 }
 0x18e   :  { %1838 = vmatpush1.bf16.msra.mxu0 %v867_v63  ;;  %1667 = vmatprep.subr.bf16.mxu1 %v1036_v0  ;;  %v2382_v63 = vlaneseq  ;;  %v396_v0 = vld [vmem:[#allocation2 + $0xab8] sm:$0xff] }
 0x18f   :  { %1839 = vmatprep.subr.bf16.mxu0 %v878_v1  ;;  %v318_v1 = vld [vmem:[#allocation2 + $0x848] sm:$0xff] }
 0x191   :  { %1668 = vmatpush1.bf16.msra.mxu1 %v1035_v4  ;;  %v1136_v4 = vunpack.c.l.s8.bf16 %v396_v0 }
 0x192   :  { %1840 = vmatpush1.bf16.msra.mxu0 %v877_v5  ;;  %1669 = vmatprep.subr.bf16.mxu1 %v1046_v6  ;;  %v978_v5 = vunpack.c.l.s8.bf16 %v318_v1  ;;  %v317_v6 = vld [vmem:[#allocation2 + $0x840] sm:$0xff] }
 0x193   :  { %1841 = vmatprep.subr.bf16.mxu0 %v888_v7  ;;  %v3091_v7 = vshrl.u32 %v2382_v63, 7  ;;  %v977_v10 = vunpack.c.l.s8.bf16 %v317_v6 }
 0x195   :  { %1670 = vmatpush1.bf16.msra.mxu1 %v1045_v11  ;;  %v3094_v11 = vsub.s32 0, %v3091_v7  ;;  %v3097_v16 = vsub.s32 1, %v3091_v7 }
 0x196   :  { %1842 = vmatpush1.bf16.msra.mxu0 %v887_v12  ;;  %1671 = vmatprep.subr.bf16.mxu1 %v1056_v13  ;;  %v1146_v12 = vunpack.c.h.s8.bf16 %v396_v0  ;;  %v988_v13 = vunpack.c.h.s8.bf16 %v318_v1 }
 0x197   :  { %1843 = vmatprep.subr.bf16.mxu0 %v898_v14  ;;  %v2378_v14 = vld [vmem:[#allocation4] sm:$0xff] }
 0x198   :  { %v2385_v21 = vrot.slane %v2378_v14, %v3094_v11  ;;  %v2389_v27 = vrot.slane %v2378_v14, %v3097_v16 }
 0x199   :  { %1672 = vmatpush1.bf16.msra.mxu1 %v1055_v18  ;;  %v328_v18 = vld [vmem:[#allocation2 + $0x898] sm:$0xff] }
 0x19a   :  { %1844 = vmatpush1.bf16.msra.mxu0 %v897_v24  ;;  %1673 = vmatprep.subr.bf16.mxu1 %v1066_v19  ;;  %v2452_v24 = vld [vmem:[%s3332_s3] sm:$0xff] }
 0x19b   :  { %1845 = vmatprep.subr.bf16.mxu0 %v908_v20  ;;  %v987_v20 = vunpack.c.h.s8.bf16 %v317_v6  ;;  %v426_v6 = vld [vmem:[#allocation2 + $0xba8] sm:$0xff] }
 0x19d   :  { %1674 = vmatpush1.bf16.msra.mxu1 %v1065_v23  ;;  %v998_v23 = vunpack.c.l.s8.bf16 %v328_v18 }
 0x19e   :  { %1846 = vmatpush1.bf16.msra.mxu0 %v907_v25  ;;  %1675 = vmatprep.subr.bf16.mxu1 %v1076_v26  ;;  %v405_v25 = vld [vmem:[#allocation2 + $0xb00] sm:$0xff]  ;;  %v327_v26 = vld [vmem:[#allocation2 + $0x890] sm:$0xff] }
 0x19f   :  { %1847 = vmatprep.subr.bf16.mxu0 %v918_v44  ;;  %v1155_v34 = vunpack.c.l.s8.bf16 %v405_v25 }
 0x1a1   :  { %1676 = vmatpush1.bf16.msra.mxu1 %v1075_v29  ;;  %v2459_v29 = vrot.slane %v2452_v24, %v3094_v11 }
 0x1a2   :  { %1848 = vmatpush1.bf16.msra.mxu0 %v917_v30  ;;  %1677 = vmatprep.subr.bf16.mxu1 %v1086_v31 }
 0x1a3   :  { %1849 = vmatprep.subr.bf16.mxu0 %v928_v32  ;;  %v2463_v32 = vrot.slane %v2452_v24, %v3097_v16  ;;  %v1195_v24 = vunpack.c.l.s8.bf16 %v425_v17 }
 0x1a5   :  { %1678 = vmatpush1.bf16.msra.mxu1 %v1085_v35  ;;  %v997_v35 = vunpack.c.l.s8.bf16 %v327_v26 }
 0x1a6   :  { %1850 = vmatpush1.bf16.msra.mxu0 %v927_v36  ;;  %1690 = vmatprep.subr.bf16.mxu1 %v1096_v37 }
 0x1a7   :  { %1862 = vmatprep.subr.bf16.mxu0 %v938_v38 }
 0x1a8   :  { %1680 = vmatmul.mubr.bf16.vlgmr.msra.gmra.mrb[4].mxu1 %v3080_v53 }
 0x1a9   :  { %1852 = vmatmul.mubr.bf16.vlgmr.msra.gmra.mrb[4].mxu0 %v3058_v8  ;;  %1691 = vmatpush1.bf16.msra.mxu1 %v1095_v46  ;;  %v1115_v8 = vunpack.c.l.s8.bf16 %v385_v57  ;;  %v415_v57 = vld [vmem:[#allocation2 + $0xb50] sm:$0xff] }
 0x1aa   :  { %1863 = vmatpush1.bf16.msra.mxu0 %v937_v47  ;;  %1692 = vmatprep.subr.bf16.mxu1 %v1106_v48  ;;  %v416_v47 = vld [vmem:[#allocation2 + $0xb58] sm:$0xff]  ;;  %v1175_v1 = vunpack.c.l.s8.bf16 %v415_v57 }
 0x1ab   :  { %1864 = vmatprep.subr.bf16.mxu0 %v948_v50  ;;  %1722 = vmatprep.mubr.bf16.mxu1 %v3087_v59 }
 0x1ac   :  { %1894 = vmatprep.mubr.bf16.mxu0 %v3065_v15  ;;  %v395_v15 = vld [vmem:[#allocation2 + $0xab0] sm:$0xff] }
 0x1ad   :  { %1693 = vmatpush1.bf16.msra.mxu1 %v1105_v54  ;;  %v1135_v9 = vunpack.c.l.s8.bf16 %v395_v15  ;;  %v1145_v19 = vunpack.c.h.s8.bf16 %v395_v15  ;;  %v1165_v54 = vunpack.c.h.s8.bf16 %v405_v25 }
 0x1ae   :  { %1865 = vmatpush1.bf16.msra.mxu0 %v947_v55  ;;  %1694 = vmatprep.subr.bf16.mxu1 %v1116_v49 }
 0x1af   :  { %1866 = vmatprep.subr.bf16.mxu0 %v958_v56  ;;  %v1176_v56 = vunpack.c.l.s8.bf16 %v416_v47 }
 0x1b1   :  { %1695 = vmatpush1.bf16.msra.mxu1 %v1115_v8 }
 0x1b2   :  { %1867 = vmatpush1.bf16.msra.mxu0 %v957_v60  ;;  %1696 = vmatprep.subr.bf16.mxu1 %v1126_v61 }
 0x1b3   :  { %1868 = vmatprep.subr.bf16.mxu0 %v968_v62 }
 0x1b5   :  { %1697 = vmatpush1.bf16.msra.mxu1 %v1125_v2  ;;  %v1017_v2 = vunpack.c.l.s8.bf16 %v337_v58 }
 0x1b6   :  { %1869 = vmatpush1.bf16.msra.mxu0 %v967_v3  ;;  %1698 = vmatprep.subr.bf16.mxu1 %v1136_v4  ;;  %v1186_v4 = vunpack.c.h.s8.bf16 %v416_v47  ;;  %v368_v47 = vld [vmem:[#allocation2 + $0x9d8] sm:$0xff] }
 0x1b7   :  { %1870 = vmatprep.subr.bf16.mxu0 %v978_v5 }
 0x1b9   :  { %1699 = vmatpush1.bf16.msra.mxu1 %v1135_v9  ;;  %v348_v9 = vld [vmem:[#allocation2 + $0x938] sm:$0xff] }
 0x1ba   :  { %1871 = vmatpush1.bf16.msra.mxu0 %v977_v10  ;;  %1700 = vmatprep.subr.bf16.mxu1 %v1146_v12  ;;  %v1185_v10 = vunpack.c.h.s8.bf16 %v415_v57  ;;  %v1027_v12 = vunpack.c.h.s8.bf16 %v337_v58  ;;  %v1038_v14 = vunpack.c.l.s8.bf16 %v348_v9 }
 0x1bb   :  { %1872 = vmatprep.subr.bf16.mxu0 %v988_v13  ;;  %v1196_v13 = vunpack.c.l.s8.bf16 %v426_v6 }
 0x1bc   :  { %v1509_v44 = vpop.f32.mrb[0].mxu0 }
 0x1bd   :  { %v2702_v28 = vadd.f32 %v1509_v44, %v3069_v39  ;;  %v1511_v30 = vpop.f32.mrb[1].mxu0  ;;  %1701 = vmatpush1.bf16.msra.mxu1 %v1145_v19  ;;  %v1008_v39 = vunpack.c.h.s8.bf16 %v328_v18  ;;  %v347_v18 = vld [vmem:[#allocation2 + $0x930] sm:$0xff] }
 0x1be   :  { %v2703_v31 = vadd.f32 %v1511_v30, %v3071_v40  ;;  %v1513_v33 = vpop.f32.mrb[2].mxu0  ;;  %1873 = vmatpush1.bf16.msra.mxu0 %v987_v20  ;;  %1702 = vmatprep.subr.bf16.mxu1 %v1156_v22  ;;  %v338_v40 = vld [vmem:[#allocation2 + $0x8e8] sm:$0xff]  ;;  %v1037_v19 = vunpack.c.l.s8.bf16 %v347_v18  ;;  %v1206_v20 = vunpack.c.h.s8.bf16 %v426_v6  ;;  %v436_v22 = vld [vmem:[#allocation2 + $0xbf8] sm:$0xff] }
 0x1bf   :  { %v2432_v36 = vmul.f32 %v2702_v28, %v2385_v21  ;;  %v2704_v37 = vadd.f32 %v1513_v33, %v3073_v42  ;;  %v1515_v38 = vpop.f32.mrb[3].mxu0  ;;  %1874 = vmatprep.subr.bf16.mxu0 %v998_v23  ;;  %v1007_v42 = vunpack.c.h.s8.bf16 %v327_v26  ;;  %v1028_v5 = vunpack.c.h.s8.bf16 %v338_v40  ;;  %v358_v23 = vld [vmem:[#allocation2 + $0x988] sm:$0xff]  ;;  %v435_v33 = vld [vmem:[#allocation2 + $0xbf0] sm:$0xff] }
 0x1c0   :  { %v2433_v41 = vmul.f32 %v2703_v31, %v2389_v27  ;;  %v2705_v46 = vadd.f32 %v1515_v38, %v3075_v45  ;;  %v1018_v45 = vunpack.c.l.s8.bf16 %v338_v40  ;;  %v1047_v28 = vunpack.c.h.s8.bf16 %v347_v18  ;;  %v3141_v18 = vld [vmem:[%s3329_s0 + $0x20] ss:$40 sps:$4 sm:$0xff]  }
 0x1c1   :  { %v3110_v48 = vadd.f32 %v2459_v29, %v2432_v36  ;;  %v2442_v50 = vmul.f32 %v2704_v37, %v2385_v21  ;;  %1703 = vmatpush1.bf16.msra.mxu1 %v1155_v34  ;;  %v1048_v21 = vunpack.c.h.s8.bf16 %v348_v9  ;;  %v1216_v31 = vunpack.c.l.s8.bf16 %v436_v22  ;;  %v357_v34 = vld [vmem:[#allocation2 + $0x980] sm:$0xff] }
 0x1c2   :  { %v3112_v51 = vadd.f32 %v2463_v32, %v2433_v41  ;;  %v2443_v52 = vmul.f32 %v2705_v46, %v2389_v27  ;;  %1875 = vmatpush1.bf16.msra.mxu0 %v997_v35  ;;  %1704 = vmatprep.subr.bf16.mxu1 %v1166_v43  ;;  %v1205_v27 = vunpack.c.h.s8.bf16 %v425_v17  ;;  %v1215_v38 = vunpack.c.l.s8.bf16 %v435_v33  ;;  %v446_v46 = vld [vmem:[#allocation2 + $0xc48] sm:$0xff]  ;;  %v377_v9 = vld [vmem:[#allocation2 + $0xa20] sm:$0xff] }
 0x1c3   :  { %v2526_v55 = vsub.f32 0.0, %v3110_v48  ;;  %v3115_v49 = vadd.f32 %v2459_v29, %v2442_v50  ;;  %1876 = vmatprep.subr.bf16.mxu0 %v1008_v39  ;;  %v1057_v43 = vunpack.c.l.s8.bf16 %v357_v34  ;;  %v1226_v39 = vunpack.c.h.s8.bf16 %v436_v22  ;;  %v70_v17 = vld [vmem:[#allocation2 + $0x88] sm:$0xff]  ;;  %v387_v22 = vld [vmem:[#allocation2 + $0xa70] sm:$0xff] }
 0x1c4   :  { %v2527_v8 = vsub.f32 0.0, %v3112_v51  ;;  %v3118_v60 = vadd.f32 %v2463_v32, %v2443_v52  ;;  %v1058_v32 = vunpack.c.l.s8.bf16 %v358_v23  ;;  %v1068_v41 = vunpack.c.h.s8.bf16 %v358_v23  ;;  %v69_v23 = vld [vmem:[#allocation2 + $0x80] sm:$0xff] }
 0x1c5   :  { %v2546_v61 = vmul.f32 1.442695, %v2526_v55  ;;  %v2536_v62 = vsub.f32 0.0, %v3115_v49  ;;  %1705 = vmatpush1.bf16.msra.mxu1 %v1165_v54  ;;  %v1225_v40 = vunpack.c.h.s8.bf16 %v435_v33  ;;  %v1067_v50 = vunpack.c.h.s8.bf16 %v357_v34  ;;  %v367_v55 = vld [vmem:[#allocation2 + $0x9d0] sm:$0xff]  ;;  %v397_v33 = vld [vmem:[#allocation2 + $0xac0] sm:$0xff] }
 0x1c6   :  { %v2548_v63 = vmul.f32 1.442695, %v2527_v8  ;;  %v2537_v0 = vsub.f32 0.0, %v3118_v60  ;;  %1877 = vmatpush1.bf16.msra.mxu0 %v1007_v42  ;;  %1706 = vmatprep.subr.bf16.mxu1 %v1176_v56  ;;  %v1236_v52 = vunpack.c.l.s8.bf16 %v446_v46  ;;  %v1078_v54 = vunpack.c.l.s8.bf16 %v368_v47  ;;  %v445_v42 = vld [vmem:[#allocation2 + $0xc40] sm:$0xff]  ;;  %v79_v34 = vld [vmem:[#allocation2 + $0xd0] sm:$0xff] }
 0x1c7   :  { %2801 = vpow2.f32 %v2546_v61  ;;  %v2566_v3 = vmul.f32 1.442695, %v2536_v62  ;;  %1878 = vmatprep.subr.bf16.mxu0 %v1018_v45  ;;  %v1235_v45 = vunpack.c.l.s8.bf16 %v445_v42  ;;  %v1077_v57 = vunpack.c.l.s8.bf16 %v367_v55 }
 0x1c8   :  { %2803 = vpow2.f32 %v2548_v63  ;;  %v2568_v15 = vmul.f32 1.442695, %v2537_v0  ;;  %v1246_v61 = vunpack.c.h.s8.bf16 %v446_v46  ;;  %v1088_v62 = vunpack.c.h.s8.bf16 %v368_v47 }
 0x1c9   :  { %2805 = vpow2.f32 %v2566_v3  ;;  %1707 = vmatpush1.bf16.msra.mxu1 %v1175_v1  ;;  %v378_v1 = vld [vmem:[#allocation2 + $0xa28] sm:$0xff]  ;;  %v509_v46 = vunpack.c.h.s8.bf16 %v79_v34 }
 0x1ca   :  { %2807 = vpow2.f32 %v2568_v15  ;;  %1879 = vmatpush1.bf16.msra.mxu0 %v1017_v2  ;;  %1708 = vmatprep.subr.bf16.mxu1 %v1186_v4  ;;  %v60_v2 = vld [vmem:[#allocation2 + $0x38] sm:$0xff]  ;;  %v1087_v15 = vunpack.c.h.s8.bf16 %v367_v55 }
 0x1cb   :  { %1880 = vmatprep.subr.bf16.mxu0 %v1028_v5  ;;  %v1245_v5 = vunpack.c.h.s8.bf16 %v445_v42  ;;  %v460_v6 = vunpack.c.l.s8.bf16 %v60_v2 }
 0x1cd   :  { %1709 = vmatpush1.bf16.msra.mxu1 %v1185_v10 }
 0x1ce   :  { %1881 = vmatpush1.bf16.msra.mxu0 %v1027_v12  ;;  %1710 = vmatprep.subr.bf16.mxu1 %v1196_v13  ;;  %v1108_v12 = vunpack.c.h.s8.bf16 %v378_v1  ;;  %v470_v13 = vunpack.c.h.s8.bf16 %v60_v2 }
 0x1cf   :  { %1882 = vmatprep.subr.bf16.mxu0 %v1038_v14  ;;  %v388_v14 = vld [vmem:[#allocation2 + $0xa78] sm:$0xff] }
 0x1d1   :  { %v2802_v25 = vpop.eup %2801  ;;  %1711 = vmatpush1.bf16.msra.mxu1 %v1195_v24  ;;  %v1107_v24 = vunpack.c.h.s8.bf16 %v377_v9 }
 0x1d2   :  { %v2804_v26 = vpop.eup %2803  ;;  %v2586_v44 = vadd.f32 1.0, %v2802_v25  ;;  %1883 = vmatpush1.bf16.msra.mxu0 %v1037_v19  ;;  %1712 = vmatprep.subr.bf16.mxu1 %v1206_v20  ;;  %v1118_v20 = vunpack.c.l.s8.bf16 %v388_v14  ;;  %v3149_v25 = vld [vmem:[%s3329_s0 + $0x4] ss:$40 sps:$4 sm:$0xff]  }
 0x1d3   :  { %v2806_v29 = vpop.eup %2805  ;;  %v2587_v30 = vadd.f32 1.0, %v2804_v26  ;;  %1884 = vmatprep.subr.bf16.mxu0 %v1048_v21  ;;  %v480_v21 = vunpack.c.l.s8.bf16 %v70_v17  ;;  %v479_v26 = vunpack.c.l.s8.bf16 %v69_v23 }
 0x1d4   :  { %v2808_v35 = vpop.eup %2807  ;;  %2809 = vrcp.f32 %v2586_v44  ;;  %v2596_v36 = vadd.f32 1.0, %v2806_v29  ;;  %v1128_v44 = vunpack.c.h.s8.bf16 %v388_v14  ;;  %v80_v29 = vld [vmem:[#allocation2 + $0xd8] sm:$0xff] }
 0x1d5   :  { %2811 = vrcp.f32 %v2587_v30  ;;  %v2597_v37 = vadd.f32 1.0, %v2808_v35  ;;  %1713 = vmatpush1.bf16.msra.mxu1 %v1205_v27  ;;  %v490_v27 = vunpack.c.h.s8.bf16 %v70_v17  ;;  %v489_v30 = vunpack.c.h.s8.bf16 %v69_v23  ;;  %v438_v17 = vld [vmem:[#allocation2 + $0xc08] sm:$0xff]  ;;  %v437_v23 = vld [vmem:[#allocation2 + $0xc00] sm:$0xff] }
 0x1d6   :  { %2813 = vrcp.f32 %v2596_v36  ;;  %1885 = vmatpush1.bf16.msra.mxu0 %v1047_v28  ;;  %1714 = vmatprep.subr.bf16.mxu1 %v1216_v31  ;;  %v398_v28 = vld [vmem:[#allocation2 + $0xac8] sm:$0xff]  ;;  %v1137_v35 = vunpack.c.l.s8.bf16 %v397_v33  ;;  %v499_v36 = vunpack.c.l.s8.bf16 %v79_v34  ;;  %v447_v34 = vld [vmem:[#allocation2 + $0xc50] sm:$0xff] }
 0x1d7   :  { %2815 = vrcp.f32 %v2597_v37  ;;  %1886 = vmatprep.subr.bf16.mxu0 %v1058_v32  ;;  %v1138_v31 = vunpack.c.l.s8.bf16 %v398_v28  ;;  %v500_v32 = vunpack.c.l.s8.bf16 %v80_v29  ;;  %v1148_v37 = vunpack.c.h.s8.bf16 %v398_v28 }
 0x1d9   :  { %1715 = vmatpush1.bf16.msra.mxu1 %v1215_v38  ;;  %v510_v38 = vunpack.c.h.s8.bf16 %v80_v29  ;;  %v448_v29 = vld [vmem:[#allocation2 + $0xc58] sm:$0xff] }
 0x1da   :  { %1887 = vmatpush1.bf16.msra.mxu0 %v1057_v43  ;;  %1716 = vmatprep.subr.bf16.mxu1 %v1226_v39  ;;  %v408_v43 = vld [vmem:[#allocation2 + $0xb18] sm:$0xff]  ;;  %v90_v39 = vld [vmem:[#allocation2 + $0x128] sm:$0xff] }
 0x1db   :  { %1888 = vmatprep.subr.bf16.mxu0 %v1068_v41  ;;  %v1147_v41 = vunpack.c.h.s8.bf16 %v397_v33  ;;  %v1158_v47 = vunpack.c.l.s8.bf16 %v408_v43  ;;  %v1168_v55 = vunpack.c.h.s8.bf16 %v408_v43 }
 0x1dd   :  { %1717 = vmatpush1.bf16.msra.mxu1 %v1225_v40  ;;  %v520_v40 = vunpack.c.l.s8.bf16 %v90_v39 }
 0x1de   :  { %v2810_v56 = vpop.eup %2809  ;;  %1889 = vmatpush1.bf16.msra.mxu0 %v1067_v50  ;;  %1718 = vmatprep.subr.bf16.mxu1 %v1236_v52  ;;  %v407_v50 = vld [vmem:[#allocation2 + $0xb10] sm:$0xff]  ;;  %v89_v52 = vld [vmem:[#allocation2 + $0x120] sm:$0xff] }
 0x1df   :  { %v2812_v58 = vpop.eup %2811  ;;  %v2646_v8 = vmul.f32 %v2810_v56, %v3110_v48  ;;  %1890 = vmatprep.subr.bf16.mxu0 %v1078_v54  ;;  %v1157_v54 = vunpack.c.l.s8.bf16 %v407_v50  ;;  %v519_v42 = vunpack.c.l.s8.bf16 %v89_v52  ;;  %v530_v56 = vunpack.c.h.s8.bf16 %v90_v39  ;;  %v140_v39 = vld [vmem:[#allocation2 + $0x2b8] sm:$0xff] }
 0x1e0   :  { %v2814_v63 = vpop.eup %2813  ;;  %v2647_v0 = vmul.f32 %v2812_v58, %v3112_v51  ;;  %v1098_v51 = vunpack.c.l.s8.bf16 %v378_v1  ;;  %v1167_v58 = vunpack.c.h.s8.bf16 %v407_v50 }
 0x1e1   :  { %v2816_v3 = vpop.eup %2815  ;;  %2666 = vst [vmem:[%s3333_s4] sm:$0xff] %v2646_v8  ;;  %v2656_v4 = vmul.f32 %v2814_v63, %v3115_v49  ;;  %1719 = vmatpush1.bf16.msra.mxu1 %v1235_v45  ;;  %v59_v49 = vld [vmem:[#allocation2 + $0x30] sm:$0xff]  ;;  %v418_v45 = vld [vmem:[#allocation2 + $0xb68] sm:$0xff]  ;;  %v529_v8 = vunpack.c.h.s8.bf16 %v89_v52  ;;  %v417_v63 = vld [vmem:[#allocation2 + $0xb60] sm:$0xff] }
 0x1e2   :  { %2667 = vst [vmem:[%s3333_s4 + $0x8] sm:$0xff] %v2647_v0  ;;  %v2657_v48 = vmul.f32 %v2816_v3, %v3118_v60  ;;  %1891 = vmatpush1.bf16.msra.mxu0 %v1077_v57  ;;  %1720 = vmatprep.subr.bf16.mxu1 %v1246_v61  ;;  %v1097_v60 = vunpack.c.l.s8.bf16 %v377_v9  ;;  %v459_v10 = vunpack.c.l.s8.bf16 %v59_v49  ;;  %v469_v19 = vunpack.c.h.s8.bf16 %v59_v49  ;;  %v100_v57 = vld [vmem:[#allocation2 + $0x178] sm:$0xff]  ;;  %v99_v0 = vld [vmem:[#allocation2 + $0x170] sm:$0xff] }
 0x1e3   :  { %2676 = vst [vmem:[%s3333_s4 + $0x50] sm:$0xff] %v2656_v4  ;;  %1892 = vmatprep.subr.bf16.mxu0 %v1088_v62  ;;  %v1178_v61 = vunpack.c.l.s8.bf16 %v418_v45  ;;  %v540_v62 = vunpack.c.l.s8.bf16 %v100_v57  ;;  %v1177_v1 = vunpack.c.l.s8.bf16 %v417_v63  ;;  %v539_v2 = vunpack.c.l.s8.bf16 %v99_v0  ;;  %v427_v49 = vld [vmem:[#allocation2 + $0xbb0] sm:$0xff] }
 0x1e4   :  { %2677 = vst [vmem:[%s3333_s4 + $0x58] sm:$0xff] %v2657_v48  ;;  %v1188_v3 = vunpack.c.h.s8.bf16 %v418_v45  ;;  %v550_v4 = vunpack.c.h.s8.bf16 %v100_v57  ;;  %v428_v48 = vld [vmem:[#allocation2 + $0xbb8] sm:$0xff]  ;;  %v139_v52 = vld [vmem:[#allocation2 + $0x2b0] sm:$0xff]  ;;  %v150_v57 = vld [vmem:[#allocation2 + $0x308] sm:$0xff] }
 0x1e5   :  { %1721 = vmatpush1.bf16.msra.mxu1 %v1245_v5  ;;  %v110_v5 = vld [vmem:[#allocation2 + $0x1c8] sm:$0xff] }
 0x1e6   :  { %1893 = vmatpush1.bf16.msra.mxu0 %v1087_v15  ;;  %1948 = vmatprep.subr.bf16.mxu1 %v460_v6  ;;  %v1187_v15 = vunpack.c.h.s8.bf16 %v417_v63  ;;  %v1198_v6 = vunpack.c.l.s8.bf16 %v428_v48  ;;  %v560_v9 = vunpack.c.l.s8.bf16 %v110_v5  ;;  %v570_v14 = vunpack.c.h.s8.bf16 %v110_v5 }
 0x1e7   :  { %1905 = vmatprep.subr.bf16.mxu0 %v1098_v51  ;;  %v549_v51 = vunpack.c.h.s8.bf16 %v99_v0  ;;  %v640_v63 = vunpack.c.l.s8.bf16 %v150_v57 }
 0x1e8   :  { %1723 = vmatmul.mubr.bf16.vlgmr.msra.gmra.mrb[4].mxu1 %v3141_v18 }
 0x1e9   :  { %1895 = vmatmul.mubr.bf16.vlgmr.msra.gmra.mrb[4].mxu0 %v3080_v53  ;;  %1949 = vmatpush1.bf16.msra.mxu1 %v459_v10  ;;  %v1117_v53 = vunpack.c.l.s8.bf16 %v387_v22  ;;  %v1197_v10 = vunpack.c.l.s8.bf16 %v427_v49 }
 0x1ea   :  { %1906 = vmatpush1.bf16.msra.mxu0 %v1097_v60  ;;  %1950 = vmatprep.subr.bf16.mxu1 %v470_v13  ;;  %v109_v60 = vld [vmem:[#allocation2 + $0x1c0] sm:$0xff]  ;;  %v1208_v13 = vunpack.c.h.s8.bf16 %v428_v48  ;;  %v650_v48 = vunpack.c.h.s8.bf16 %v150_v57 }
 0x1eb   :  { %1907 = vmatprep.subr.bf16.mxu0 %v1108_v12  ;;  %1937 = vmatprep.mubr.bf16.mxu0 %v3087_v59  ;;  %v1127_v59 = vunpack.c.h.s8.bf16 %v387_v22  ;;  %v559_v12 = vunpack.c.l.s8.bf16 %v109_v60 }
 0x1ec   :  { %1980 = vmatprep.mubr.bf16.mxu1 %v3149_v25 }
 0x1ed   :  { %1951 = vmatpush1.bf16.msra.mxu1 %v469_v19  ;;  %v1207_v19 = vunpack.c.h.s8.bf16 %v427_v49 }
 0x1ee   :  { %1908 = vmatpush1.bf16.msra.mxu0 %v1107_v24  ;;  %1952 = vmatprep.subr.bf16.mxu1 %v480_v21  ;;  %v120_v24 = vld [vmem:[#allocation2 + $0x218] sm:$0xff]  ;;  %v1218_v21 = vunpack.c.l.s8.bf16 %v438_v17 }
 0x1ef   :  { %1909 = vmatprep.subr.bf16.mxu0 %v1118_v20  ;;  %v569_v20 = vunpack.c.h.s8.bf16 %v109_v60  ;;  %v580_v22 = vunpack.c.l.s8.bf16 %v120_v24  ;;  %v590_v28 = vunpack.c.h.s8.bf16 %v120_v24  ;;  %v170_v24 = vld [vmem:[#allocation2 + $0x3a8] sm:$0xff] }
 0x1f1   :  { %1953 = vmatpush1.bf16.msra.mxu1 %v479_v26  ;;  %v1217_v26 = vunpack.c.l.s8.bf16 %v437_v23 }
 0x1f2   :  { %1910 = vmatpush1.bf16.msra.mxu0 %v1117_v53  ;;  %1954 = vmatprep.subr.bf16.mxu1 %v490_v27  ;;  %v119_v53 = vld [vmem:[#allocation2 + $0x210] sm:$0xff]  ;;  %v1228_v27 = vunpack.c.h.s8.bf16 %v438_v17 }
 0x1f3   :  { %1911 = vmatprep.subr.bf16.mxu0 %v1128_v44  ;;  %v579_v44 = vunpack.c.l.s8.bf16 %v119_v53 }
 0x1f5   :  { %1955 = vmatpush1.bf16.msra.mxu1 %v489_v30  ;;  %v1227_v30 = vunpack.c.h.s8.bf16 %v437_v23 }
 0x1f6   :  { %1912 = vmatpush1.bf16.msra.mxu0 %v1127_v59  ;;  %1956 = vmatprep.subr.bf16.mxu1 %v500_v32  ;;  %v130_v59 = vld [vmem:[#allocation2 + $0x268] sm:$0xff]  ;;  %v1238_v32 = vunpack.c.l.s8.bf16 %v448_v29 }
 0x1f7   :  { %1913 = vmatprep.subr.bf16.mxu0 %v1138_v31  ;;  %v589_v31 = vunpack.c.h.s8.bf16 %v119_v53  ;;  %v600_v33 = vunpack.c.l.s8.bf16 %v130_v59  ;;  %v610_v43 = vunpack.c.h.s8.bf16 %v130_v59  ;;  %v169_v53 = vld [vmem:[#allocation2 + $0x3a0] sm:$0xff]  ;;  %v180_v59 = vld [vmem:[#allocation2 + $0x3f8] sm:$0xff] }
 0x1f9   :  { %1957 = vmatpush1.bf16.msra.mxu1 %v499_v36  ;;  %v1237_v36 = vunpack.c.l.s8.bf16 %v447_v34 }
 0x1fa   :  { %1914 = vmatpush1.bf16.msra.mxu0 %v1137_v35  ;;  %1958 = vmatprep.subr.bf16.mxu1 %v510_v38  ;;  %v129_v35 = vld [vmem:[#allocation2 + $0x260] sm:$0xff]  ;;  %v1248_v38 = vunpack.c.h.s8.bf16 %v448_v29 }
 0x1fb   :  { %1915 = vmatprep.subr.bf16.mxu0 %v1148_v37  ;;  %v599_v37 = vunpack.c.l.s8.bf16 %v129_v35 }
 0x1fd   :  { %1959 = vmatpush1.bf16.msra.mxu1 %v509_v46  ;;  %v1247_v46 = vunpack.c.h.s8.bf16 %v447_v34 }
 0x1fe   :  { %1916 = vmatpush1.bf16.msra.mxu0 %v1147_v41  ;;  %1960 = vmatprep.subr.bf16.mxu1 %v520_v40  ;;  %v62_v41 = vld [vmem:[#allocation2 + $0x48] sm:$0xff]  ;;  %v620_v40 = vunpack.c.l.s8.bf16 %v140_v39 }
 0x1ff   :  { %1917 = vmatprep.subr.bf16.mxu0 %v1158_v47  ;;  %v609_v47 = vunpack.c.h.s8.bf16 %v129_v35  ;;  %v462_v50 = vunpack.c.l.s8.bf16 %v62_v41  ;;  %v472_v45 = vunpack.c.h.s8.bf16 %v62_v41  ;;  %v179_v35 = vld [vmem:[#allocation2 + $0x3f0] sm:$0xff]  ;;  %v190_v41 = vld [vmem:[#allocation2 + $0x448] sm:$0xff] }
 0x201   :  { %1961 = vmatpush1.bf16.msra.mxu1 %v519_v42  ;;  %v619_v42 = vunpack.c.l.s8.bf16 %v139_v52 }
 0x202   :  { %1918 = vmatpush1.bf16.msra.mxu0 %v1157_v54  ;;  %1962 = vmatprep.subr.bf16.mxu1 %v530_v56  ;;  %v61_v54 = vld [vmem:[#allocation2 + $0x40] sm:$0xff]  ;;  %v630_v56 = vunpack.c.h.s8.bf16 %v140_v39 }
 0x203   :  { %1919 = vmatprep.subr.bf16.mxu0 %v1168_v55  ;;  %v461_v55 = vunpack.c.l.s8.bf16 %v61_v54 }
 0x205   :  { %1963 = vmatpush1.bf16.msra.mxu1 %v529_v8  ;;  %v3156_v8 = vld [vmem:[%s3329_s0] ss:$40 sps:$4 sm:$0xff]  }
 0x206   :  { %1920 = vmatpush1.bf16.msra.mxu0 %v1167_v58  ;;  %1964 = vmatprep.subr.bf16.mxu1 %v540_v62  ;;  %v72_v58 = vld [vmem:[#allocation2 + $0x98] sm:$0xff]  ;;  %v471_v62 = vunpack.c.h.s8.bf16 %v61_v54  ;;  %v189_v54 = vld [vmem:[#allocation2 + $0x440] sm:$0xff] }
 0x207   :  { %1921 = vmatprep.subr.bf16.mxu0 %v1178_v61  ;;  %v629_v61 = vunpack.c.h.s8.bf16 %v139_v52  ;;  %v482_v0 = vunpack.c.l.s8.bf16 %v72_v58  ;;  %v492_v5 = vunpack.c.h.s8.bf16 %v72_v58  ;;  %v200_v58 = vld [vmem:[#allocation2 + $0x498] sm:$0xff] }
 0x209   :  { %1965 = vmatpush1.bf16.msra.mxu1 %v539_v2  ;;  %v71_v2 = vld [vmem:[#allocation2 + $0x90] sm:$0xff] }
 0x20a   :  { %1922 = vmatpush1.bf16.msra.mxu0 %v1177_v1  ;;  %1966 = vmatprep.subr.bf16.mxu1 %v550_v4  ;;  %v149_v1 = vld [vmem:[#allocation2 + $0x300] sm:$0xff]  ;;  %v481_v4 = vunpack.c.l.s8.bf16 %v71_v2 }
 0x20b   :  { %1923 = vmatprep.subr.bf16.mxu0 %v1188_v3  ;;  %v639_v3 = vunpack.c.l.s8.bf16 %v149_v1 }
 0x20d   :  { %1967 = vmatpush1.bf16.msra.mxu1 %v549_v51  ;;  %v82_v51 = vld [vmem:[#allocation2 + $0xe8] sm:$0xff] }
 0x20e   :  { %1924 = vmatpush1.bf16.msra.mxu0 %v1187_v15  ;;  %1968 = vmatprep.subr.bf16.mxu1 %v560_v9  ;;  %v160_v15 = vld [vmem:[#allocation2 + $0x358] sm:$0xff]  ;;  %v491_v9 = vunpack.c.h.s8.bf16 %v71_v2  ;;  %v502_v60 = vunpack.c.l.s8.bf16 %v82_v51  ;;  %v512_v17 = vunpack.c.h.s8.bf16 %v82_v51  ;;  %v199_v2 = vld [vmem:[#allocation2 + $0x490] sm:$0xff]  ;;  %v210_v51 = vld [vmem:[#allocation2 + $0x4e8] sm:$0xff] }
 0x20f   :  { %1925 = vmatprep.subr.bf16.mxu0 %v1198_v6  ;;  %v649_v6 = vunpack.c.h.s8.bf16 %v149_v1  ;;  %v660_v49 = vunpack.c.l.s8.bf16 %v160_v15 }
 0x211   :  { %1969 = vmatpush1.bf16.msra.mxu1 %v559_v12 }
 0x212   :  { %1926 = vmatpush1.bf16.msra.mxu0 %v1197_v10  ;;  %1970 = vmatprep.subr.bf16.mxu1 %v570_v14  ;;  %v159_v10 = vld [vmem:[#allocation2 + $0x350] sm:$0xff]  ;;  %v670_v14 = vunpack.c.h.s8.bf16 %v160_v15 }
 0x213   :  { %1927 = vmatprep.subr.bf16.mxu0 %v1208_v13  ;;  %v659_v12 = vunpack.c.l.s8.bf16 %v159_v10 }
 0x215   :  { %1971 = vmatpush1.bf16.msra.mxu1 %v569_v20  ;;  %v669_v20 = vunpack.c.h.s8.bf16 %v159_v10 }
 0x216   :  { %1928 = vmatpush1.bf16.msra.mxu0 %v1207_v19  ;;  %1972 = vmatprep.subr.bf16.mxu1 %v580_v22  ;;  %v92_v19 = vld [vmem:[#allocation2 + $0x138] sm:$0xff]  ;;  %v680_v22 = vunpack.c.l.s8.bf16 %v170_v24 }
 0x217   :  { %1929 = vmatprep.subr.bf16.mxu0 %v1218_v21  ;;  %v522_v23 = vunpack.c.l.s8.bf16 %v92_v19  ;;  %v532_v29 = vunpack.c.h.s8.bf16 %v92_v19  ;;  %v220_v19 = vld [vmem:[#allocation2 + $0x538] sm:$0xff] }
 0x219   :  { %1973 = vmatpush1.bf16.msra.mxu1 %v579_v44  ;;  %v679_v44 = vunpack.c.l.s8.bf16 %v169_v53 }
 0x21a   :  { %1930 = vmatpush1.bf16.msra.mxu0 %v1217_v26  ;;  %1974 = vmatprep.subr.bf16.mxu1 %v590_v28  ;;  %v91_v26 = vld [vmem:[#allocation2 + $0x130] sm:$0xff]  ;;  %v690_v28 = vunpack.c.h.s8.bf16 %v170_v24 }
 0x21b   :  { %1931 = vmatprep.subr.bf16.mxu0 %v1228_v27  ;;  %v521_v27 = vunpack.c.l.s8.bf16 %v91_v26 }
 0x21d   :  { %1975 = vmatpush1.bf16.msra.mxu1 %v589_v31  ;;  %v689_v31 = vunpack.c.h.s8.bf16 %v169_v53 }
 0x21e   :  { %1932 = vmatpush1.bf16.msra.mxu0 %v1227_v30  ;;  %1976 = vmatprep.subr.bf16.mxu1 %v600_v33  ;;  %v102_v30 = vld [vmem:[#allocation2 + $0x188] sm:$0xff]  ;;  %v700_v33 = vunpack.c.l.s8.bf16 %v180_v59 }
 0x21f   :  { %1933 = vmatprep.subr.bf16.mxu0 %v1238_v32  ;;  %v531_v32 = vunpack.c.h.s8.bf16 %v91_v26  ;;  %v542_v34 = vunpack.c.l.s8.bf16 %v102_v30  ;;  %v552_v39 = vunpack.c.h.s8.bf16 %v102_v30  ;;  %v219_v26 = vld [vmem:[#allocation2 + $0x530] sm:$0xff]  ;;  %v230_v30 = vld [vmem:[#allocation2 + $0x588] sm:$0xff] }
 0x221   :  { %1977 = vmatpush1.bf16.msra.mxu1 %v599_v37  ;;  %v699_v37 = vunpack.c.l.s8.bf16 %v179_v35 }
 0x222   :  { %1934 = vmatpush1.bf16.msra.mxu0 %v1237_v36  ;;  %1978 = vmatprep.subr.bf16.mxu1 %v610_v43  ;;  %v101_v36 = vld [vmem:[#allocation2 + $0x180] sm:$0xff]  ;;  %v710_v43 = vunpack.c.h.s8.bf16 %v180_v59 }
 0x223   :  { %1935 = vmatprep.subr.bf16.mxu0 %v1248_v38  ;;  %v541_v38 = vunpack.c.l.s8.bf16 %v101_v36 }
 0x225   :  { %1979 = vmatpush1.bf16.msra.mxu1 %v609_v47  ;;  %v709_v47 = vunpack.c.h.s8.bf16 %v179_v35  ;;  %v800_v35 = vunpack.c.l.s8.bf16 %v230_v30 }
 0x226   :  { %1936 = vmatpush1.bf16.msra.mxu0 %v1247_v46  ;;  %1991 = vmatprep.subr.bf16.mxu1 %v620_v40  ;;  %v112_v46 = vld [vmem:[#allocation2 + $0x1d8] sm:$0xff]  ;;  %v551_v40 = vunpack.c.h.s8.bf16 %v101_v36 }
 0x227   :  { %2163 = vmatprep.subr.bf16.mxu0 %v462_v50  ;;  %v720_v50 = vunpack.c.l.s8.bf16 %v190_v41  ;;  %v562_v52 = vunpack.c.l.s8.bf16 %v112_v46  ;;  %v572_v57 = vunpack.c.h.s8.bf16 %v112_v46 }
 0x228   :  { %1981 = vmatmul.mubr.bf16.vlgmr.msra.gmra.mrb[8].mxu1 %v3156_v8 }
 0x229   :  { %1938 = vmatmul.mubr.bf16.vlgmr.msra.gmra.mrb[4].mxu0 %v3141_v18  ;;  %1992 = vmatpush1.bf16.msra.mxu1 %v619_v42  ;;  %v3162_v18 = vld [vmem:[%s3329_s0 + $0xc] ss:$40 sps:$4 sm:$0xff]  }
 0x22a   :  { %2164 = vmatpush1.bf16.msra.mxu0 %v461_v55  ;;  %1993 = vmatprep.subr.bf16.mxu1 %v630_v56  ;;  %v111_v42 = vld [vmem:[#allocation2 + $0x1d0] sm:$0xff]  ;;  %v719_v55 = vunpack.c.l.s8.bf16 %v189_v54 }
 0x22b   :  { %2165 = vmatprep.subr.bf16.mxu0 %v472_v45  ;;  %2023 = vmatprep.mubr.bf16.mxu1 %v3162_v18  ;;  %v561_v56 = vunpack.c.l.s8.bf16 %v111_v42  ;;  %v730_v45 = vunpack.c.h.s8.bf16 %v190_v41  ;;  %v810_v41 = vunpack.c.h.s8.bf16 %v230_v30 }
 0x22c   :  { %2195 = vmatprep.mubr.bf16.mxu0 %v3149_v25  ;;  %v81_v25 = vld [vmem:[#allocation2 + $0xe0] sm:$0xff] }
 0x22d   :  { %1994 = vmatpush1.bf16.msra.mxu1 %v629_v61  ;;  %v501_v13 = vunpack.c.l.s8.bf16 %v81_v25  ;;  %v511_v21 = vunpack.c.h.s8.bf16 %v81_v25  ;;  %v122_v61 = vld [vmem:[#allocation2 + $0x228] sm:$0xff]  ;;  %v209_v25 = vld [vmem:[#allocation2 + $0x4e0] sm:$0xff] }
 0x22e   :  { %2166 = vmatpush1.bf16.msra.mxu0 %v471_v62  ;;  %1995 = vmatprep.subr.bf16.mxu1 %v640_v63  ;;  %v729_v62 = vunpack.c.h.s8.bf16 %v189_v54  ;;  %v571_v63 = vunpack.c.h.s8.bf16 %v111_v42  ;;  %v582_v1 = vunpack.c.l.s8.bf16 %v122_v61  ;;  %v592_v15 = vunpack.c.h.s8.bf16 %v122_v61  ;;  %v250_v61 = vld [vmem:[#allocation2 + $0x628] sm:$0xff] }
 0x22f   :  { %2167 = vmatprep.subr.bf16.mxu0 %v482_v0  ;;  %v740_v0 = vunpack.c.l.s8.bf16 %v200_v58 }
 0x231   :  { %1996 = vmatpush1.bf16.msra.mxu1 %v639_v3  ;;  %v121_v3 = vld [vmem:[#allocation2 + $0x220] sm:$0xff] }
 0x232   :  { %2168 = vmatpush1.bf16.msra.mxu0 %v481_v4  ;;  %1997 = vmatprep.subr.bf16.mxu1 %v650_v48  ;;  %v739_v4 = vunpack.c.l.s8.bf16 %v199_v2  ;;  %v581_v48 = vunpack.c.l.s8.bf16 %v121_v3 }
 0x233   :  { %2169 = vmatprep.subr.bf16.mxu0 %v492_v5  ;;  %v750_v5 = vunpack.c.h.s8.bf16 %v200_v58 }
 0x235   :  { %1998 = vmatpush1.bf16.msra.mxu1 %v649_v6  ;;  %v132_v6 = vld [vmem:[#allocation2 + $0x278] sm:$0xff] }
 0x236   :  { %2170 = vmatpush1.bf16.msra.mxu0 %v491_v9  ;;  %1999 = vmatprep.subr.bf16.mxu1 %v660_v49  ;;  %v749_v9 = vunpack.c.h.s8.bf16 %v199_v2  ;;  %v591_v49 = vunpack.c.h.s8.bf16 %v121_v3  ;;  %v602_v10 = vunpack.c.l.s8.bf16 %v132_v6  ;;  %v612_v24 = vunpack.c.h.s8.bf16 %v132_v6  ;;  %v249_v3 = vld [vmem:[#allocation2 + $0x620] sm:$0xff]  ;;  %v260_v6 = vld [vmem:[#allocation2 + $0x678] sm:$0xff] }
 0x237   :  { %2171 = vmatprep.subr.bf16.mxu0 %v502_v60  ;;  %v760_v60 = vunpack.c.l.s8.bf16 %v210_v51 }
 0x239   :  { %2000 = vmatpush1.bf16.msra.mxu1 %v659_v12  ;;  %v131_v12 = vld [vmem:[#allocation2 + $0x270] sm:$0xff] }
 0x23a   :  { %2172 = vmatpush1.bf16.msra.mxu0 %v501_v13  ;;  %2001 = vmatprep.subr.bf16.mxu1 %v670_v14  ;;  %v759_v13 = vunpack.c.l.s8.bf16 %v209_v25  ;;  %v601_v14 = vunpack.c.l.s8.bf16 %v131_v12 }
 0x23b   :  { %2173 = vmatprep.subr.bf16.mxu0 %v512_v17  ;;  %v770_v17 = vunpack.c.h.s8.bf16 %v210_v51 }
 0x23d   :  { %2002 = vmatpush1.bf16.msra.mxu1 %v669_v20  ;;  %v142_v20 = vld [vmem:[#allocation2 + $0x2c8] sm:$0xff] }
 0x23e   :  { %2174 = vmatpush1.bf16.msra.mxu0 %v511_v21  ;;  %2003 = vmatprep.subr.bf16.mxu1 %v680_v22  ;;  %v769_v21 = vunpack.c.h.s8.bf16 %v209_v25  ;;  %v611_v22 = vunpack.c.h.s8.bf16 %v131_v12  ;;  %v622_v53 = vunpack.c.l.s8.bf16 %v142_v20  ;;  %v632_v59 = vunpack.c.h.s8.bf16 %v142_v20  ;;  %v259_v12 = vld [vmem:[#allocation2 + $0x670] sm:$0xff]  ;;  %v270_v20 = vld [vmem:[#allocation2 + $0x6c8] sm:$0xff] }
 0x23f   :  { %2175 = vmatprep.subr.bf16.mxu0 %v522_v23  ;;  %v780_v23 = vunpack.c.l.s8.bf16 %v220_v19 }
 0x241   :  { %2004 = vmatpush1.bf16.msra.mxu1 %v679_v44  ;;  %v141_v44 = vld [vmem:[#allocation2 + $0x2c0] sm:$0xff] }
 0x242   :  { %2176 = vmatpush1.bf16.msra.mxu0 %v521_v27  ;;  %2005 = vmatprep.subr.bf16.mxu1 %v690_v28  ;;  %v779_v27 = vunpack.c.l.s8.bf16 %v219_v26  ;;  %v621_v28 = vunpack.c.l.s8.bf16 %v141_v44 }
 0x243   :  { %2177 = vmatprep.subr.bf16.mxu0 %v532_v29  ;;  %v790_v29 = vunpack.c.h.s8.bf16 %v220_v19 }
 0x245   :  { %2006 = vmatpush1.bf16.msra.mxu1 %v689_v31  ;;  %v152_v31 = vld [vmem:[#allocation2 + $0x318] sm:$0xff] }
 0x246   :  { %2178 = vmatpush1.bf16.msra.mxu0 %v531_v32  ;;  %2007 = vmatprep.subr.bf16.mxu1 %v700_v33  ;;  %v3169_v32 = vld [vmem:[%s3329_s0 + $0x8] ss:$40 sps:$4 sm:$0xff]   ;;  %v789_v33 = vunpack.c.h.s8.bf16 %v219_v26  ;;  %v642_v36 = vunpack.c.l.s8.bf16 %v152_v31  ;;  %v652_v46 = vunpack.c.h.s8.bf16 %v152_v31  ;;  %v280_v31 = vld [vmem:[#allocation2 + $0x718] sm:$0xff] }
 0x247   :  { %2179 = vmatprep.subr.bf16.mxu0 %v542_v34  ;;  %v631_v34 = vunpack.c.h.s8.bf16 %v141_v44  ;;  %v269_v44 = vld [vmem:[#allocation2 + $0x6c0] sm:$0xff] }
 0x249   :  { %2008 = vmatpush1.bf16.msra.mxu1 %v699_v37  ;;  %v229_v37 = vld [vmem:[#allocation2 + $0x580] sm:$0xff] }
 0x24a   :  { %2180 = vmatpush1.bf16.msra.mxu0 %v541_v38  ;;  %2009 = vmatprep.subr.bf16.mxu1 %v710_v43  ;;  %v151_v38 = vld [vmem:[#allocation2 + $0x310] sm:$0xff] }
 0x24b   :  { %2181 = vmatprep.subr.bf16.mxu0 %v552_v39  ;;  %v3176_v43 = vld [vmem:[%s3329_s0 + $0x14] ss:$40 sps:$4 sm:$0xff]   ;;  %v641_v39 = vunpack.c.l.s8.bf16 %v151_v38 }
 0x24d   :  { %2010 = vmatpush1.bf16.msra.mxu1 %v709_v47  ;;  %v240_v47 = vld [vmem:[#allocation2 + $0x5d8] sm:$0xff] }
 0x24e   :  { %2182 = vmatpush1.bf16.msra.mxu0 %v551_v40  ;;  %2011 = vmatprep.subr.bf16.mxu1 %v720_v50  ;;  %v162_v40 = vld [vmem:[#allocation2 + $0x368] sm:$0xff]  ;;  %v809_v50 = vunpack.c.h.s8.bf16 %v229_v37  ;;  %v820_v54 = vunpack.c.l.s8.bf16 %v240_v47 }
 0x24f   :  { %2183 = vmatprep.subr.bf16.mxu0 %v562_v52  ;;  %v651_v52 = vunpack.c.h.s8.bf16 %v151_v38  ;;  %v662_v42 = vunpack.c.l.s8.bf16 %v162_v40  ;;  %v672_v58 = vunpack.c.h.s8.bf16 %v162_v40  ;;  %v279_v38 = vld [vmem:[#allocation2 + $0x710] sm:$0xff]  ;;  %v290_v40 = vld [vmem:[#allocation2 + $0x768] sm:$0xff] }
 0x251   :  { %2012 = vmatpush1.bf16.msra.mxu1 %v719_v55  ;;  %v239_v55 = vld [vmem:[#allocation2 + $0x5d0] sm:$0xff] }
 0x252   :  { %2184 = vmatpush1.bf16.msra.mxu0 %v561_v56  ;;  %2013 = vmatprep.subr.bf16.mxu1 %v730_v45  ;;  %v819_v56 = vunpack.c.l.s8.bf16 %v239_v55 }
 0x253   :  { %2185 = vmatprep.subr.bf16.mxu0 %v572_v57  ;;  %v830_v57 = vunpack.c.h.s8.bf16 %v240_v47 }
 0x255   :  { %2014 = vmatpush1.bf16.msra.mxu1 %v729_v62  ;;  %v172_v62 = vld [vmem:[#allocation2 + $0x3b8] sm:$0xff] }
 0x256   :  { %2186 = vmatpush1.bf16.msra.mxu0 %v571_v63  ;;  %2015 = vmatprep.subr.bf16.mxu1 %v740_v0  ;;  %v829_v63 = vunpack.c.h.s8.bf16 %v239_v55  ;;  %v682_v2 = vunpack.c.l.s8.bf16 %v172_v62  ;;  %v692_v51 = vunpack.c.h.s8.bf16 %v172_v62  ;;  %v300_v62 = vld [vmem:[#allocation2 + $0x7b8] sm:$0xff] }
 0x257   :  { %2187 = vmatprep.subr.bf16.mxu0 %v582_v1  ;;  %v840_v1 = vunpack.c.l.s8.bf16 %v250_v61 }
 0x259   :  { %2016 = vmatpush1.bf16.msra.mxu1 %v739_v4  ;;  %v171_v4 = vld [vmem:[#allocation2 + $0x3b0] sm:$0xff] }
 0x25a   :  { %2188 = vmatpush1.bf16.msra.mxu0 %v581_v48  ;;  %2017 = vmatprep.subr.bf16.mxu1 %v750_v5  ;;  %v839_v48 = vunpack.c.l.s8.bf16 %v249_v3  ;;  %v681_v5 = vunpack.c.l.s8.bf16 %v171_v4 }
 0x25b   :  { %2189 = vmatprep.subr.bf16.mxu0 %v592_v15  ;;  %v850_v15 = vunpack.c.h.s8.bf16 %v250_v61 }
 0x25d   :  { %2018 = vmatpush1.bf16.msra.mxu1 %v749_v9  ;;  %v182_v9 = vld [vmem:[#allocation2 + $0x408] sm:$0xff] }
 0x25e   :  { %2190 = vmatpush1.bf16.msra.mxu0 %v591_v49  ;;  %2019 = vmatprep.subr.bf16.mxu1 %v760_v60  ;;  %v849_v49 = vunpack.c.h.s8.bf16 %v249_v3  ;;  %v691_v60 = vunpack.c.h.s8.bf16 %v171_v4  ;;  %v702_v25 = vunpack.c.l.s8.bf16 %v182_v9  ;;  %v712_v19 = vunpack.c.h.s8.bf16 %v182_v9  ;;  %v299_v4 = vld [vmem:[#allocation2 + $0x7b0] sm:$0xff]  ;;  %v310_v9 = vld [vmem:[#allocation2 + $0x808] sm:$0xff] }
 0x25f   :  { %2191 = vmatprep.subr.bf16.mxu0 %v602_v10  ;;  %v860_v10 = vunpack.c.l.s8.bf16 %v260_v6 }
 0x261   :  { %2020 = vmatpush1.bf16.msra.mxu1 %v759_v13  ;;  %v181_v13 = vld [vmem:[#allocation2 + $0x400] sm:$0xff] }
 0x262   :  { %2192 = vmatpush1.bf16.msra.mxu0 %v601_v14  ;;  %2021 = vmatprep.subr.bf16.mxu1 %v770_v17  ;;  %v859_v14 = vunpack.c.l.s8.bf16 %v259_v12  ;;  %v701_v17 = vunpack.c.l.s8.bf16 %v181_v13 }
 0x263   :  { %2193 = vmatprep.subr.bf16.mxu0 %v612_v24  ;;  %v870_v24 = vunpack.c.h.s8.bf16 %v260_v6 }
 0x265   :  { %2022 = vmatpush1.bf16.msra.mxu1 %v769_v21  ;;  %v192_v21 = vld [vmem:[#allocation2 + $0x458] sm:$0xff] }
 0x266   :  { %2194 = vmatpush1.bf16.msra.mxu0 %v611_v22  ;;  %2034 = vmatprep.subr.bf16.mxu1 %v780_v23  ;;  %v869_v22 = vunpack.c.h.s8.bf16 %v259_v12  ;;  %v711_v23 = vunpack.c.h.s8.bf16 %v181_v13  ;;  %v722_v26 = vunpack.c.l.s8.bf16 %v192_v21  ;;  %v732_v30 = vunpack.c.h.s8.bf16 %v192_v21 }
 0x267   :  { %2206 = vmatprep.subr.bf16.mxu0 %v622_v53  ;;  %v880_v53 = vunpack.c.l.s8.bf16 %v270_v20  ;;  %v960_v12 = vunpack.c.l.s8.bf16 %v310_v9 }
 0x268   :  { %2024 = vmatmul.mubr.bf16.vlgmr.msra.gmra.mrb[8].mxu1 %v3169_v32 }
 0x269   :  { %2196 = vmatmul.mubr.bf16.vlgmr.msra.gmra.mrb[8].mxu0 %v3156_v8  ;;  %2035 = vmatpush1.bf16.msra.mxu1 %v779_v27  ;;  %v799_v8 = vunpack.c.l.s8.bf16 %v229_v37  ;;  %v191_v27 = vld [vmem:[#allocation2 + $0x450] sm:$0xff] }
 0x26a   :  { %2207 = vmatpush1.bf16.msra.mxu0 %v621_v28  ;;  %2036 = vmatprep.subr.bf16.mxu1 %v790_v29  ;;  %v879_v28 = vunpack.c.l.s8.bf16 %v269_v44  ;;  %v721_v29 = vunpack.c.l.s8.bf16 %v191_v27 }
 0x26b   :  { %2208 = vmatprep.subr.bf16.mxu0 %v632_v59  ;;  %2066 = vmatprep.mubr.bf16.mxu1 %v3176_v43  ;;  %v890_v59 = vunpack.c.h.s8.bf16 %v270_v20  ;;  %v970_v20 = vunpack.c.h.s8.bf16 %v310_v9 }
 0x26c   :  { %2238 = vmatprep.mubr.bf16.mxu0 %v3162_v18  ;;  %v161_v18 = vld [vmem:[#allocation2 + $0x360] sm:$0xff] }
 0x26d   :  { %2037 = vmatpush1.bf16.msra.mxu1 %v789_v33  ;;  %v661_v45 = vunpack.c.l.s8.bf16 %v161_v18  ;;  %v671_v0 = vunpack.c.h.s8.bf16 %v161_v18  ;;  %v202_v33 = vld [vmem:[#allocation2 + $0x4a8] sm:$0xff]  ;;  %v289_v18 = vld [vmem:[#allocation2 + $0x760] sm:$0xff] }
 0x26e   :  { %2209 = vmatpush1.bf16.msra.mxu0 %v631_v34  ;;  %2038 = vmatprep.subr.bf16.mxu1 %v800_v35  ;;  %v889_v34 = vunpack.c.h.s8.bf16 %v269_v44  ;;  %v731_v35 = vunpack.c.h.s8.bf16 %v191_v27  ;;  %v742_v37 = vunpack.c.l.s8.bf16 %v202_v33  ;;  %v752_v47 = vunpack.c.h.s8.bf16 %v202_v33 }
 0x26f   :  { %2210 = vmatprep.subr.bf16.mxu0 %v642_v36  ;;  %v900_v36 = vunpack.c.l.s8.bf16 %v280_v31 }
 0x271   :  { %2039 = vmatpush1.bf16.msra.mxu1 %v799_v8  ;;  %v201_v8 = vld [vmem:[#allocation2 + $0x4a0] sm:$0xff] }
 0x272   :  { %2211 = vmatpush1.bf16.msra.mxu0 %v641_v39  ;;  %2040 = vmatprep.subr.bf16.mxu1 %v810_v41  ;;  %v899_v39 = vunpack.c.l.s8.bf16 %v279_v38  ;;  %v741_v41 = vunpack.c.l.s8.bf16 %v201_v8 }
 0x273   :  { %2212 = vmatprep.subr.bf16.mxu0 %v652_v46  ;;  %v910_v46 = vunpack.c.h.s8.bf16 %v280_v31  ;;  %v2396_v31 = vsub.s32 3, %v3091_v7 }
 0x275   :  { %2041 = vmatpush1.bf16.msra.mxu1 %v809_v50  ;;  %v212_v50 = vld [vmem:[#allocation2 + $0x4f8] sm:$0xff] }
 0x276   :  { %2213 = vmatpush1.bf16.msra.mxu0 %v651_v52  ;;  %2042 = vmatprep.subr.bf16.mxu1 %v820_v54  ;;  %v909_v52 = vunpack.c.h.s8.bf16 %v279_v38  ;;  %v751_v54 = vunpack.c.h.s8.bf16 %v201_v8  ;;  %v762_v55 = vunpack.c.l.s8.bf16 %v212_v50  ;;  %v772_v61 = vunpack.c.h.s8.bf16 %v212_v50 }
 0x277   :  { %2214 = vmatprep.subr.bf16.mxu0 %v662_v42  ;;  %v920_v42 = vunpack.c.l.s8.bf16 %v290_v40 }
 0x279   :  { %2043 = vmatpush1.bf16.msra.mxu1 %v819_v56  ;;  %v211_v56 = vld [vmem:[#allocation2 + $0x4f0] sm:$0xff] }
 0x27a   :  { %2215 = vmatpush1.bf16.msra.mxu0 %v661_v45  ;;  %2044 = vmatprep.subr.bf16.mxu1 %v830_v57  ;;  %v919_v45 = vunpack.c.l.s8.bf16 %v289_v18  ;;  %v761_v57 = vunpack.c.l.s8.bf16 %v211_v56 }
 0x27b   :  { %2216 = vmatprep.subr.bf16.mxu0 %v672_v58  ;;  %v930_v58 = vunpack.c.h.s8.bf16 %v290_v40 }
 0x27d   :  { %2045 = vmatpush1.bf16.msra.mxu1 %v829_v63  ;;  %v222_v63 = vld [vmem:[#allocation2 + $0x548] sm:$0xff] }
 0x27e   :  { %2217 = vmatpush1.bf16.msra.mxu0 %v671_v0  ;;  %2046 = vmatprep.subr.bf16.mxu1 %v840_v1  ;;  %v929_v0 = vunpack.c.h.s8.bf16 %v289_v18  ;;  %v771_v1 = vunpack.c.h.s8.bf16 %v211_v56  ;;  %v782_v3 = vunpack.c.l.s8.bf16 %v222_v63  ;;  %v792_v6 = vunpack.c.h.s8.bf16 %v222_v63 }
 0x27f   :  { %2218 = vmatprep.subr.bf16.mxu0 %v682_v2  ;;  %v940_v2 = vunpack.c.l.s8.bf16 %v300_v62 }
 0x281   :  { %2047 = vmatpush1.bf16.msra.mxu1 %v839_v48  ;;  %v221_v48 = vld [vmem:[#allocation2 + $0x540] sm:$0xff] }
 0x282   :  { %2219 = vmatpush1.bf16.msra.mxu0 %v681_v5  ;;  %2048 = vmatprep.subr.bf16.mxu1 %v850_v15  ;;  %v939_v5 = vunpack.c.l.s8.bf16 %v299_v4  ;;  %v781_v15 = vunpack.c.l.s8.bf16 %v221_v48 }
 0x283   :  { %2220 = vmatprep.subr.bf16.mxu0 %v692_v51  ;;  %v950_v51 = vunpack.c.h.s8.bf16 %v300_v62 }
 0x285   :  { %2049 = vmatpush1.bf16.msra.mxu1 %v849_v49  ;;  %v232_v49 = vld [vmem:[#allocation2 + $0x598] sm:$0xff] }
 0x286   :  { %2221 = vmatpush1.bf16.msra.mxu0 %v691_v60  ;;  %2050 = vmatprep.subr.bf16.mxu1 %v860_v10  ;;  %v3183_v60 = vld [vmem:[%s3329_s0 + $0x10] ss:$40 sps:$4 sm:$0xff]   ;;  %v949_v10 = vunpack.c.h.s8.bf16 %v299_v4  ;;  %v802_v13 = vunpack.c.l.s8.bf16 %v232_v49  ;;  %v812_v21 = vunpack.c.h.s8.bf16 %v232_v49 }
 0x287   :  { %2222 = vmatprep.subr.bf16.mxu0 %v702_v25  ;;  %v791_v25 = vunpack.c.h.s8.bf16 %v221_v48  ;;  %v340_v48 = vld [vmem:[#allocation2 + $0x8f8] sm:$0xff] }
 0x289   :  { %2051 = vmatpush1.bf16.msra.mxu1 %v859_v14  ;;  %v309_v14 = vld [vmem:[#allocation2 + $0x800] sm:$0xff] }
 0x28a   :  { %2223 = vmatpush1.bf16.msra.mxu0 %v701_v17  ;;  %2052 = vmatprep.subr.bf16.mxu1 %v870_v24  ;;  %v231_v17 = vld [vmem:[#allocation2 + $0x590] sm:$0xff]  ;;  %v3190_v24 = vld [vmem:[%s3329_s0 + $0x1c] ss:$40 sps:$4 sm:$0xff]  }
 0x28b   :  { %2224 = vmatprep.subr.bf16.mxu0 %v712_v19  ;;  %v801_v19 = vunpack.c.l.s8.bf16 %v231_v17 }
 0x28d   :  { %2053 = vmatpush1.bf16.msra.mxu1 %v869_v22  ;;  %v320_v22 = vld [vmem:[#allocation2 + $0x858] sm:$0xff] }
 0x28e   :  { %2225 = vmatpush1.bf16.msra.mxu0 %v711_v23  ;;  %2054 = vmatprep.subr.bf16.mxu1 %v880_v53  ;;  %v242_v23 = vld [vmem:[#allocation2 + $0x5e8] sm:$0xff]  ;;  %v969_v53 = vunpack.c.h.s8.bf16 %v309_v14  ;;  %v980_v44 = vunpack.c.l.s8.bf16 %v320_v22  ;;  %v990_v33 = vunpack.c.h.s8.bf16 %v320_v22 }
 0x28f   :  { %2226 = vmatprep.subr.bf16.mxu0 %v722_v26  ;;  %v811_v26 = vunpack.c.h.s8.bf16 %v231_v17  ;;  %v822_v27 = vunpack.c.l.s8.bf16 %v242_v23  ;;  %v339_v17 = vld [vmem:[#allocation2 + $0x8f0] sm:$0xff] }
 0x291   :  { %2055 = vmatpush1.bf16.msra.mxu1 %v879_v28  ;;  %v319_v28 = vld [vmem:[#allocation2 + $0x850] sm:$0xff] }
 0x292   :  { %2227 = vmatpush1.bf16.msra.mxu0 %v721_v29  ;;  %2056 = vmatprep.subr.bf16.mxu1 %v890_v59  ;;  %v2392_v29 = vsub.s32 2, %v3091_v7  ;;  %v979_v59 = vunpack.c.l.s8.bf16 %v319_v28 }
 0x293   :  { %2228 = vmatprep.subr.bf16.mxu0 %v732_v30 }
 0x295   :  { %2057 = vmatpush1.bf16.msra.mxu1 %v889_v34  ;;  %v832_v34 = vunpack.c.h.s8.bf16 %v242_v23  ;;  %v1019_v23 = vunpack.c.l.s8.bf16 %v339_v17 }
 0x296   :  { %2229 = vmatpush1.bf16.msra.mxu0 %v731_v35  ;;  %2058 = vmatprep.subr.bf16.mxu1 %v900_v36  ;;  %v330_v35 = vld [vmem:[#allocation2 + $0x8a8] sm:$0xff]  ;;  %v252_v36 = vld [vmem:[#allocation2 + $0x638] sm:$0xff] }
 0x297   :  { %2230 = vmatprep.subr.bf16.mxu0 %v742_v37  ;;  %v3196_v37 = vld [vmem:[#allocation4] sm:$0xff]  ;;  %v1000_v40 = vunpack.c.l.s8.bf16 %v330_v35  ;;  %v842_v50 = vunpack.c.l.s8.bf16 %v252_v36 }
 0x298   :  { %v2393_v38 = vrot.slane %v3196_v37, %v2392_v29  ;;  %v2397_v8 = vrot.slane %v3196_v37, %v2396_v31 }
 0x299   :  { %2059 = vmatpush1.bf16.msra.mxu1 %v899_v39  ;;  %v989_v39 = vunpack.c.h.s8.bf16 %v319_v28  ;;  %v272_v28 = vld [vmem:[#allocation2 + $0x6d8] sm:$0xff] }
 0x29a   :  { %2231 = vmatpush1.bf16.msra.mxu0 %v741_v41  ;;  %2060 = vmatprep.subr.bf16.mxu1 %v910_v46  ;;  %v3203_v46 = vld [vmem:[%s3332_s3] sm:$0xff] }
 0x29b   :  { %2232 = vmatprep.subr.bf16.mxu0 %v752_v47  ;;  %v2467_v47 = vrot.slane %v3203_v46, %v2392_v29 }
 0x29d   :  { %2061 = vmatpush1.bf16.msra.mxu1 %v909_v52  ;;  %v329_v52 = vld [vmem:[#allocation2 + $0x8a0] sm:$0xff] }
 0x29e   :  { %2233 = vmatpush1.bf16.msra.mxu0 %v751_v54  ;;  %2062 = vmatprep.subr.bf16.mxu1 %v920_v42  ;;  %v251_v54 = vld [vmem:[#allocation2 + $0x630] sm:$0xff]  ;;  %v1009_v49 = vunpack.c.h.s8.bf16 %v329_v52 }
 0x29f   :  { %2234 = vmatprep.subr.bf16.mxu0 %v762_v55  ;;  %v2471_v55 = vrot.slane %v3203_v46, %v2396_v31  ;;  %v349_v31 = vld [vmem:[#allocation2 + $0x940] sm:$0xff] }
 0x2a1   :  { %2063 = vmatpush1.bf16.msra.mxu1 %v919_v45 }
 0x2a2   :  { %2235 = vmatpush1.bf16.msra.mxu0 %v761_v57  ;;  %2064 = vmatprep.subr.bf16.mxu1 %v930_v58  ;;  %v999_v58 = vunpack.c.l.s8.bf16 %v329_v52 }
 0x2a3   :  { %2236 = vmatprep.subr.bf16.mxu0 %v772_v61  ;;  %v841_v61 = vunpack.c.l.s8.bf16 %v251_v54 }
 0x2a5   :  { %2065 = vmatpush1.bf16.msra.mxu1 %v929_v0 }
 0x2a6   :  { %2237 = vmatpush1.bf16.msra.mxu0 %v771_v1  ;;  %2077 = vmatprep.subr.bf16.mxu1 %v940_v2  ;;  %v1010_v1 = vunpack.c.h.s8.bf16 %v330_v35  ;;  %v852_v2 = vunpack.c.h.s8.bf16 %v252_v36 }
 0x2a7   :  { %2249 = vmatprep.subr.bf16.mxu0 %v782_v3 }
 0x2a8   :  { %2067 = vmatmul.mubr.bf16.vlgmr.msra.gmra.mrb[8].mxu1 %v3183_v60 }
 0x2a9   :  { %2239 = vmatmul.mubr.bf16.vlgmr.msra.gmra.mrb[8].mxu0 %v3169_v32  ;;  %2078 = vmatpush1.bf16.msra.mxu1 %v939_v5  ;;  %v959_v32 = vunpack.c.l.s8.bf16 %v309_v14  ;;  %v262_v5 = vld [vmem:[#allocation2 + $0x688] sm:$0xff] }
 0x2aa   :  { %2250 = vmatpush1.bf16.msra.mxu0 %v781_v15  ;;  %2079 = vmatprep.subr.bf16.mxu1 %v950_v51  ;;  %v862_v14 = vunpack.c.l.s8.bf16 %v262_v5 }
 0x2ab   :  { %2251 = vmatprep.subr.bf16.mxu0 %v792_v6  ;;  %2109 = vmatprep.mubr.bf16.mxu1 %v3190_v24 }
 0x2ac   :  { %2281 = vmatprep.mubr.bf16.mxu0 %v3176_v43  ;;  %v241_v43 = vld [vmem:[#allocation2 + $0x5e0] sm:$0xff] }
 0x2ad   :  { %2080 = vmatpush1.bf16.msra.mxu1 %v949_v10  ;;  %v821_v30 = vunpack.c.l.s8.bf16 %v241_v43  ;;  %v831_v41 = vunpack.c.h.s8.bf16 %v241_v43  ;;  %v851_v10 = vunpack.c.h.s8.bf16 %v251_v54  ;;  %v1029_v43 = vunpack.c.h.s8.bf16 %v339_v17 }
 0x2ae   :  { %2252 = vmatpush1.bf16.msra.mxu0 %v791_v25  ;;  %2081 = vmatprep.subr.bf16.mxu1 %v960_v12 }
 0x2af   :  { %2253 = vmatprep.subr.bf16.mxu0 %v802_v13  ;;  %v1020_v13 = vunpack.c.l.s8.bf16 %v340_v48 }
 0x2b1   :  { %2082 = vmatpush1.bf16.msra.mxu1 %v959_v32  ;;  %v261_v32 = vld [vmem:[#allocation2 + $0x680] sm:$0xff] }
 0x2b2   :  { %2254 = vmatpush1.bf16.msra.mxu0 %v801_v19  ;;  %2083 = vmatprep.subr.bf16.mxu1 %v970_v20  ;;  %v871_v29 = vunpack.c.h.s8.bf16 %v261_v32 }
 0x2b3   :  { %2255 = vmatprep.subr.bf16.mxu0 %v812_v21 }
 0x2b5   :  { %2084 = vmatpush1.bf16.msra.mxu1 %v969_v53  ;;  %v861_v53 = vunpack.c.l.s8.bf16 %v261_v32 }
 0x2b6   :  { %2256 = vmatpush1.bf16.msra.mxu0 %v811_v26  ;;  %2085 = vmatprep.subr.bf16.mxu1 %v980_v44  ;;  %v1030_v26 = vunpack.c.h.s8.bf16 %v340_v48  ;;  %v872_v44 = vunpack.c.h.s8.bf16 %v262_v5  ;;  %v292_v48 = vld [vmem:[#allocation2 + $0x778] sm:$0xff] }
 0x2b7   :  { %2257 = vmatprep.subr.bf16.mxu0 %v822_v27  ;;  %v350_v27 = vld [vmem:[#allocation2 + $0x948] sm:$0xff] }
 0x2b9   :  { %2086 = vmatpush1.bf16.msra.mxu1 %v979_v59  ;;  %v1040_v59 = vunpack.c.l.s8.bf16 %v350_v27 }
 0x2ba   :  { %2258 = vmatpush1.bf16.msra.mxu0 %v821_v30  ;;  %2087 = vmatprep.subr.bf16.mxu1 %v990_v33  ;;  %v882_v30 = vunpack.c.l.s8.bf16 %v272_v28  ;;  %v271_v33 = vld [vmem:[#allocation2 + $0x6d0] sm:$0xff] }
 0x2bb   :  { %2259 = vmatprep.subr.bf16.mxu0 %v832_v34  ;;  %v1724_v42 = vpop.f32.mrb[4].mxu1  ;;  %v1039_v34 = vunpack.c.l.s8.bf16 %v349_v31  ;;  %v881_v35 = vunpack.c.l.s8.bf16 %v271_v33 }
 0x2bc   :  { %v2434_v18 = vmul.f32 %v2393_v38, %v1724_v42  ;;  %v1726_v56 = vpop.f32.mrb[5].mxu1 }
 0x2bd   :  { %v2435_v45 = vmul.f32 %v2397_v8, %v1726_v56  ;;  %v1728_v57 = vpop.f32.mrb[6].mxu1  ;;  %2088 = vmatpush1.bf16.msra.mxu1 %v989_v39 }
 0x2be   :  { %2260 = vmatpush1.bf16.msra.mxu0 %v831_v41  ;;  %v3207_v62 = vadd.f32 %v2467_v47, %v2434_v18  ;;  %v2444_v63 = vmul.f32 %v2393_v38, %v1728_v57  ;;  %v1730_v0 = vpop.f32.mrb[7].mxu1  ;;  %2089 = vmatprep.subr.bf16.mxu1 %v1000_v40  ;;  %v1050_v38 = vunpack.c.h.s8.bf16 %v350_v27  ;;  %v282_v40 = vld [vmem:[#allocation2 + $0x728] sm:$0xff]  ;;  %v891_v18 = vunpack.c.h.s8.bf16 %v271_v33 }
 0x2bf   :  { %2261 = vmatprep.subr.bf16.mxu0 %v842_v50  ;;  %v3209_v3 = vadd.f32 %v2471_v55, %v2435_v45  ;;  %v2445_v4 = vmul.f32 %v2397_v8, %v1730_v0  ;;  %v892_v8 = vunpack.c.h.s8.bf16 %v272_v28  ;;  %v902_v57 = vunpack.c.l.s8.bf16 %v282_v40  ;;  %v390_v33 = vld [vmem:[#allocation2 + $0xa88] sm:$0xff] }
 0x2c0   :  { %v2528_v15 = vsub.f32 0.0, %v3207_v62  ;;  %v3212_v51 = vadd.f32 %v2467_v47, %v2444_v63  ;;  %v360_v47 = vld [vmem:[#allocation2 + $0x998] sm:$0xff] }
 0x2c1   :  { %v2529_v6 = vsub.f32 0.0, %v3209_v3  ;;  %v3215_v9 = vadd.f32 %v2471_v55, %v2445_v4  ;;  %2090 = vmatpush1.bf16.msra.mxu1 %v999_v58  ;;  %v1049_v55 = vunpack.c.h.s8.bf16 %v349_v31  ;;  %v1060_v45 = vunpack.c.l.s8.bf16 %v360_v47  ;;  %v359_v58 = vld [vmem:[#allocation2 + $0x990] sm:$0xff]  ;;  %v370_v4 = vld [vmem:[#allocation2 + $0x9e8] sm:$0xff] }
 0x2c2   :  { %2262 = vmatpush1.bf16.msra.mxu0 %v841_v61  ;;  %v2550_v25 = vmul.f32 1.442695, %v2528_v15  ;;  %v2538_v12 = vsub.f32 0.0, %v3212_v51  ;;  %2091 = vmatprep.subr.bf16.mxu1 %v1010_v1  ;;  %v281_v61 = vld [vmem:[#allocation2 + $0x720] sm:$0xff]  ;;  %v1059_v63 = vunpack.c.l.s8.bf16 %v359_v58  ;;  %v1070_v1 = vunpack.c.h.s8.bf16 %v360_v47  ;;  %v311_v47 = vld [vmem:[#allocation2 + $0x810] sm:$0xff] }
 0x2c3   :  { %2263 = vmatprep.subr.bf16.mxu0 %v852_v2  ;;  %v2552_v19 = vmul.f32 1.442695, %v2529_v6  ;;  %v2539_v20 = vsub.f32 0.0, %v3215_v9  ;;  %v901_v0 = vunpack.c.l.s8.bf16 %v281_v61  ;;  %v912_v2 = vunpack.c.h.s8.bf16 %v282_v40  ;;  %v3245_v40 = vld [vmem:[%s3329_s0 + $0x24] ss:$40 sps:$4 sm:$0xff]  }
 0x2c4   :  { %2817 = vpow2.f32 %v2550_v25  ;;  %v2570_v21 = vmul.f32 1.442695, %v2538_v12  ;;  %v1069_v5 = vunpack.c.h.s8.bf16 %v359_v58  ;;  %v911_v15 = vunpack.c.h.s8.bf16 %v281_v61  ;;  %v291_v25 = vld [vmem:[#allocation2 + $0x770] sm:$0xff] }
 0x2c5   :  { %2819 = vpow2.f32 %v2552_v19  ;;  %v2572_v22 = vmul.f32 1.442695, %v2539_v20  ;;  %2092 = vmatpush1.bf16.msra.mxu1 %v1009_v49  ;;  %v1080_v6 = vunpack.c.l.s8.bf16 %v370_v4  ;;  %v922_v49 = vunpack.c.l.s8.bf16 %v292_v48  ;;  %v399_v58 = vld [vmem:[#allocation2 + $0xad0] sm:$0xff] }
 0x2c6   :  { %2264 = vmatpush1.bf16.msra.mxu0 %v851_v10  ;;  %2821 = vpow2.f32 %v2570_v21  ;;  %2093 = vmatprep.subr.bf16.mxu1 %v1020_v13  ;;  %v369_v10 = vld [vmem:[#allocation2 + $0x9e0] sm:$0xff]  ;;  %v921_v20 = vunpack.c.l.s8.bf16 %v291_v25  ;;  %v2400_v61 = vsub.s32 4, %v3091_v7 }
 0x2c7   :  { %2265 = vmatprep.subr.bf16.mxu0 %v862_v14  ;;  %2823 = vpow2.f32 %v2572_v22  ;;  %v1079_v19 = vunpack.c.l.s8.bf16 %v369_v10 }
 0x2c9   :  { %2094 = vmatpush1.bf16.msra.mxu1 %v1019_v23  ;;  %v1090_v23 = vunpack.c.h.s8.bf16 %v370_v4 }
 0x2ca   :  { %2266 = vmatpush1.bf16.msra.mxu0 %v861_v53  ;;  %2095 = vmatprep.subr.bf16.mxu1 %v1030_v26  ;;  %v932_v53 = vunpack.c.h.s8.bf16 %v292_v48  ;;  %v302_v26 = vld [vmem:[#allocation2 + $0x7c8] sm:$0xff] }
 0x2cb   :  { %2267 = vmatprep.subr.bf16.mxu0 %v872_v44  ;;  %v931_v44 = vunpack.c.h.s8.bf16 %v291_v25  ;;  %v942_v28 = vunpack.c.l.s8.bf16 %v302_v26  ;;  %v952_v31 = vunpack.c.h.s8.bf16 %v302_v26  ;;  %v410_v48 = vld [vmem:[#allocation2 + $0xb28] sm:$0xff]  ;;  %v2475_v25 = vrot.slane %v3203_v46, %v2400_v61 }
 0x2cd   :  { %2096 = vmatpush1.bf16.msra.mxu1 %v1029_v43  ;;  %v379_v43 = vld [vmem:[#allocation2 + $0xa30] sm:$0xff] }
 0x2ce   :  { %2268 = vmatpush1.bf16.msra.mxu0 %v871_v29  ;;  %v2818_v36 = vpop.eup %2817  ;;  %2097 = vmatprep.subr.bf16.mxu1 %v1040_v59  ;;  %v1099_v29 = vunpack.c.l.s8.bf16 %v379_v43 }
 0x2cf   :  { %2269 = vmatprep.subr.bf16.mxu0 %v882_v30  ;;  %v2820_v39 = vpop.eup %2819  ;;  %v2588_v41 = vadd.f32 1.0, %v2818_v36  ;;  %v1109_v36 = vunpack.c.h.s8.bf16 %v379_v43 }
 0x2d0   :  { %v2822_v50 = vpop.eup %2821  ;;  %v2589_v52 = vadd.f32 1.0, %v2820_v39 }
 0x2d1   :  { %v2824_v54 = vpop.eup %2823  ;;  %2825 = vrcp.f32 %v2588_v41  ;;  %v2598_v42 = vadd.f32 1.0, %v2822_v50  ;;  %2098 = vmatpush1.bf16.msra.mxu1 %v1039_v34  ;;  %v312_v34 = vld [vmem:[#allocation2 + $0x818] sm:$0xff]  ;;  %v389_v41 = vld [vmem:[#allocation2 + $0xa80] sm:$0xff]  ;;  %v961_v50 = vunpack.c.l.s8.bf16 %v311_v47 }
 0x2d2   :  { %2270 = vmatpush1.bf16.msra.mxu0 %v881_v35  ;;  %2827 = vrcp.f32 %v2589_v52  ;;  %v2599_v56 = vadd.f32 1.0, %v2824_v54  ;;  %2099 = vmatprep.subr.bf16.mxu1 %v1050_v38  ;;  %v3238_v35 = vld [vmem:[%s3329_s0 + $0x18] ss:$40 sps:$4 sm:$0xff]   ;;  %v962_v39 = vunpack.c.l.s8.bf16 %v312_v34  ;;  %v1130_v52 = vunpack.c.h.s8.bf16 %v390_v33 }
 0x2d3   :  { %2271 = vmatprep.subr.bf16.mxu0 %v892_v8  ;;  %2829 = vrcp.f32 %v2598_v42  ;;  %v1120_v8 = vunpack.c.l.s8.bf16 %v390_v33  ;;  %v972_v54 = vunpack.c.h.s8.bf16 %v312_v34  ;;  %v400_v42 = vld [vmem:[#allocation2 + $0xad8] sm:$0xff] }
 0x2d4   :  { %2831 = vrcp.f32 %v2599_v56  ;;  %v971_v56 = vunpack.c.h.s8.bf16 %v311_v47  ;;  %v419_v47 = vld [vmem:[#allocation2 + $0xb70] sm:$0xff] }
 0x2d5   :  { %2100 = vmatpush1.bf16.msra.mxu1 %v1049_v55  ;;  %v322_v55 = vld [vmem:[#allocation2 + $0x868] sm:$0xff] }
 0x2d6   :  { %2272 = vmatpush1.bf16.msra.mxu0 %v891_v18  ;;  %2101 = vmatprep.subr.bf16.mxu1 %v1060_v45  ;;  %v1129_v18 = vunpack.c.h.s8.bf16 %v389_v41  ;;  %v1140_v45 = vunpack.c.l.s8.bf16 %v400_v42  ;;  %v992_v4 = vunpack.c.h.s8.bf16 %v322_v55 }
 0x2d7   :  { %2273 = vmatprep.subr.bf16.mxu0 %v902_v57  ;;  %v982_v57 = vunpack.c.l.s8.bf16 %v322_v55  ;;  %v1179_v55 = vunpack.c.l.s8.bf16 %v419_v47 }
 0x2d9   :  { %2102 = vmatpush1.bf16.msra.mxu1 %v1059_v63  ;;  %v1139_v63 = vunpack.c.l.s8.bf16 %v399_v58 }
 0x2da   :  { %2274 = vmatpush1.bf16.msra.mxu0 %v901_v0  ;;  %2103 = vmatprep.subr.bf16.mxu1 %v1070_v1  ;;  %v2404_v1 = vsub.s32 5, %v3091_v7 }
 0x2db   :  { %2275 = vmatprep.subr.bf16.mxu0 %v912_v2  ;;  %v2826_v12 = vpop.eup %2825  ;;  %v1150_v2 = vunpack.c.h.s8.bf16 %v400_v42 }
 0x2dc   :  { %v2828_v13 = vpop.eup %2827  ;;  %v2648_v14 = vmul.f32 %v2826_v12, %v3207_v62  ;;  %v1160_v12 = vunpack.c.l.s8.bf16 %v410_v48 }
 0x2dd   :  { %v2830_v17 = vpop.eup %2829  ;;  %v2649_v32 = vmul.f32 %v2828_v13, %v3209_v3  ;;  %2104 = vmatpush1.bf16.msra.mxu1 %v1069_v5  ;;  %v380_v3 = vld [vmem:[#allocation2 + $0xa38] sm:$0xff] }
 0x2de   :  { %2276 = vmatpush1.bf16.msra.mxu0 %v911_v15  ;;  %v2832_v21 = vpop.eup %2831  ;;  %2668 = vst [vmem:[%s3333_s4 + $0x10] sm:$0xff] %v2648_v14  ;;  %v2658_v22 = vmul.f32 %v2830_v17, %v3212_v51  ;;  %2105 = vmatprep.subr.bf16.mxu1 %v1080_v6  ;;  %v1089_v51 = vunpack.c.h.s8.bf16 %v369_v10  ;;  %v1100_v27 = vunpack.c.l.s8.bf16 %v380_v3  ;;  %v1110_v30 = vunpack.c.h.s8.bf16 %v380_v3  ;;  %v332_v5 = vld [vmem:[#allocation2 + $0x8b8] sm:$0xff]  ;;  %v409_v14 = vld [vmem:[#allocation2 + $0xb20] sm:$0xff]  ;;  %v331_v17 = vld [vmem:[#allocation2 + $0x8b0] sm:$0xff] }
 0x2df   :  { %2277 = vmatprep.subr.bf16.mxu0 %v922_v49  ;;  %2669 = vst [vmem:[%s3333_s4 + $0x18] sm:$0xff] %v2649_v32  ;;  %v2659_v62 = vmul.f32 %v2832_v21, %v3215_v9  ;;  %v301_v9 = vld [vmem:[#allocation2 + $0x7c0] sm:$0xff]  ;;  %v2401_v15 = vrot.slane %v3196_v37, %v2400_v61  ;;  %v2405_v6 = vrot.slane %v3196_v37, %v2404_v1  ;;  %v1149_v49 = vunpack.c.h.s8.bf16 %v399_v58  ;;  %v352_v58 = vld [vmem:[#allocation2 + $0x958] sm:$0xff] }
 0x2e0   :  { %2678 = vst [vmem:[%s3333_s4 + $0x60] sm:$0xff] %v2658_v22  ;;  %v941_v59 = vunpack.c.l.s8.bf16 %v301_v9  ;;  %v951_v38 = vunpack.c.h.s8.bf16 %v301_v9  ;;  %v1002_v13 = vunpack.c.l.s8.bf16 %v332_v5  ;;  %v420_v9 = vld [vmem:[#allocation2 + $0xb78] sm:$0xff]  ;;  %v1169_v34 = vunpack.c.h.s8.bf16 %v409_v14 }
 0x2e1   :  { %2679 = vst [vmem:[%s3333_s4 + $0x68] sm:$0xff] %v2659_v62  ;;  %2106 = vmatpush1.bf16.msra.mxu1 %v1079_v19  ;;  %v2479_v19 = vrot.slane %v3203_v46, %v2404_v1  ;;  %v1001_v62 = vunpack.c.l.s8.bf16 %v331_v17  ;;  %v429_v1 = vld [vmem:[#allocation2 + $0xbc0] sm:$0xff] }
 0x2e2   :  { %2278 = vmatpush1.bf16.msra.mxu0 %v921_v20  ;;  %2107 = vmatprep.subr.bf16.mxu1 %v1090_v23 }
 0x2e3   :  { %2279 = vmatprep.subr.bf16.mxu0 %v932_v53  ;;  %v1159_v53 = vunpack.c.l.s8.bf16 %v409_v14 }
 0x2e5   :  { %2108 = vmatpush1.bf16.msra.mxu1 %v1089_v51 }
 0x2e6   :  { %2280 = vmatpush1.bf16.msra.mxu0 %v931_v44  ;;  %2120 = vmatprep.subr.bf16.mxu1 %v1100_v27  ;;  %v1170_v44 = vunpack.c.h.s8.bf16 %v410_v48  ;;  %v1012_v27 = vunpack.c.h.s8.bf16 %v332_v5 }
 0x2e7   :  { %2292 = vmatprep.subr.bf16.mxu0 %v942_v28 }
 0x2e8   :  { %2110 = vmatmul.mubr.bf16.vlgmr.msra.gmra.mrb[8].mxu1 %v3238_v35 }
 0x2e9   :  { %2282 = vmatmul.mubr.bf16.vlgmr.msra.gmra.mrb[8].mxu0 %v3183_v60  ;;  %2121 = vmatpush1.bf16.msra.mxu1 %v1099_v29  ;;  %v1119_v60 = vunpack.c.l.s8.bf16 %v389_v41  ;;  %v342_v29 = vld [vmem:[#allocation2 + $0x908] sm:$0xff] }
 0x2ea   :  { %2293 = vmatpush1.bf16.msra.mxu0 %v941_v59  ;;  %2122 = vmatprep.subr.bf16.mxu1 %v1110_v30  ;;  %v1022_v41 = vunpack.c.l.s8.bf16 %v342_v29 }
 0x2eb   :  { %2294 = vmatprep.subr.bf16.mxu0 %v952_v31  ;;  %2152 = vmatprep.mubr.bf16.mxu1 %v3245_v40 }
 0x2ec   :  { %2324 = vmatprep.mubr.bf16.mxu0 %v3190_v24  ;;  %v321_v24 = vld [vmem:[#allocation2 + $0x860] sm:$0xff] }
 0x2ed   :  { %2123 = vmatpush1.bf16.msra.mxu1 %v1109_v36  ;;  %v981_v0 = vunpack.c.l.s8.bf16 %v321_v24  ;;  %v991_v10 = vunpack.c.h.s8.bf16 %v321_v24  ;;  %v1011_v36 = vunpack.c.h.s8.bf16 %v331_v17  ;;  %v1189_v24 = vunpack.c.h.s8.bf16 %v419_v47 }
 0x2ee   :  { %2295 = vmatpush1.bf16.msra.mxu0 %v951_v38  ;;  %2124 = vmatprep.subr.bf16.mxu1 %v1120_v8 }
 0x2ef   :  { %2296 = vmatprep.subr.bf16.mxu0 %v962_v39  ;;  %v1180_v39 = vunpack.c.l.s8.bf16 %v420_v9 }
 0x2f1   :  { %2125 = vmatpush1.bf16.msra.mxu1 %v1119_v60  ;;  %v341_v60 = vld [vmem:[#allocation2 + $0x900] sm:$0xff] }
 0x2f2   :  { %2297 = vmatpush1.bf16.msra.mxu0 %v961_v50  ;;  %2126 = vmatprep.subr.bf16.mxu1 %v1130_v52  ;;  %v1031_v61 = vunpack.c.h.s8.bf16 %v341_v60 }
 0x2f3   :  { %2298 = vmatprep.subr.bf16.mxu0 %v972_v54 }
 0x2f5   :  { %2127 = vmatpush1.bf16.msra.mxu1 %v1129_v18  ;;  %v1021_v18 = vunpack.c.l.s8.bf16 %v341_v60 }
 0x2f6   :  { %2299 = vmatpush1.bf16.msra.mxu0 %v971_v56  ;;  %2128 = vmatprep.subr.bf16.mxu1 %v1140_v45  ;;  %v1190_v56 = vunpack.c.h.s8.bf16 %v420_v9  ;;  %v1032_v45 = vunpack.c.h.s8.bf16 %v342_v29  ;;  %v372_v9 = vld [vmem:[#allocation2 + $0x9f8] sm:$0xff] }
 0x2f7   :  { %2300 = vmatprep.subr.bf16.mxu0 %v982_v57  ;;  %v430_v57 = vld [vmem:[#allocation2 + $0xbc8] sm:$0xff] }
 0x2f9   :  { %2129 = vmatpush1.bf16.msra.mxu1 %v1139_v63  ;;  %v1200_v63 = vunpack.c.l.s8.bf16 %v430_v57 }
 0x2fa   :  { %2301 = vmatpush1.bf16.msra.mxu0 %v981_v0  ;;  %2130 = vmatprep.subr.bf16.mxu1 %v1150_v2  ;;  %v1042_v0 = vunpack.c.l.s8.bf16 %v352_v58  ;;  %v351_v2 = vld [vmem:[#allocation2 + $0x950] sm:$0xff] }
 0x2fb   :  { %2302 = vmatprep.subr.bf16.mxu0 %v992_v4  ;;  %v1199_v4 = vunpack.c.l.s8.bf16 %v429_v1  ;;  %v1041_v48 = vunpack.c.l.s8.bf16 %v351_v2 }
 0x2fc   :  { %v1939_v32 = vpop.f32.mrb[4].mxu0 }
 0x2fd   :  { %v2436_v20 = vmul.f32 %v2401_v15, %v1939_v32  ;;  %v1941_v21 = vpop.f32.mrb[5].mxu0  ;;  %2131 = vmatpush1.bf16.msra.mxu1 %v1149_v49 }
 0x2fe   :  { %v2437_v22 = vmul.f32 %v2405_v6, %v1941_v21  ;;  %v1943_v23 = vpop.f32.mrb[6].mxu0  ;;  %2303 = vmatpush1.bf16.msra.mxu0 %v991_v10  ;;  %2132 = vmatprep.subr.bf16.mxu1 %v1160_v12  ;;  %v362_v12 = vld [vmem:[#allocation2 + $0x9a8] sm:$0xff] }
 0x2ff   :  { %v3255_v3 = vadd.f32 %v2475_v25, %v2436_v20  ;;  %v2446_v26 = vmul.f32 %v2401_v15, %v1943_v23  ;;  %v1945_v51 = vpop.f32.mrb[7].mxu0  ;;  %2304 = vmatprep.subr.bf16.mxu0 %v1002_v13  ;;  %v1210_v15 = vunpack.c.h.s8.bf16 %v430_v57  ;;  %v1051_v20 = vunpack.c.h.s8.bf16 %v351_v2  ;;  %v381_v57 = vld [vmem:[#allocation2 + $0xa40] sm:$0xff] }
 0x300   :  { %v3257_v28 = vadd.f32 %v2479_v19, %v2437_v22  ;;  %v2447_v43 = vmul.f32 %v2405_v6, %v1945_v51  ;;  %v1052_v6 = vunpack.c.h.s8.bf16 %v352_v58  ;;  %v1062_v23 = vunpack.c.l.s8.bf16 %v362_v12 }
 0x301   :  { %v2530_v59 = vsub.f32 0.0, %v3255_v3  ;;  %v3260_v30 = vadd.f32 %v2475_v25, %v2446_v26  ;;  %2133 = vmatpush1.bf16.msra.mxu1 %v1159_v53  ;;  %v440_v25 = vld [vmem:[#allocation2 + $0xc18] sm:$0xff]  ;;  %v439_v53 = vld [vmem:[#allocation2 + $0xc10] sm:$0xff] }
 0x302   :  { %v2531_v31 = vsub.f32 0.0, %v3257_v28  ;;  %v3263_v33 = vadd.f32 %v2479_v19, %v2447_v43  ;;  %2305 = vmatpush1.bf16.msra.mxu0 %v1001_v62  ;;  %2134 = vmatprep.subr.bf16.mxu1 %v1170_v44  ;;  %v1209_v19 = vunpack.c.h.s8.bf16 %v429_v1  ;;  %v1220_v22 = vunpack.c.l.s8.bf16 %v440_v25  ;;  %v361_v62 = vld [vmem:[#allocation2 + $0x9a0] sm:$0xff]  ;;  %v450_v43 = vld [vmem:[#allocation2 + $0xc68] sm:$0xff]  ;;  %v391_v1 = vld [vmem:[#allocation2 + $0xa90] sm:$0xff] }
 0x303   :  { %v2554_v38 = vmul.f32 1.442695, %v2530_v59  ;;  %v2540_v8 = vsub.f32 0.0, %v3260_v30  ;;  %2306 = vmatprep.subr.bf16.mxu0 %v1012_v27  ;;  %v1219_v26 = vunpack.c.l.s8.bf16 %v439_v53  ;;  %v1061_v51 = vunpack.c.l.s8.bf16 %v361_v62 }
 0x304   :  { %v2556_v50 = vmul.f32 1.442695, %v2531_v31  ;;  %v2541_v52 = vsub.f32 0.0, %v3263_v33  ;;  %v1230_v44 = vunpack.c.h.s8.bf16 %v440_v25  ;;  %v1072_v27 = vunpack.c.h.s8.bf16 %v362_v12  ;;  %v411_v12 = vld [vmem:[#allocation2 + $0xb30] sm:$0xff] }
 0x305   :  { %2833 = vpow2.f32 %v2554_v38  ;;  %v2574_v54 = vmul.f32 1.442695, %v2540_v8  ;;  %2135 = vmatpush1.bf16.msra.mxu1 %v1169_v34  ;;  %v1229_v29 = vunpack.c.h.s8.bf16 %v439_v53  ;;  %v1071_v59 = vunpack.c.h.s8.bf16 %v361_v62  ;;  %v371_v38 = vld [vmem:[#allocation2 + $0x9f0] sm:$0xff] }
 0x306   :  { %2835 = vpow2.f32 %v2556_v50  ;;  %v2576_v42 = vmul.f32 1.442695, %v2541_v52  ;;  %2307 = vmatpush1.bf16.msra.mxu0 %v1011_v36  ;;  %2136 = vmatprep.subr.bf16.mxu1 %v1180_v39  ;;  %v1240_v31 = vunpack.c.l.s8.bf16 %v450_v43  ;;  %v1082_v34 = vunpack.c.l.s8.bf16 %v372_v9  ;;  %v449_v36 = vld [vmem:[#allocation2 + $0xc60] sm:$0xff] }
 0x307   :  { %2837 = vpow2.f32 %v2574_v54  ;;  %2308 = vmatprep.subr.bf16.mxu0 %v1022_v41  ;;  %v1239_v50 = vunpack.c.l.s8.bf16 %v449_v36  ;;  %v1081_v52 = vunpack.c.l.s8.bf16 %v371_v38  ;;  %v1121_v2 = vunpack.c.l.s8.bf16 %v391_v1 }
 0x308   :  { %2839 = vpow2.f32 %v2576_v42 }
 0x309   :  { %2137 = vmatpush1.bf16.msra.mxu1 %v1179_v55  ;;  %v1250_v55 = vunpack.c.h.s8.bf16 %v450_v43 }
 0x30a   :  { %2309 = vmatpush1.bf16.msra.mxu0 %v1021_v18  ;;  %2138 = vmatprep.subr.bf16.mxu1 %v1190_v56  ;;  %v1092_v18 = vunpack.c.h.s8.bf16 %v372_v9  ;;  %v1091_v56 = vunpack.c.h.s8.bf16 %v371_v38 }
 0x30b   :  { %2310 = vmatprep.subr.bf16.mxu0 %v1032_v45 }
 0x30d   :  { %2139 = vmatpush1.bf16.msra.mxu1 %v1189_v24  ;;  %v392_v24 = vld [vmem:[#allocation2 + $0xa98] sm:$0xff] }
 0x30e   :  { %2311 = vmatpush1.bf16.msra.mxu0 %v1031_v61  ;;  %2140 = vmatprep.subr.bf16.mxu1 %v1200_v63  ;;  %v3286_v61 = vld [vmem:[%s3329_s0 + $0x20] ss:$40 sps:$4 sm:$0xff]   ;;  %v1111_v63 = vunpack.c.h.s8.bf16 %v381_v57 }
 0x30f   :  { %v2834_v5 = vpop.eup %2833  ;;  %2312 = vmatprep.subr.bf16.mxu0 %v1042_v0  ;;  %v1122_v0 = vunpack.c.l.s8.bf16 %v392_v24 }
 0x310   :  { %v2836_v49 = vpop.eup %2835  ;;  %v2590_v10 = vadd.f32 1.0, %v2834_v5  ;;  %v1131_v5 = vunpack.c.h.s8.bf16 %v391_v1 }
 0x311   :  { %v2838_v13 = vpop.eup %2837  ;;  %v2591_v14 = vadd.f32 1.0, %v2836_v49  ;;  %2141 = vmatpush1.bf16.msra.mxu1 %v1199_v4  ;;  %v1132_v4 = vunpack.c.h.s8.bf16 %v392_v24 }
 0x312   :  { %v2840_v17 = vpop.eup %2839  ;;  %2841 = vrcp.f32 %v2590_v10  ;;  %v2600_v32 = vadd.f32 1.0, %v2838_v13  ;;  %2313 = vmatpush1.bf16.msra.mxu0 %v1041_v48  ;;  %2142 = vmatprep.subr.bf16.mxu1 %v1210_v15  ;;  %v402_v48 = vld [vmem:[#allocation2 + $0xae8] sm:$0xff]  ;;  %v412_v10 = vld [vmem:[#allocation2 + $0xb38] sm:$0xff]  ;;  %v1161_v13 = vunpack.c.l.s8.bf16 %v411_v12 }
 0x313   :  { %2843 = vrcp.f32 %v2591_v14  ;;  %v2601_v21 = vadd.f32 1.0, %v2840_v17  ;;  %2314 = vmatprep.subr.bf16.mxu0 %v1052_v6  ;;  %v1142_v15 = vunpack.c.l.s8.bf16 %v402_v48  ;;  %v401_v6 = vld [vmem:[#allocation2 + $0xae0] sm:$0xff]  ;;  %v1162_v25 = vunpack.c.l.s8.bf16 %v412_v10  ;;  %v422_v17 = vld [vmem:[#allocation2 + $0xb88] sm:$0xff] }
 0x314   :  { %2845 = vrcp.f32 %v2600_v32  ;;  %v1141_v49 = vunpack.c.l.s8.bf16 %v401_v6  ;;  %v1172_v14 = vunpack.c.h.s8.bf16 %v412_v10  ;;  %v1171_v32 = vunpack.c.h.s8.bf16 %v411_v12 }
 0x315   :  { %2847 = vrcp.f32 %v2601_v21  ;;  %2143 = vmatpush1.bf16.msra.mxu1 %v1209_v19  ;;  %v1182_v19 = vunpack.c.l.s8.bf16 %v422_v17 }
 0x316   :  { %2315 = vmatpush1.bf16.msra.mxu0 %v1051_v20  ;;  %2144 = vmatprep.subr.bf16.mxu1 %v1220_v22  ;;  %v421_v20 = vld [vmem:[#allocation2 + $0xb80] sm:$0xff]  ;;  %v1192_v22 = vunpack.c.h.s8.bf16 %v422_v17 }
 0x317   :  { %2316 = vmatprep.subr.bf16.mxu0 %v1062_v23  ;;  %v1181_v21 = vunpack.c.l.s8.bf16 %v421_v20  ;;  %v432_v23 = vld [vmem:[#allocation2 + $0xbd8] sm:$0xff]  ;;  %v1191_v53 = vunpack.c.h.s8.bf16 %v421_v20 }
 0x318   :  { %v1202_v62 = vunpack.c.l.s8.bf16 %v432_v23 }
 0x319   :  { %2145 = vmatpush1.bf16.msra.mxu1 %v1219_v26  ;;  %v431_v26 = vld [vmem:[#allocation2 + $0xbd0] sm:$0xff] }
 0x31a   :  { %2317 = vmatpush1.bf16.msra.mxu0 %v1061_v51  ;;  %2146 = vmatprep.subr.bf16.mxu1 %v1230_v44  ;;  %v1201_v51 = vunpack.c.l.s8.bf16 %v431_v26  ;;  %v1212_v44 = vunpack.c.h.s8.bf16 %v432_v23  ;;  %v1211_v43 = vunpack.c.h.s8.bf16 %v431_v26  ;;  %v2453_v23 = vld [vmem:[%s3332_s3 + $0x8] sm:$0x3] }
 0x31b   :  { %2318 = vmatprep.subr.bf16.mxu0 %v1072_v27  ;;  %v442_v27 = vld [vmem:[#allocation2 + $0xc28] sm:$0xff]  ;;  %v2491_v26 = vrot.slane %v2453_v23, %v3094_v11 }
 0x31c   :  { %v2842_v8 = vpop.eup %2841  ;;  %v1222_v9 = vunpack.c.l.s8.bf16 %v442_v27 }
 0x31d   :  { %v2844_v39 = vpop.eup %2843  ;;  %v2650_v41 = vmul.f32 %v2842_v8, %v3255_v3  ;;  %2147 = vmatpush1.bf16.msra.mxu1 %v1229_v29  ;;  %v441_v29 = vld [vmem:[#allocation2 + $0xc20] sm:$0xff]  ;;  %v451_v8 = vld [vmem:[#allocation2 + $0xc70] sm:$0xff] }
 0x31e   :  { %v2846_v47 = vpop.eup %2845  ;;  %v2651_v60 = vmul.f32 %v2844_v39, %v3257_v28  ;;  %2319 = vmatpush1.bf16.msra.mxu0 %v1071_v59  ;;  %2148 = vmatprep.subr.bf16.mxu1 %v1240_v31  ;;  %v382_v28 = vld [vmem:[#allocation2 + $0xa48] sm:$0xff]  ;;  %v1221_v59 = vunpack.c.l.s8.bf16 %v441_v29  ;;  %v1232_v31 = vunpack.c.h.s8.bf16 %v442_v27  ;;  %v1241_v39 = vunpack.c.l.s8.bf16 %v451_v8 }
 0x31f   :  { %v2848_v54 = vpop.eup %2847  ;;  %2670 = vst [vmem:[%s3333_s4 + $0x20] sm:$0xff] %v2650_v41  ;;  %v2660_v42 = vmul.f32 %v2846_v47, %v3260_v30  ;;  %2320 = vmatprep.subr.bf16.mxu0 %v1082_v34  ;;  %v1249_v30 = vunpack.c.h.s8.bf16 %v449_v36  ;;  %v1102_v45 = vunpack.c.l.s8.bf16 %v382_v28  ;;  %v1112_v58 = vunpack.c.h.s8.bf16 %v382_v28  ;;  %v452_v34 = vld [vmem:[#allocation2 + $0xc78] sm:$0xff] }
 0x320   :  { %2671 = vst [vmem:[%s3333_s4 + $0x28] sm:$0xff] %v2651_v60  ;;  %v2661_v3 = vmul.f32 %v2848_v54, %v3263_v33  ;;  %v1101_v33 = vunpack.c.l.s8.bf16 %v381_v57  ;;  %v1231_v36 = vunpack.c.h.s8.bf16 %v441_v29  ;;  %v1242_v38 = vunpack.c.l.s8.bf16 %v452_v34 }
 0x321   :  { %2680 = vst [vmem:[%s3333_s4 + $0x70] sm:$0xff] %v2660_v42  ;;  %2149 = vmatpush1.bf16.msra.mxu1 %v1239_v50  ;;  %v1252_v41 = vunpack.c.h.s8.bf16 %v452_v34  ;;  %v1251_v47 = vunpack.c.h.s8.bf16 %v451_v8  ;;  %v2408_v60 = vsub.s32 6, %v3091_v7  ;;  %v2412_v50 = vsub.s32 7, %v3091_v7 }
 0x322   :  { %2681 = vst [vmem:[%s3333_s4 + $0x78] sm:$0xff] %v2661_v3  ;;  %2321 = vmatpush1.bf16.msra.mxu0 %v1081_v52  ;;  %2150 = vmatprep.subr.bf16.mxu1 %v1250_v55 }
 0x323   :  { %2322 = vmatprep.subr.bf16.mxu0 %v1092_v18  ;;  %v2409_v52 = vrot.slane %v3196_v37, %v2408_v60  ;;  %v2413_v54 = vrot.slane %v3196_v37, %v2412_v50  ;;  %v2483_v42 = vrot.slane %v3203_v46, %v2408_v60  ;;  %v2487_v18 = vrot.slane %v3203_v46, %v2412_v50 }
 0x325   :  { %2151 = vmatpush1.bf16.msra.mxu1 %v1249_v30 }
 0x326   :  { %2323 = vmatpush1.bf16.msra.mxu0 %v1091_v56 }
 0x327   :  { %2335 = vmatprep.subr.bf16.mxu0 %v1102_v45 }
 0x328   :  { %2153 = vmatmul.mubr.bf16.vlgmr.msra.gmra.mrb[8].mxu1 %v3286_v61 }
 0x329   :  { %2325 = vmatmul.mubr.bf16.vlgmr.msra.gmra.mrb[8].mxu0 %v3238_v35  ;;  %v1152_v35 = vunpack.c.h.s8.bf16 %v402_v48 }
 0x32a   :  { %2336 = vmatpush1.bf16.msra.mxu0 %v1101_v33  ;;  %2367 = vmatprep.mubr.bf16.mxu0 %v3245_v40  ;;  %v1151_v40 = vunpack.c.h.s8.bf16 %v401_v6 }
 0x32b   :  { %2337 = vmatprep.subr.bf16.mxu0 %v1112_v58 }
 0x32e   :  { %2338 = vmatpush1.bf16.msra.mxu0 %v1111_v63 }
 0x32f   :  { %2339 = vmatprep.subr.bf16.mxu0 %v1122_v0 }
 0x332   :  { %2340 = vmatpush1.bf16.msra.mxu0 %v1121_v2 }
 0x333   :  { %2341 = vmatprep.subr.bf16.mxu0 %v1132_v4 }
 0x336   :  { %2342 = vmatpush1.bf16.msra.mxu0 %v1131_v5 }
 0x337   :  { %2343 = vmatprep.subr.bf16.mxu0 %v1142_v15 }
 0x33a   :  { %2344 = vmatpush1.bf16.msra.mxu0 %v1141_v49 }
 0x33b   :  { %2345 = vmatprep.subr.bf16.mxu0 %v1152_v35 }
 0x33e   :  { %2346 = vmatpush1.bf16.msra.mxu0 %v1151_v40 }
 0x33f   :  { %2347 = vmatprep.subr.bf16.mxu0 %v1162_v25 }
 0x342   :  { %2348 = vmatpush1.bf16.msra.mxu0 %v1161_v13 }
 0x343   :  { %2349 = vmatprep.subr.bf16.mxu0 %v1172_v14 }
 0x346   :  { %2350 = vmatpush1.bf16.msra.mxu0 %v1171_v32 }
 0x347   :  { %2351 = vmatprep.subr.bf16.mxu0 %v1182_v19 }
 0x34a   :  { %2352 = vmatpush1.bf16.msra.mxu0 %v1181_v21 }
 0x34b   :  { %2353 = vmatprep.subr.bf16.mxu0 %v1192_v22  ;;  %v2379_v22 = vld [vmem:[#allocation4 + $0x8] sm:$0x3] }
 0x34e   :  { %2354 = vmatpush1.bf16.msra.mxu0 %v1191_v53  ;;  %v2417_v53 = vrot.slane %v2379_v22, %v3094_v11 }
 0x34f   :  { %2355 = vmatprep.subr.bf16.mxu0 %v1202_v62  ;;  %v2421_v62 = vrot.slane %v2379_v22, %v3097_v16 }
 0x352   :  { %2356 = vmatpush1.bf16.msra.mxu0 %v1201_v51 }
 0x353   :  { %2357 = vmatprep.subr.bf16.mxu0 %v1212_v44  ;;  %v2495_v44 = vrot.slane %v2453_v23, %v3097_v16 }
 0x356   :  { %2358 = vmatpush1.bf16.msra.mxu0 %v1211_v43 }
 0x357   :  { %2359 = vmatprep.subr.bf16.mxu0 %v1222_v9 }
 0x35a   :  { %2360 = vmatpush1.bf16.msra.mxu0 %v1221_v59 }
 0x35b   :  { %2361 = vmatprep.subr.bf16.mxu0 %v1232_v31 }
 0x35e   :  { %2362 = vmatpush1.bf16.msra.mxu0 %v1231_v36 }
 0x35f   :  { %2363 = vmatprep.subr.bf16.mxu0 %v1242_v38 }
 0x362   :  { %2364 = vmatpush1.bf16.msra.mxu0 %v1241_v39 }
 0x363   :  { %2365 = vmatprep.subr.bf16.mxu0 %v1252_v41 }
 0x366   :  { %2366 = vmatpush1.bf16.msra.mxu0 %v1251_v47 }
 0x369   :  { %2368 = vmatmul.mubr.bf16.vlgmr.msra.gmra.mrb[8].mxu0 %v3286_v61 }
 0x3fb   :  { %v2154_v55 = vpop.f32.mrb[8].mxu1 }
 0x3fc   :  { %v2438_v3 = vmul.f32 %v2409_v52, %v2154_v55  ;;  %v2156_v28 = vpop.f32.mrb[9].mxu1 }
 0x3fd   :  { %v2439_v30 = vmul.f32 %v2413_v54, %v2156_v28  ;;  %v2158_v56 = vpop.f32.mrb[10].mxu1 }
 0x3fe   :  { %v2512_v45 = vadd.f32 %v2483_v42, %v2438_v3  ;;  %v2448_v57 = vmul.f32 %v2409_v52, %v2158_v56  ;;  %v2160_v33 = vpop.f32.mrb[11].mxu1 }
 0x3ff   :  { %v2513_v58 = vadd.f32 %v2487_v18, %v2439_v30  ;;  %v2449_v24 = vmul.f32 %v2413_v54, %v2160_v33 }
 0x400   :  { %v2532_v61 = vsub.f32 0.0, %v2512_v45  ;;  %v2522_v7 = vadd.f32 %v2483_v42, %v2448_v57 }
 0x401   :  { %v2533_v63 = vsub.f32 0.0, %v2513_v58  ;;  %v2523_v0 = vadd.f32 %v2487_v18, %v2449_v24 }
 0x402   :  { %v2558_v1 = vmul.f32 1.442695, %v2532_v61  ;;  %v2542_v37 = vsub.f32 0.0, %v2522_v7 }
 0x403   :  { %v2560_v2 = vmul.f32 1.442695, %v2533_v63  ;;  %v2543_v4 = vsub.f32 0.0, %v2523_v0 }
 0x404   :  { %2849 = vpow2.f32 %v2558_v1  ;;  %v2578_v48 = vmul.f32 1.442695, %v2542_v37 }
 0x405   :  { %2851 = vpow2.f32 %v2560_v2  ;;  %v2580_v46 = vmul.f32 1.442695, %v2543_v4 }
 0x406   :  { %2853 = vpow2.f32 %v2578_v48 }
 0x407   :  { %2855 = vpow2.f32 %v2580_v46 }
 0x40e   :  { %v2850_v5 = vpop.eup %2849 }
 0x40f   :  { %v2852_v15 = vpop.eup %2851  ;;  %v2592_v6 = vadd.f32 1.0, %v2850_v5 }
 0x410   :  { %v2854_v49 = vpop.eup %2853  ;;  %v2593_v35 = vadd.f32 1.0, %v2852_v15 }
 0x411   :  { %v2856_v10 = vpop.eup %2855  ;;  %2857 = vrcp.f32 %v2592_v6  ;;  %v2602_v40 = vadd.f32 1.0, %v2854_v49 }
 0x412   :  { %2859 = vrcp.f32 %v2593_v35  ;;  %v2603_v25 = vadd.f32 1.0, %v2856_v10 }
 0x413   :  { %2861 = vrcp.f32 %v2602_v40 }
 0x414   :  { %2863 = vrcp.f32 %v2603_v25 }
 0x41b   :  { %v2858_v12 = vpop.eup %2857 }
 0x41c   :  { %v2860_v13 = vpop.eup %2859  ;;  %v2652_v14 = vmul.f32 %v2858_v12, %v2512_v45 }
 0x41d   :  { %v2862_v17 = vpop.eup %2861  ;;  %v2653_v32 = vmul.f32 %v2860_v13, %v2513_v58 }
 0x41e   :  { %v2864_v19 = vpop.eup %2863  ;;  %2672 = vst [vmem:[%s3333_s4 + $0x30] sm:$0xff] %v2652_v14  ;;  %v2662_v20 = vmul.f32 %v2862_v17, %v2522_v7 }
 0x41f   :  { %2673 = vst [vmem:[%s3333_s4 + $0x38] sm:$0xff] %v2653_v32  ;;  %v2663_v21 = vmul.f32 %v2864_v19, %v2523_v0 }
 0x420   :  { %2682 = vst [vmem:[%s3333_s4 + $0x80] sm:$0xff] %v2662_v20 }
 0x421   :  { %2683 = vst [vmem:[%s3333_s4 + $0x88] sm:$0xff] %v2663_v21 }
 0x43c   :  { %v2369_v51 = vpop.f32.mrb[8].mxu0 }
 0x43d   :  { %v2440_v27 = vmul.f32 %v2417_v53, %v2369_v51  ;;  %v2371_v43 = vpop.f32.mrb[9].mxu0 }
 0x43e   :  { %v2441_v9 = vmul.f32 %v2421_v62, %v2371_v43  ;;  %v2373_v29 = vpop.f32.mrb[10].mxu0 }
 0x43f   :  { %v2514_v59 = vadd.f32 %v2491_v26, %v2440_v27  ;;  %v2450_v31 = vmul.f32 %v2417_v53, %v2373_v29  ;;  %v2375_v34 = vpop.f32.mrb[11].mxu0 }
 0x440   :  { %v2515_v36 = vadd.f32 %v2495_v44, %v2441_v9  ;;  %v2451_v38 = vmul.f32 %v2421_v62, %v2375_v34 }
 0x441   :  { %v2534_v8 = vsub.f32 0.0, %v2514_v59  ;;  %v2524_v39 = vadd.f32 %v2491_v26, %v2450_v31 }
 0x442   :  { %v2535_v41 = vsub.f32 0.0, %v2515_v36  ;;  %v2525_v47 = vadd.f32 %v2495_v44, %v2451_v38 }
 0x443   :  { %v2562_v60 = vmul.f32 1.442695, %v2534_v8  ;;  %v2544_v50 = vsub.f32 0.0, %v2524_v39 }
 0x444   :  { %v2564_v52 = vmul.f32 1.442695, %v2535_v41  ;;  %v2545_v11 = vsub.f32 0.0, %v2525_v47 }
 0x445   :  { %2865 = vpow2.f32 %v2562_v60  ;;  %v2582_v54 = vmul.f32 1.442695, %v2544_v50 }
 0x446   :  { %2867 = vpow2.f32 %v2564_v52  ;;  %v2584_v16 = vmul.f32 1.442695, %v2545_v11 }
 0x447   :  { %2869 = vpow2.f32 %v2582_v54 }
 0x448   :  { %2871 = vpow2.f32 %v2584_v16 }
 0x44f   :  { %v2866_v42 = vpop.eup %2865 }
 0x450   :  { %v2868_v55 = vpop.eup %2867  ;;  %v2594_v18 = vadd.f32 1.0, %v2866_v42 }
 0x451   :  { %v2870_v3 = vpop.eup %2869  ;;  %v2595_v28 = vadd.f32 1.0, %v2868_v55 }
 0x452   :  { %v2872_v30 = vpop.eup %2871  ;;  %2873 = vrcp.f32 %v2594_v18  ;;  %v2604_v56 = vadd.f32 1.0, %v2870_v3 }
 0x453   :  { %2875 = vrcp.f32 %v2595_v28  ;;  %v2605_v45 = vadd.f32 1.0, %v2872_v30 }
 0x454   :  { %2877 = vrcp.f32 %v2604_v56 }
 0x455   :  { %2879 = vrcp.f32 %v2605_v45 }
 0x45c   :  { %v2874_v57 = vpop.eup %2873 }
 0x45d   :  { %v2876_v33 = vpop.eup %2875  ;;  %v2654_v58 = vmul.f32 %v2874_v57, %v2514_v59 }
 0x45e   :  { %v2878_v24 = vpop.eup %2877  ;;  %v2655_v61 = vmul.f32 %v2876_v33, %v2515_v36 }
 0x45f   :  { %v2880_v7 = vpop.eup %2879  ;;  %2674 = vst [vmem:[%s3333_s4 + $0x40] sm:$0xff] %v2654_v58  ;;  %v2664_v63 = vmul.f32 %v2878_v24, %v2524_v39 }
 0x460   :  { %2675 = vst [vmem:[%s3333_s4 + $0x48] sm:$0xff] %v2655_v61  ;;  %v2665_v0 = vmul.f32 %v2880_v7, %v2525_v47 }
 0x461   :  { %2684 = vst [vmem:[%s3333_s4 + $0x90] sm:$0xff] %v2664_v63 }
 0x462   :  { %2685 = vst [vmem:[%s3333_s4 + $0x98] sm:$0xff] %v2665_v0 }
 0x463   :  { %2690 = vsyncpa [#allocation3], 1 }
 0x464   :  { %2691 = vsyncpa [#allocation5], 1 }

</bundles_post_ra>
